<compile_context>
chip_gen: v7x
topology: tpu7x:2x2x1
jax: 0.10.0
libtpu: 0.0.40
codegen_flags: <defaults>
</compile_context>

<pallas_src>
import functools

import jax
import jax.numpy as jnp
import numpy as np
from jax.experimental import pallas as pl
from jax.experimental.pallas import tpu as pltpu


# ----------------------------------------------------------------------------
# Fused Pallas kernel: entire SincNet forward for the whole batch
# ----------------------------------------------------------------------------
def sincnet_fused_kernel(
    x_ref,
    w1_ref, b1_ref, g1_ref, be1_ref,
    w2_ref, b2_ref, g2_ref, be2_ref,
    w3_ref, b3_ref, g3_ref, be3_ref,
    w4_ref, b4_ref, bg4_ref, bb4_ref,
    w5_ref, b5_ref, bg5_ref, bb5_ref,
    w6_ref, b6_ref, bg6_ref, bb6_ref,
    w7_ref, b7_ref,
    o_ref,
    conv1_ref, act1_ref, conv2_ref, act2_ref, conv3_ref, act3_ref,
    *, batch, pool_k, slope, eps):
  """Whole SincNet forward in one kernel invocation.

  Activations are 2-D (batch*length, channels) slabs in VMEM (length on
  sublanes, channels on lanes).  Each conv layer is ONE matmul of the
  lane-concatenated shifted views against a fused (K*Cin, Cout) weight;
  MaxPool1d is pk strided sublane reads + jnp.maximum; LayerNorm is
  per-sample; the FC/BN/softmax stack runs on the same VMEM-resident data.
  """

  def lrelu(v):
    return jnp.where(v > 0, v, slope * v)

  def conv_pool_ln_block(in_ref, conv_ref, out_ref, w_ref, b_ref, g_ref,
                         be_ref, pk):
    rows_in, c_in = in_ref.shape
    l_in = rows_in // batch
    kc, c_out = w_ref.shape
    k_size = kc // c_in
    l_out = l_in - k_size + 1
    l_p = l_out // pk                       # MaxPool1d floor mode
    r_full = rows_in - k_size + 1

    # Conv1d (cross-correlation) as a SINGLE matmul: lane-concatenate the K
    # shifted whole-batch views (im2col on the fly) and multiply by the fused
    # (K*Cin, Cout) weight.  Boundary-straddling rows are garbage but are
    # never read back (see pooling read ranges below).
    taps = [in_ref[pl.ds(k, r_full), :] for k in range(k_size)]
    patches = jnp.concatenate(taps, axis=1) if k_size > 1 else taps[0]
    acc = jnp.dot(patches, w_ref[...], preferred_element_type=jnp.float32)
    conv_ref[...] = lrelu(acc + b_ref[...])

    gamma = g_ref[...]
    beta = be_ref[...]
    inv_n = 1.0 / (l_p * c_out)

    # MaxPool1d(pk) per sample: pk strided sublane reads + running maximum.
    # Valid read range per sample is [b*l_in, b*l_in + l_out), which the
    # strided slices never leave (max index = b*l_in + l_p*pk - 1).
    for b in range(batch):
      pooled = conv_ref[pl.ds(b * l_in, l_p, stride=pk), :]
      for p in range(1, pk):
        pooled = jnp.maximum(
            pooled, conv_ref[pl.ds(b * l_in + p, l_p, stride=pk), :])

      # Per-sample LayerNorm over the whole (C, L) slab + elementwise affine.
      mean = jnp.sum(jnp.sum(pooled, axis=1, keepdims=True),
                     axis=0, keepdims=True) * inv_n
      d = pooled - mean
      var = jnp.sum(jnp.sum(d * d, axis=1, keepdims=True),
                    axis=0, keepdims=True) * inv_n
      out_ref[pl.ds(b * l_p, l_p), :] = (
          d * jax.lax.rsqrt(var + eps) * gamma + beta)
    return l_p, c_out

  # --- conv blocks 1..3 (SincConv filter bank has zero bias) ---
  conv_pool_ln_block(x_ref, conv1_ref, act1_ref, w1_ref, b1_ref, g1_ref,
                     be1_ref, pool_k[0])
  conv_pool_ln_block(act1_ref, conv2_ref, act2_ref, w2_ref, b2_ref, g2_ref,
                     be2_ref, pool_k[1])
  lp3, c3 = conv_pool_ln_block(act2_ref, conv3_ref, act3_ref, w3_ref, b3_ref,
                               g3_ref, be3_ref, pool_k[2])

  # --- fc4 without any flatten: for each length position j, a strided read
  # (stride = lp3) gathers row j of every sample, contracted against the
  # matching (c3, fc0) block of the length-major-permuted fc4 weight. ---
  y = jnp.dot(act3_ref[pl.ds(0, batch, stride=lp3), :],
              w4_ref[pl.ds(0, c3), :], preferred_element_type=jnp.float32)
  for j in range(1, lp3):
    y = y + jnp.dot(act3_ref[pl.ds(j, batch, stride=lp3), :],
                    w4_ref[pl.ds(j * c3, c3), :],
                    preferred_element_type=jnp.float32)
  y = y + b4_ref[...]

  # --- BatchNorm1d (training-mode batch stats) + LeakyReLU + fc5..fc7 ---
  def batchnorm(v, g, bt):
    m = jnp.mean(v, axis=0, keepdims=True)
    var = jnp.mean((v - m) ** 2, axis=0, keepdims=True)     # biased variance
    return (v - m) * jax.lax.rsqrt(var + eps) * g + bt

  y = lrelu(batchnorm(y, bg4_ref[...], bb4_ref[...]))
  y = jnp.dot(y, w5_ref[...], preferred_element_type=jnp.float32) + b5_ref[...]
  y = lrelu(batchnorm(y, bg5_ref[...], bb5_ref[...]))
  y = jnp.dot(y, w6_ref[...], preferred_element_type=jnp.float32) + b6_ref[...]
  y = lrelu(batchnorm(y, bg6_ref[...], bb6_ref[...]))
  y = jnp.dot(y, w7_ref[...], preferred_element_type=jnp.float32) + b7_ref[...]
  y = lrelu(y)

  # Softmax over dim=1; reciprocal goes to the (otherwise idle) EUP slot.
  ymax = jnp.max(y, axis=1, keepdims=True)
  e = jnp.exp(y - ymax)
  denom = jnp.sum(e, axis=1, keepdims=True)
  o_ref[...] = e * pl.reciprocal(denom, approx=True)


# ----------------------------------------------------------------------------
# Wrapper: layout plumbing (done once per call, all tiny) + pallas_call
# ----------------------------------------------------------------------------
def calc_convpool1d_shape(n_filters, len_before, conv_k, pool_k):
  return [n_filters, (len_before - conv_k + 1) // pool_k]


def sincnet_forward(x_ncl, params, cfg):
  slope = cfg["lrelu_slope"]
  ck, pk, nf = cfg["conv_k"], cfg["pool_k"], cfg["conv_n_filters"]
  fc = cfg["fc_sizes"]
  n_classes = cfg["n_classes"]
  B, c_in, l_in = x_ncl.shape

  shape1 = calc_convpool1d_shape(nf[0], l_in, ck[0], pk[0])
  shape2 = calc_convpool1d_shape(nf[1], shape1[1], ck[1], pk[1])
  shape3 = calc_convpool1d_shape(nf[2], shape2[1], ck[2], pk[2])
  lp1, lp2, lp3 = shape1[1], shape2[1], shape3[1]
  c3 = nf[2]
  flat = c3 * lp3

  # Boundary layout work (outside the kernel, all tiny):
  x2d = jnp.transpose(x_ncl, (0, 2, 1)).reshape(B * l_in, c_in)   # NCL->(B*L,C)

  def fuse_conv_w(w):                 # torch (Cout, Cin, K) -> (K*Cin, Cout)
    co, ci, k = w.shape
    return jnp.transpose(w, (2, 1, 0)).reshape(k * ci, co)

  w1 = fuse_conv_w(params["w1"])
  w2 = fuse_conv_w(params["w2"])
  w3 = fuse_conv_w(params["w3"])
  g1, be1 = params["ln1_g"].T, params["ln1_b"].T                  # (Lp, C)
  g2, be2 = params["ln2_g"].T, params["ln2_b"].T
  g3, be3 = params["ln3_g"].T, params["ln3_b"].T
  # torch.flatten(out, 1) is channel-major (index c*lp3 + j); the kernel
  # consumes length-major blocks, so permute fc4 input rows once here:
  # w4_lc[j*C + c] = w4[c*lp3 + j].
  w4_lc = params["w4"].reshape(c3, lp3, fc[0]).transpose(1, 0, 2).reshape(
      flat, fc[0])

  kernel = functools.partial(
      sincnet_fused_kernel, batch=B, pool_k=tuple(pk), slope=slope, eps=1e-5)

  vmem = pl.BlockSpec(memory_space=pltpu.MemorySpace.VMEM)
  args = (x2d,
          w1, params["b1"].reshape(1, -1), g1, be1,
          w2, params["b2"].reshape(1, -1), g2, be2,
          w3, params["b3"].reshape(1, -1), g3, be3,
          w4_lc, params["b4"], params["bn4_g"], params["bn4_b"],
          params["w5"], params["b5"], params["bn5_g"], params["bn5_b"],
          params["w6"], params["b6"], params["bn6_g"], params["bn6_b"],
          params["w7"], params["b7"])

  return pl.pallas_call(
      kernel,
      in_specs=[vmem] * len(args),
      out_specs=vmem,
      out_shape=jax.ShapeDtypeStruct((B, n_classes), jnp.float32),
      scratch_shapes=[
          pltpu.VMEM((B * l_in - ck[0] + 1, nf[0]), jnp.float32),  # conv1 out
          pltpu.VMEM((B * lp1, nf[0]), jnp.float32),               # block1 act
          pltpu.VMEM((B * lp1 - ck[1] + 1, nf[1]), jnp.float32),   # conv2 out
          pltpu.VMEM((B * lp2, nf[1]), jnp.float32),               # block2 act
          pltpu.VMEM((B * lp2 - ck[2] + 1, nf[2]), jnp.float32),   # conv3 out
          pltpu.VMEM((B * lp3, nf[2]), jnp.float32),               # block3 act
      ],
      compiler_params=pltpu.CompilerParams(
          vmem_limit_bytes=32 * 1024 * 1024),
  )(*args)


# ---- SincConvMC parameter setup (plain JAX glue, init-time only) -------------
def f_to_m(f):
  return 2595.0 * jnp.log10(1.0 + f / 700.0)


def m_to_f(m):
  return 700.0 * (jnp.power(10.0, m / 2595.0) - 1.0)


def init_sinc_params(key, out_channels, fs=16000.0):
  k1, k2 = jax.random.split(key)
  m_low = f_to_m(jnp.float32(0.0))
  m_high = f_to_m(jnp.float32(fs / 2.0))
  m1 = jax.random.uniform(k1, (out_channels,)) * (m_high - m_low) / 2 + m_low
  m2 = m1 + jnp.abs(jax.random.uniform(k2, (out_channels,)) * (m_high - m_low) / 2
                    + m_low - m1)
  m1 = m1 / 2
  f1 = m_to_f(m1)
  f2 = m_to_f(m2)
  return f1 / fs, (f2 - f1) / fs                                 # (__f1, __fb)


def sinc_filters(f1_param, fb_param, kernel_size, in_channels):
  """SincConvMC filter bank g_ready: (Cout, Cin, K).

  torch.sinc(x) == jnp.sinc(x) == sin(pi*x)/(pi*x), so jnp.sinc(2*pi*f*n)
  reproduces the reference torch.sinc(2*np.pi*f_space) exactly.
  """
  n_space = jnp.arange(kernel_size, dtype=jnp.float32) - (kernel_size - 1) / 2.0
  # torch.hamming_window default (periodic): 0.54 - 0.46*cos(2*pi*n/K)
  window = 0.54 - 0.46 * jnp.cos(
      2.0 * jnp.pi * jnp.arange(kernel_size, dtype=jnp.float32) / kernel_size)
  f1_abs = jnp.abs(f1_param)
  f2_abs = f1_abs + fb_param
  f1_space = f1_abs[:, None] * n_space[None, :]
  f2_space = f2_abs[:, None] * n_space[None, :]
  g = 2.0 * (f2_abs[:, None] * jnp.sinc(2.0 * np.pi * f2_space)
             - f1_abs[:, None] * jnp.sinc(2.0 * np.pi * f1_space)) * window[None, :]
  return jnp.tile(g[:, None, :], (1, in_channels, 1))             # (Cout, Cin, K)


# ----------------------------------------------------------------------------
# Parameter construction (random, torch-layout) and demo
# ----------------------------------------------------------------------------
def build_params(key, cfg):
  in_channels = cfg["in_channels"]
  in_size = cfg["in_size"]
  nf = cfg["conv_n_filters"]
  ck = cfg["conv_k"]
  pk = cfg["pool_k"]
  fc = cfg["fc_sizes"]
  n_classes = cfg["n_classes"]

  shape1 = calc_convpool1d_shape(nf[0], in_size, ck[0], pk[0])
  shape2 = calc_convpool1d_shape(nf[1], shape1[1], ck[1], pk[1])
  shape3 = calc_convpool1d_shape(nf[2], shape2[1], ck[2], pk[2])

  keys = jax.random.split(key, 16)
  params = {}

  # conv1: SincConvMC (do_sincconv=True) -> sinc filter bank, no bias.
  f1_p, fb_p = init_sinc_params(keys[0], nf[0])
  params["w1"] = sinc_filters(f1_p, fb_p, ck[0], in_channels)
  params["b1"] = jnp.zeros((nf[0],), jnp.float32)
  params["ln1_g"] = jnp.ones(tuple(shape1), jnp.float32)
  params["ln1_b"] = jnp.zeros(tuple(shape1), jnp.float32)

  params["w2"] = 0.1 * jax.random.normal(keys[1], (nf[1], nf[0], ck[1]), jnp.float32)
  params["b2"] = 0.01 * jax.random.normal(keys[2], (nf[1],), jnp.float32)
  params["ln2_g"] = jnp.ones(tuple(shape2), jnp.float32)
  params["ln2_b"] = jnp.zeros(tuple(shape2), jnp.float32)

  params["w3"] = 0.1 * jax.random.normal(keys[3], (nf[2], nf[1], ck[2]), jnp.float32)
  params["b3"] = 0.01 * jax.random.normal(keys[4], (nf[2],), jnp.float32)
  params["ln3_g"] = jnp.ones(tuple(shape3), jnp.float32)
  params["ln3_b"] = jnp.zeros(tuple(shape3), jnp.float32)

  # fc weights stored as (in, out) with "in" indexed in torch flatten order
  # (channel-major), exactly like torch.flatten(out, 1) expects.
  flat = shape3[0] * shape3[1]
  params["w4"] = 0.1 * jax.random.normal(keys[5], (flat, fc[0]), jnp.float32)
  params["b4"] = jnp.zeros((1, fc[0]), jnp.float32)
  params["bn4_g"] = jnp.ones((1, fc[0]), jnp.float32)
  params["bn4_b"] = jnp.zeros((1, fc[0]), jnp.float32)

  params["w5"] = 0.1 * jax.random.normal(keys[6], (fc[0], fc[1]), jnp.float32)
  params["b5"] = jnp.zeros((1, fc[1]), jnp.float32)
  params["bn5_g"] = jnp.ones((1, fc[1]), jnp.float32)
  params["bn5_b"] = jnp.zeros((1, fc[1]), jnp.float32)

  params["w6"] = 0.1 * jax.random.normal(keys[7], (fc[1], fc[2]), jnp.float32)
  params["b6"] = jnp.zeros((1, fc[2]), jnp.float32)
  params["bn6_g"] = jnp.ones((1, fc[2]), jnp.float32)
  params["bn6_b"] = jnp.zeros((1, fc[2]), jnp.float32)

  params["w7"] = 0.1 * jax.random.normal(keys[8], (fc[2], n_classes), jnp.float32)
  params["b7"] = jnp.zeros((1, n_classes), jnp.float32)
  return params


if __name__ == "__main__":
  cfg = dict(
      in_channels=4,
      in_size=128,
      conv_n_filters=[8, 8, 8],
      conv_k=[5, 3, 3],
      pool_k=[2, 2, 2],
      fc_sizes=[32, 32, 32],
      n_classes=4,
      lrelu_slope=0.01,
  )

  key = jax.random.PRNGKey(0)
  k_param, k_x = jax.random.split(key)
  params = build_params(k_param, cfg)
  x = jax.random.normal(k_x, (2, cfg["in_channels"], cfg["in_size"]), jnp.float32)

  fwd = jax.jit(lambda xx, pp: sincnet_forward(xx, pp, cfg))
  out = jax.block_until_ready(fwd(x, params))

  assert out.shape == (2, cfg["n_classes"]), out.shape
  assert bool(jnp.all(jnp.isfinite(out)))
  row_sums = np.asarray(jnp.sum(out, axis=1))
  # Softmax uses the approx EUP reciprocal, so row sums are ~1 within ~1e-3.
  assert np.allclose(row_sums, 1.0, atol=5e-3), row_sums

  print("KERNEL_OK")
</pallas_src>

<mosaic_0001>
module attributes {stable_mosaic.version = 11 : i64} {
  func.func @sincnet_fused_kernel(%arg0: memref<256x4xf32, #tpu.memory_space<vmem>>, %arg1: memref<20x8xf32, #tpu.memory_space<vmem>>, %arg2: memref<1x8xf32, #tpu.memory_space<vmem>>, %arg3: memref<62x8xf32, #tpu.memory_space<vmem>>, %arg4: memref<62x8xf32, #tpu.memory_space<vmem>>, %arg5: memref<24x8xf32, #tpu.memory_space<vmem>>, %arg6: memref<1x8xf32, #tpu.memory_space<vmem>>, %arg7: memref<30x8xf32, #tpu.memory_space<vmem>>, %arg8: memref<30x8xf32, #tpu.memory_space<vmem>>, %arg9: memref<24x8xf32, #tpu.memory_space<vmem>>, %arg10: memref<1x8xf32, #tpu.memory_space<vmem>>, %arg11: memref<14x8xf32, #tpu.memory_space<vmem>>, %arg12: memref<14x8xf32, #tpu.memory_space<vmem>>, %arg13: memref<112x32xf32, #tpu.memory_space<vmem>>, %arg14: memref<1x32xf32, #tpu.memory_space<vmem>>, %arg15: memref<1x32xf32, #tpu.memory_space<vmem>>, %arg16: memref<1x32xf32, #tpu.memory_space<vmem>>, %arg17: memref<32x32xf32, #tpu.memory_space<vmem>>, %arg18: memref<1x32xf32, #tpu.memory_space<vmem>>, %arg19: memref<1x32xf32, #tpu.memory_space<vmem>>, %arg20: memref<1x32xf32, #tpu.memory_space<vmem>>, %arg21: memref<32x32xf32, #tpu.memory_space<vmem>>, %arg22: memref<1x32xf32, #tpu.memory_space<vmem>>, %arg23: memref<1x32xf32, #tpu.memory_space<vmem>>, %arg24: memref<1x32xf32, #tpu.memory_space<vmem>>, %arg25: memref<32x4xf32, #tpu.memory_space<vmem>>, %arg26: memref<1x4xf32, #tpu.memory_space<vmem>>, %arg27: memref<2x4xf32, #tpu.memory_space<vmem>>, %arg28: memref<252x8xf32, #tpu.memory_space<vmem>>, %arg29: memref<124x8xf32, #tpu.memory_space<vmem>>, %arg30: memref<122x8xf32, #tpu.memory_space<vmem>>, %arg31: memref<60x8xf32, #tpu.memory_space<vmem>>, %arg32: memref<58x8xf32, #tpu.memory_space<vmem>>, %arg33: memref<28x8xf32, #tpu.memory_space<vmem>>) attributes {dimension_semantics = [], scalar_prefetch = 0 : i64, scratch_operands = 6 : i64, tpu.core_type = #tpu.core_type<tc>} {
    %c0 = arith.constant 0 : index
    %c0_0 = arith.constant 0 : index
    %0 = vector.load %arg0[%c0, %c0_0] : memref<256x4xf32, #tpu.memory_space<vmem>>, vector<252x4xf32>
    %c1 = arith.constant 1 : index
    %c0_1 = arith.constant 0 : index
    %1 = vector.load %arg0[%c1, %c0_1] : memref<256x4xf32, #tpu.memory_space<vmem>>, vector<252x4xf32>
    %c2 = arith.constant 2 : index
    %c0_2 = arith.constant 0 : index
    %2 = vector.load %arg0[%c2, %c0_2] : memref<256x4xf32, #tpu.memory_space<vmem>>, vector<252x4xf32>
    %c3 = arith.constant 3 : index
    %c0_3 = arith.constant 0 : index
    %3 = vector.load %arg0[%c3, %c0_3] : memref<256x4xf32, #tpu.memory_space<vmem>>, vector<252x4xf32>
    %c4 = arith.constant 4 : index
    %c0_4 = arith.constant 0 : index
    %4 = vector.load %arg0[%c4, %c0_4] : memref<256x4xf32, #tpu.memory_space<vmem>>, vector<252x4xf32>
    %5 = tpu.concatenate %0, %1, %2, %3, %4 in 1 : vector<252x4xf32>, vector<252x4xf32>, vector<252x4xf32>, vector<252x4xf32>, vector<252x4xf32> -> vector<252x20xf32>
    %c0_5 = arith.constant 0 : index
    %c0_6 = arith.constant 0 : index
    %6 = vector.load %arg1[%c0_5, %c0_6] : memref<20x8xf32, #tpu.memory_space<vmem>>, vector<20x8xf32>
    %cst = arith.constant dense<0.000000e+00> : vector<252x8xf32>
    %7 = tpu.matmul %5, %6, %cst {dimension_numbers = #tpu.dot_dimension_numbers<[1], [0], [0], [1], [0, 0, 1, 1], [], []>} : vector<252x20xf32>, vector<20x8xf32>, vector<252x8xf32> -> vector<252x8xf32>
    %c0_7 = arith.constant 0 : index
    %c0_8 = arith.constant 0 : index
    %8 = vector.load %arg2[%c0_7, %c0_8] : memref<1x8xf32, #tpu.memory_space<vmem>>, vector<1x8xf32>
    %9 = vector.broadcast %8 : vector<1x8xf32> to vector<252x8xf32>
    %10 = arith.addf %7, %9 : vector<252x8xf32>
    %cst_9 = arith.constant 0.000000e+00 : f32
    %11 = vector.broadcast %cst_9 : f32 to vector<252x8xf32>
    %12 = arith.cmpf ogt, %10, %11 : vector<252x8xf32>
    %cst_10 = arith.constant 0.00999999977 : f32
    %13 = vector.broadcast %cst_10 : f32 to vector<252x8xf32>
    %14 = arith.mulf %13, %10 : vector<252x8xf32>
    %15 = arith.select %12, %10, %14 : vector<252x8xi1>, vector<252x8xf32>
    %c0_11 = arith.constant 0 : index
    %c0_12 = arith.constant 0 : index
    %16 = vector.load %arg28[%c0_11, %c0_12] : memref<252x8xf32, #tpu.memory_space<vmem>>, vector<252x8xf32>
    tpu.vector_store %arg28[%c0_11, %c0_12], %15 {strides = array<i32>} : memref<252x8xf32, #tpu.memory_space<vmem>>, vector<252x8xf32>,
    %c0_13 = arith.constant 0 : index
    %c0_14 = arith.constant 0 : index
    %17 = vector.load %arg3[%c0_13, %c0_14] : memref<62x8xf32, #tpu.memory_space<vmem>>, vector<62x8xf32>
    %c0_15 = arith.constant 0 : index
    %c0_16 = arith.constant 0 : index
    %18 = vector.load %arg4[%c0_15, %c0_16] : memref<62x8xf32, #tpu.memory_space<vmem>>, vector<62x8xf32>
    %c0_17 = arith.constant 0 : index
    %c0_18 = arith.constant 0 : index
    %19 = tpu.strided_load %arg28[%c0_17, %c0_18] {strides = array<i32: 2, 1>} : memref<252x8xf32, #tpu.memory_space<vmem>>, vector<62x8xf32>
    %c1_19 = arith.constant 1 : index
    %c0_20 = arith.constant 0 : index
    %20 = tpu.strided_load %arg28[%c1_19, %c0_20] {strides = array<i32: 2, 1>} : memref<252x8xf32, #tpu.memory_space<vmem>>, vector<62x8xf32>
    %21 = arith.maximumf %19, %20 : vector<62x8xf32>
    %cst_21 = arith.constant dense<0.000000e+00> : vector<62xf32>
    %22 = vector.multi_reduction <add>, %21, %cst_21 [1] : vector<62x8xf32> to vector<62xf32>
    %23 = vector.shape_cast %22 : vector<62xf32> to vector<62x1xf32>
    %cst_22 = arith.constant dense<0.000000e+00> : vector<1xf32>
    %24 = vector.multi_reduction <add>, %23, %cst_22 [0] : vector<62x1xf32> to vector<1xf32>
    %25 = vector.shape_cast %24 : vector<1xf32> to vector<1x1xf32>
    %cst_23 = arith.constant 0.00201612897 : f32
    %26 = vector.broadcast %cst_23 : f32 to vector<1x1xf32>
    %27 = arith.mulf %25, %26 : vector<1x1xf32>
    %28 = vector.broadcast %27 : vector<1x1xf32> to vector<62x8xf32>
    %29 = arith.subf %21, %28 : vector<62x8xf32>
    %30 = arith.mulf %29, %29 : vector<62x8xf32>
    %cst_24 = arith.constant dense<0.000000e+00> : vector<62xf32>
    %31 = vector.multi_reduction <add>, %30, %cst_24 [1] : vector<62x8xf32> to vector<62xf32>
    %32 = vector.shape_cast %31 : vector<62xf32> to vector<62x1xf32>
    %cst_25 = arith.constant dense<0.000000e+00> : vector<1xf32>
    %33 = vector.multi_reduction <add>, %32, %cst_25 [0] : vector<62x1xf32> to vector<1xf32>
    %34 = vector.shape_cast %33 : vector<1xf32> to vector<1x1xf32>
    %cst_26 = arith.constant 0.00201612897 : f32
    %35 = vector.broadcast %cst_26 : f32 to vector<1x1xf32>
    %36 = arith.mulf %34, %35 : vector<1x1xf32>
    %cst_27 = arith.constant 9.99999974E-6 : f32
    %37 = vector.broadcast %cst_27 : f32 to vector<1x1xf32>
    %38 = arith.addf %36, %37 : vector<1x1xf32>
    %39 = math.rsqrt %38 : vector<1x1xf32>
    %40 = vector.broadcast %39 : vector<1x1xf32> to vector<62x8xf32>
    %41 = arith.mulf %29, %40 : vector<62x8xf32>
    %42 = arith.mulf %41, %17 : vector<62x8xf32>
    %43 = arith.addf %42, %18 : vector<62x8xf32>
    %c0_28 = arith.constant 0 : index
    %c0_29 = arith.constant 0 : index
    %44 = vector.load %arg29[%c0_28, %c0_29] : memref<124x8xf32, #tpu.memory_space<vmem>>, vector<62x8xf32>
    tpu.vector_store %arg29[%c0_28, %c0_29], %43 {strides = array<i32>} : memref<124x8xf32, #tpu.memory_space<vmem>>, vector<62x8xf32>,
    %c128 = arith.constant 128 : index
    %c0_30 = arith.constant 0 : index
    %45 = tpu.strided_load %arg28[%c128, %c0_30] {strides = array<i32: 2, 1>} : memref<252x8xf32, #tpu.memory_space<vmem>>, vector<62x8xf32>
    %c129 = arith.constant 129 : index
    %c0_31 = arith.constant 0 : index
    %46 = tpu.strided_load %arg28[%c129, %c0_31] {strides = array<i32: 2, 1>} : memref<252x8xf32, #tpu.memory_space<vmem>>, vector<62x8xf32>
    %47 = arith.maximumf %45, %46 : vector<62x8xf32>
    %cst_32 = arith.constant dense<0.000000e+00> : vector<62xf32>
    %48 = vector.multi_reduction <add>, %47, %cst_32 [1] : vector<62x8xf32> to vector<62xf32>
    %49 = vector.shape_cast %48 : vector<62xf32> to vector<62x1xf32>
    %cst_33 = arith.constant dense<0.000000e+00> : vector<1xf32>
    %50 = vector.multi_reduction <add>, %49, %cst_33 [0] : vector<62x1xf32> to vector<1xf32>
    %51 = vector.shape_cast %50 : vector<1xf32> to vector<1x1xf32>
    %cst_34 = arith.constant 0.00201612897 : f32
    %52 = vector.broadcast %cst_34 : f32 to vector<1x1xf32>
    %53 = arith.mulf %51, %52 : vector<1x1xf32>
    %54 = vector.broadcast %53 : vector<1x1xf32> to vector<62x8xf32>
    %55 = arith.subf %47, %54 : vector<62x8xf32>
    %56 = arith.mulf %55, %55 : vector<62x8xf32>
    %cst_35 = arith.constant dense<0.000000e+00> : vector<62xf32>
    %57 = vector.multi_reduction <add>, %56, %cst_35 [1] : vector<62x8xf32> to vector<62xf32>
    %58 = vector.shape_cast %57 : vector<62xf32> to vector<62x1xf32>
    %cst_36 = arith.constant dense<0.000000e+00> : vector<1xf32>
    %59 = vector.multi_reduction <add>, %58, %cst_36 [0] : vector<62x1xf32> to vector<1xf32>
    %60 = vector.shape_cast %59 : vector<1xf32> to vector<1x1xf32>
    %cst_37 = arith.constant 0.00201612897 : f32
    %61 = vector.broadcast %cst_37 : f32 to vector<1x1xf32>
    %62 = arith.mulf %60, %61 : vector<1x1xf32>
    %cst_38 = arith.constant 9.99999974E-6 : f32
    %63 = vector.broadcast %cst_38 : f32 to vector<1x1xf32>
    %64 = arith.addf %62, %63 : vector<1x1xf32>
    %65 = math.rsqrt %64 : vector<1x1xf32>
    %66 = vector.broadcast %65 : vector<1x1xf32> to vector<62x8xf32>
    %67 = arith.mulf %55, %66 : vector<62x8xf32>
    %68 = arith.mulf %67, %17 : vector<62x8xf32>
    %69 = arith.addf %68, %18 : vector<62x8xf32>
    %c62 = arith.constant 62 : index
    %c0_39 = arith.constant 0 : index
    %70 = vector.load %arg29[%c62, %c0_39] : memref<124x8xf32, #tpu.memory_space<vmem>>, vector<62x8xf32>
    tpu.vector_store %arg29[%c62, %c0_39], %69 {strides = array<i32>} : memref<124x8xf32, #tpu.memory_space<vmem>>, vector<62x8xf32>,
    %c0_40 = arith.constant 0 : index
    %c0_41 = arith.constant 0 : index
    %71 = vector.load %arg29[%c0_40, %c0_41] : memref<124x8xf32, #tpu.memory_space<vmem>>, vector<122x8xf32>
    %c1_42 = arith.constant 1 : index
    %c0_43 = arith.constant 0 : index
    %72 = vector.load %arg29[%c1_42, %c0_43] : memref<124x8xf32, #tpu.memory_space<vmem>>, vector<122x8xf32>
    %c2_44 = arith.constant 2 : index
    %c0_45 = arith.constant 0 : index
    %73 = vector.load %arg29[%c2_44, %c0_45] : memref<124x8xf32, #tpu.memory_space<vmem>>, vector<122x8xf32>
    %74 = tpu.concatenate %71, %72, %73 in 1 : vector<122x8xf32>, vector<122x8xf32>, vector<122x8xf32> -> vector<122x24xf32>
    %c0_46 = arith.constant 0 : index
    %c0_47 = arith.constant 0 : index
    %75 = vector.load %arg5[%c0_46, %c0_47] : memref<24x8xf32, #tpu.memory_space<vmem>>, vector<24x8xf32>
    %cst_48 = arith.constant dense<0.000000e+00> : vector<122x8xf32>
    %76 = tpu.matmul %74, %75, %cst_48 {dimension_numbers = #tpu.dot_dimension_numbers<[1], [0], [0], [1], [0, 0, 1, 1], [], []>} : vector<122x24xf32>, vector<24x8xf32>, vector<122x8xf32> -> vector<122x8xf32>
    %c0_49 = arith.constant 0 : index
    %c0_50 = arith.constant 0 : index
    %77 = vector.load %arg6[%c0_49, %c0_50] : memref<1x8xf32, #tpu.memory_space<vmem>>, vector<1x8xf32>
    %78 = vector.broadcast %77 : vector<1x8xf32> to vector<122x8xf32>
    %79 = arith.addf %76, %78 : vector<122x8xf32>
    %cst_51 = arith.constant 0.000000e+00 : f32
    %80 = vector.broadcast %cst_51 : f32 to vector<122x8xf32>
    %81 = arith.cmpf ogt, %79, %80 : vector<122x8xf32>
    %cst_52 = arith.constant 0.00999999977 : f32
    %82 = vector.broadcast %cst_52 : f32 to vector<122x8xf32>
    %83 = arith.mulf %82, %79 : vector<122x8xf32>
    %84 = arith.select %81, %79, %83 : vector<122x8xi1>, vector<122x8xf32>
    %c0_53 = arith.constant 0 : index
    %c0_54 = arith.constant 0 : index
    %85 = vector.load %arg30[%c0_53, %c0_54] : memref<122x8xf32, #tpu.memory_space<vmem>>, vector<122x8xf32>
    tpu.vector_store %arg30[%c0_53, %c0_54], %84 {strides = array<i32>} : memref<122x8xf32, #tpu.memory_space<vmem>>, vector<122x8xf32>,
    %c0_55 = arith.constant 0 : index
    %c0_56 = arith.constant 0 : index
    %86 = vector.load %arg7[%c0_55, %c0_56] : memref<30x8xf32, #tpu.memory_space<vmem>>, vector<30x8xf32>
    %c0_57 = arith.constant 0 : index
    %c0_58 = arith.constant 0 : index
    %87 = vector.load %arg8[%c0_57, %c0_58] : memref<30x8xf32, #tpu.memory_space<vmem>>, vector<30x8xf32>
    %c0_59 = arith.constant 0 : index
    %c0_60 = arith.constant 0 : index
    %88 = tpu.strided_load %arg30[%c0_59, %c0_60] {strides = array<i32: 2, 1>} : memref<122x8xf32, #tpu.memory_space<vmem>>, vector<30x8xf32>
    %c1_61 = arith.constant 1 : index
    %c0_62 = arith.constant 0 : index
    %89 = tpu.strided_load %arg30[%c1_61, %c0_62] {strides = array<i32: 2, 1>} : memref<122x8xf32, #tpu.memory_space<vmem>>, vector<30x8xf32>
    %90 = arith.maximumf %88, %89 : vector<30x8xf32>
    %cst_63 = arith.constant dense<0.000000e+00> : vector<30xf32>
    %91 = vector.multi_reduction <add>, %90, %cst_63 [1] : vector<30x8xf32> to vector<30xf32>
    %92 = vector.shape_cast %91 : vector<30xf32> to vector<30x1xf32>
    %cst_64 = arith.constant dense<0.000000e+00> : vector<1xf32>
    %93 = vector.multi_reduction <add>, %92, %cst_64 [0] : vector<30x1xf32> to vector<1xf32>
    %94 = vector.shape_cast %93 : vector<1xf32> to vector<1x1xf32>
    %cst_65 = arith.constant 0.00416666688 : f32
    %95 = vector.broadcast %cst_65 : f32 to vector<1x1xf32>
    %96 = arith.mulf %94, %95 : vector<1x1xf32>
    %97 = vector.broadcast %96 : vector<1x1xf32> to vector<30x8xf32>
    %98 = arith.subf %90, %97 : vector<30x8xf32>
    %99 = arith.mulf %98, %98 : vector<30x8xf32>
    %cst_66 = arith.constant dense<0.000000e+00> : vector<30xf32>
    %100 = vector.multi_reduction <add>, %99, %cst_66 [1] : vector<30x8xf32> to vector<30xf32>
    %101 = vector.shape_cast %100 : vector<30xf32> to vector<30x1xf32>
    %cst_67 = arith.constant dense<0.000000e+00> : vector<1xf32>
    %102 = vector.multi_reduction <add>, %101, %cst_67 [0] : vector<30x1xf32> to vector<1xf32>
    %103 = vector.shape_cast %102 : vector<1xf32> to vector<1x1xf32>
    %cst_68 = arith.constant 0.00416666688 : f32
    %104 = vector.broadcast %cst_68 : f32 to vector<1x1xf32>
    %105 = arith.mulf %103, %104 : vector<1x1xf32>
    %cst_69 = arith.constant 9.99999974E-6 : f32
    %106 = vector.broadcast %cst_69 : f32 to vector<1x1xf32>
    %107 = arith.addf %105, %106 : vector<1x1xf32>
    %108 = math.rsqrt %107 : vector<1x1xf32>
    %109 = vector.broadcast %108 : vector<1x1xf32> to vector<30x8xf32>
    %110 = arith.mulf %98, %109 : vector<30x8xf32>
    %111 = arith.mulf %110, %86 : vector<30x8xf32>
    %112 = arith.addf %111, %87 : vector<30x8xf32>
    %c0_70 = arith.constant 0 : index
    %c0_71 = arith.constant 0 : index
    %113 = vector.load %arg31[%c0_70, %c0_71] : memref<60x8xf32, #tpu.memory_space<vmem>>, vector<30x8xf32>
    tpu.vector_store %arg31[%c0_70, %c0_71], %112 {strides = array<i32>} : memref<60x8xf32, #tpu.memory_space<vmem>>, vector<30x8xf32>,
    %c62_72 = arith.constant 62 : index
    %c0_73 = arith.constant 0 : index
    %114 = tpu.strided_load %arg30[%c62_72, %c0_73] {strides = array<i32: 2, 1>} : memref<122x8xf32, #tpu.memory_space<vmem>>, vector<30x8xf32>
    %c63 = arith.constant 63 : index
    %c0_74 = arith.constant 0 : index
    %115 = tpu.strided_load %arg30[%c63, %c0_74] {strides = array<i32: 2, 1>} : memref<122x8xf32, #tpu.memory_space<vmem>>, vector<30x8xf32>
    %116 = arith.maximumf %114, %115 : vector<30x8xf32>
    %cst_75 = arith.constant dense<0.000000e+00> : vector<30xf32>
    %117 = vector.multi_reduction <add>, %116, %cst_75 [1] : vector<30x8xf32> to vector<30xf32>
    %118 = vector.shape_cast %117 : vector<30xf32> to vector<30x1xf32>
    %cst_76 = arith.constant dense<0.000000e+00> : vector<1xf32>
    %119 = vector.multi_reduction <add>, %118, %cst_76 [0] : vector<30x1xf32> to vector<1xf32>
    %120 = vector.shape_cast %119 : vector<1xf32> to vector<1x1xf32>
    %cst_77 = arith.constant 0.00416666688 : f32
    %121 = vector.broadcast %cst_77 : f32 to vector<1x1xf32>
    %122 = arith.mulf %120, %121 : vector<1x1xf32>
    %123 = vector.broadcast %122 : vector<1x1xf32> to vector<30x8xf32>
    %124 = arith.subf %116, %123 : vector<30x8xf32>
    %125 = arith.mulf %124, %124 : vector<30x8xf32>
    %cst_78 = arith.constant dense<0.000000e+00> : vector<30xf32>
    %126 = vector.multi_reduction <add>, %125, %cst_78 [1] : vector<30x8xf32> to vector<30xf32>
    %127 = vector.shape_cast %126 : vector<30xf32> to vector<30x1xf32>
    %cst_79 = arith.constant dense<0.000000e+00> : vector<1xf32>
    %128 = vector.multi_reduction <add>, %127, %cst_79 [0] : vector<30x1xf32> to vector<1xf32>
    %129 = vector.shape_cast %128 : vector<1xf32> to vector<1x1xf32>
    %cst_80 = arith.constant 0.00416666688 : f32
    %130 = vector.broadcast %cst_80 : f32 to vector<1x1xf32>
    %131 = arith.mulf %129, %130 : vector<1x1xf32>
    %cst_81 = arith.constant 9.99999974E-6 : f32
    %132 = vector.broadcast %cst_81 : f32 to vector<1x1xf32>
    %133 = arith.addf %131, %132 : vector<1x1xf32>
    %134 = math.rsqrt %133 : vector<1x1xf32>
    %135 = vector.broadcast %134 : vector<1x1xf32> to vector<30x8xf32>
    %136 = arith.mulf %124, %135 : vector<30x8xf32>
    %137 = arith.mulf %136, %86 : vector<30x8xf32>
    %138 = arith.addf %137, %87 : vector<30x8xf32>
    %c30 = arith.constant 30 : index
    %c0_82 = arith.constant 0 : index
    %139 = vector.load %arg31[%c30, %c0_82] : memref<60x8xf32, #tpu.memory_space<vmem>>, vector<30x8xf32>
    tpu.vector_store %arg31[%c30, %c0_82], %138 {strides = array<i32>} : memref<60x8xf32, #tpu.memory_space<vmem>>, vector<30x8xf32>,
    %c0_83 = arith.constant 0 : index
    %c0_84 = arith.constant 0 : index
    %140 = vector.load %arg31[%c0_83, %c0_84] : memref<60x8xf32, #tpu.memory_space<vmem>>, vector<58x8xf32>
    %c1_85 = arith.constant 1 : index
    %c0_86 = arith.constant 0 : index
    %141 = vector.load %arg31[%c1_85, %c0_86] : memref<60x8xf32, #tpu.memory_space<vmem>>, vector<58x8xf32>
    %c2_87 = arith.constant 2 : index
    %c0_88 = arith.constant 0 : index
    %142 = vector.load %arg31[%c2_87, %c0_88] : memref<60x8xf32, #tpu.memory_space<vmem>>, vector<58x8xf32>
    %143 = tpu.concatenate %140, %141, %142 in 1 : vector<58x8xf32>, vector<58x8xf32>, vector<58x8xf32> -> vector<58x24xf32>
    %c0_89 = arith.constant 0 : index
    %c0_90 = arith.constant 0 : index
    %144 = vector.load %arg9[%c0_89, %c0_90] : memref<24x8xf32, #tpu.memory_space<vmem>>, vector<24x8xf32>
    %cst_91 = arith.constant dense<0.000000e+00> : vector<58x8xf32>
    %145 = tpu.matmul %143, %144, %cst_91 {dimension_numbers = #tpu.dot_dimension_numbers<[1], [0], [0], [1], [0, 0, 1, 1], [], []>} : vector<58x24xf32>, vector<24x8xf32>, vector<58x8xf32> -> vector<58x8xf32>
    %c0_92 = arith.constant 0 : index
    %c0_93 = arith.constant 0 : index
    %146 = vector.load %arg10[%c0_92, %c0_93] : memref<1x8xf32, #tpu.memory_space<vmem>>, vector<1x8xf32>
    %147 = vector.broadcast %146 : vector<1x8xf32> to vector<58x8xf32>
    %148 = arith.addf %145, %147 : vector<58x8xf32>
    %cst_94 = arith.constant 0.000000e+00 : f32
    %149 = vector.broadcast %cst_94 : f32 to vector<58x8xf32>
    %150 = arith.cmpf ogt, %148, %149 : vector<58x8xf32>
    %cst_95 = arith.constant 0.00999999977 : f32
    %151 = vector.broadcast %cst_95 : f32 to vector<58x8xf32>
    %152 = arith.mulf %151, %148 : vector<58x8xf32>
    %153 = arith.select %150, %148, %152 : vector<58x8xi1>, vector<58x8xf32>
    %c0_96 = arith.constant 0 : index
    %c0_97 = arith.constant 0 : index
    %154 = vector.load %arg32[%c0_96, %c0_97] : memref<58x8xf32, #tpu.memory_space<vmem>>, vector<58x8xf32>
    tpu.vector_store %arg32[%c0_96, %c0_97], %153 {strides = array<i32>} : memref<58x8xf32, #tpu.memory_space<vmem>>, vector<58x8xf32>,
    %c0_98 = arith.constant 0 : index
    %c0_99 = arith.constant 0 : index
    %155 = vector.load %arg11[%c0_98, %c0_99] : memref<14x8xf32, #tpu.memory_space<vmem>>, vector<14x8xf32>
    %c0_100 = arith.constant 0 : index
    %c0_101 = arith.constant 0 : index
    %156 = vector.load %arg12[%c0_100, %c0_101] : memref<14x8xf32, #tpu.memory_space<vmem>>, vector<14x8xf32>
    %c0_102 = arith.constant 0 : index
    %c0_103 = arith.constant 0 : index
    %157 = tpu.strided_load %arg32[%c0_102, %c0_103] {strides = array<i32: 2, 1>} : memref<58x8xf32, #tpu.memory_space<vmem>>, vector<14x8xf32>
    %c1_104 = arith.constant 1 : index
    %c0_105 = arith.constant 0 : index
    %158 = tpu.strided_load %arg32[%c1_104, %c0_105] {strides = array<i32: 2, 1>} : memref<58x8xf32, #tpu.memory_space<vmem>>, vector<14x8xf32>
    %159 = arith.maximumf %157, %158 : vector<14x8xf32>
    %cst_106 = arith.constant dense<0.000000e+00> : vector<14xf32>
    %160 = vector.multi_reduction <add>, %159, %cst_106 [1] : vector<14x8xf32> to vector<14xf32>
    %161 = vector.shape_cast %160 : vector<14xf32> to vector<14x1xf32>
    %cst_107 = arith.constant dense<0.000000e+00> : vector<1xf32>
    %162 = vector.multi_reduction <add>, %161, %cst_107 [0] : vector<14x1xf32> to vector<1xf32>
    %163 = vector.shape_cast %162 : vector<1xf32> to vector<1x1xf32>
    %cst_108 = arith.constant 0.00892857183 : f32
    %164 = vector.broadcast %cst_108 : f32 to vector<1x1xf32>
    %165 = arith.mulf %163, %164 : vector<1x1xf32>
    %166 = vector.broadcast %165 : vector<1x1xf32> to vector<14x8xf32>
    %167 = arith.subf %159, %166 : vector<14x8xf32>
    %168 = arith.mulf %167, %167 : vector<14x8xf32>
    %cst_109 = arith.constant dense<0.000000e+00> : vector<14xf32>
    %169 = vector.multi_reduction <add>, %168, %cst_109 [1] : vector<14x8xf32> to vector<14xf32>
    %170 = vector.shape_cast %169 : vector<14xf32> to vector<14x1xf32>
    %cst_110 = arith.constant dense<0.000000e+00> : vector<1xf32>
    %171 = vector.multi_reduction <add>, %170, %cst_110 [0] : vector<14x1xf32> to vector<1xf32>
    %172 = vector.shape_cast %171 : vector<1xf32> to vector<1x1xf32>
    %cst_111 = arith.constant 0.00892857183 : f32
    %173 = vector.broadcast %cst_111 : f32 to vector<1x1xf32>
    %174 = arith.mulf %172, %173 : vector<1x1xf32>
    %cst_112 = arith.constant 9.99999974E-6 : f32
    %175 = vector.broadcast %cst_112 : f32 to vector<1x1xf32>
    %176 = arith.addf %174, %175 : vector<1x1xf32>
    %177 = math.rsqrt %176 : vector<1x1xf32>
    %178 = vector.broadcast %177 : vector<1x1xf32> to vector<14x8xf32>
    %179 = arith.mulf %167, %178 : vector<14x8xf32>
    %180 = arith.mulf %179, %155 : vector<14x8xf32>
    %181 = arith.addf %180, %156 : vector<14x8xf32>
    %c0_113 = arith.constant 0 : index
    %c0_114 = arith.constant 0 : index
    %182 = vector.load %arg33[%c0_113, %c0_114] : memref<28x8xf32, #tpu.memory_space<vmem>>, vector<14x8xf32>
    tpu.vector_store %arg33[%c0_113, %c0_114], %181 {strides = array<i32>} : memref<28x8xf32, #tpu.memory_space<vmem>>, vector<14x8xf32>,
    %c30_115 = arith.constant 30 : index
    %c0_116 = arith.constant 0 : index
    %183 = tpu.strided_load %arg32[%c30_115, %c0_116] {strides = array<i32: 2, 1>} : memref<58x8xf32, #tpu.memory_space<vmem>>, vector<14x8xf32>
    %c31 = arith.constant 31 : index
    %c0_117 = arith.constant 0 : index
    %184 = tpu.strided_load %arg32[%c31, %c0_117] {strides = array<i32: 2, 1>} : memref<58x8xf32, #tpu.memory_space<vmem>>, vector<14x8xf32>
    %185 = arith.maximumf %183, %184 : vector<14x8xf32>
    %cst_118 = arith.constant dense<0.000000e+00> : vector<14xf32>
    %186 = vector.multi_reduction <add>, %185, %cst_118 [1] : vector<14x8xf32> to vector<14xf32>
    %187 = vector.shape_cast %186 : vector<14xf32> to vector<14x1xf32>
    %cst_119 = arith.constant dense<0.000000e+00> : vector<1xf32>
    %188 = vector.multi_reduction <add>, %187, %cst_119 [0] : vector<14x1xf32> to vector<1xf32>
    %189 = vector.shape_cast %188 : vector<1xf32> to vector<1x1xf32>
    %cst_120 = arith.constant 0.00892857183 : f32
    %190 = vector.broadcast %cst_120 : f32 to vector<1x1xf32>
    %191 = arith.mulf %189, %190 : vector<1x1xf32>
    %192 = vector.broadcast %191 : vector<1x1xf32> to vector<14x8xf32>
    %193 = arith.subf %185, %192 : vector<14x8xf32>
    %194 = arith.mulf %193, %193 : vector<14x8xf32>
    %cst_121 = arith.constant dense<0.000000e+00> : vector<14xf32>
    %195 = vector.multi_reduction <add>, %194, %cst_121 [1] : vector<14x8xf32> to vector<14xf32>
    %196 = vector.shape_cast %195 : vector<14xf32> to vector<14x1xf32>
    %cst_122 = arith.constant dense<0.000000e+00> : vector<1xf32>
    %197 = vector.multi_reduction <add>, %196, %cst_122 [0] : vector<14x1xf32> to vector<1xf32>
    %198 = vector.shape_cast %197 : vector<1xf32> to vector<1x1xf32>
    %cst_123 = arith.constant 0.00892857183 : f32
    %199 = vector.broadcast %cst_123 : f32 to vector<1x1xf32>
    %200 = arith.mulf %198, %199 : vector<1x1xf32>
    %cst_124 = arith.constant 9.99999974E-6 : f32
    %201 = vector.broadcast %cst_124 : f32 to vector<1x1xf32>
    %202 = arith.addf %200, %201 : vector<1x1xf32>
    %203 = math.rsqrt %202 : vector<1x1xf32>
    %204 = vector.broadcast %203 : vector<1x1xf32> to vector<14x8xf32>
    %205 = arith.mulf %193, %204 : vector<14x8xf32>
    %206 = arith.mulf %205, %155 : vector<14x8xf32>
    %207 = arith.addf %206, %156 : vector<14x8xf32>
    %c14 = arith.constant 14 : index
    %c0_125 = arith.constant 0 : index
    %208 = vector.load %arg33[%c14, %c0_125] : memref<28x8xf32, #tpu.memory_space<vmem>>, vector<14x8xf32>
    tpu.vector_store %arg33[%c14, %c0_125], %207 {strides = array<i32>} : memref<28x8xf32, #tpu.memory_space<vmem>>, vector<14x8xf32>,
    %c0_126 = arith.constant 0 : index
    %c0_127 = arith.constant 0 : index
    %209 = tpu.strided_load %arg33[%c0_126, %c0_127] {strides = array<i32: 14, 1>} : memref<28x8xf32, #tpu.memory_space<vmem>>, vector<2x8xf32>
    %c0_128 = arith.constant 0 : index
    %c0_129 = arith.constant 0 : index
    %210 = vector.load %arg13[%c0_128, %c0_129] : memref<112x32xf32, #tpu.memory_space<vmem>>, vector<8x32xf32>
    %cst_130 = arith.constant dense<0.000000e+00> : vector<2x32xf32>
    %211 = tpu.matmul %209, %210, %cst_130 {dimension_numbers = #tpu.dot_dimension_numbers<[1], [0], [0], [1], [0, 0, 1, 1], [], []>} : vector<2x8xf32>, vector<8x32xf32>, vector<2x32xf32> -> vector<2x32xf32>
    %c1_131 = arith.constant 1 : index
    %c0_132 = arith.constant 0 : index
    %212 = tpu.strided_load %arg33[%c1_131, %c0_132] {strides = array<i32: 14, 1>} : memref<28x8xf32, #tpu.memory_space<vmem>>, vector<2x8xf32>
    %c8 = arith.constant 8 : index
    %c0_133 = arith.constant 0 : index
    %213 = vector.load %arg13[%c8, %c0_133] : memref<112x32xf32, #tpu.memory_space<vmem>>, vector<8x32xf32>
    %cst_134 = arith.constant dense<0.000000e+00> : vector<2x32xf32>
    %214 = tpu.matmul %212, %213, %cst_134 {dimension_numbers = #tpu.dot_dimension_numbers<[1], [0], [0], [1], [0, 0, 1, 1], [], []>} : vector<2x8xf32>, vector<8x32xf32>, vector<2x32xf32> -> vector<2x32xf32>
    %215 = arith.addf %211, %214 : vector<2x32xf32>
    %c2_135 = arith.constant 2 : index
    %c0_136 = arith.constant 0 : index
    %216 = tpu.strided_load %arg33[%c2_135, %c0_136] {strides = array<i32: 14, 1>} : memref<28x8xf32, #tpu.memory_space<vmem>>, vector<2x8xf32>
    %c16 = arith.constant 16 : index
    %c0_137 = arith.constant 0 : index
    %217 = vector.load %arg13[%c16, %c0_137] : memref<112x32xf32, #tpu.memory_space<vmem>>, vector<8x32xf32>
    %cst_138 = arith.constant dense<0.000000e+00> : vector<2x32xf32>
    %218 = tpu.matmul %216, %217, %cst_138 {dimension_numbers = #tpu.dot_dimension_numbers<[1], [0], [0], [1], [0, 0, 1, 1], [], []>} : vector<2x8xf32>, vector<8x32xf32>, vector<2x32xf32> -> vector<2x32xf32>
    %219 = arith.addf %215, %218 : vector<2x32xf32>
    %c3_139 = arith.constant 3 : index
    %c0_140 = arith.constant 0 : index
    %220 = tpu.strided_load %arg33[%c3_139, %c0_140] {strides = array<i32: 14, 1>} : memref<28x8xf32, #tpu.memory_space<vmem>>, vector<2x8xf32>
    %c24 = arith.constant 24 : index
    %c0_141 = arith.constant 0 : index
    %221 = vector.load %arg13[%c24, %c0_141] : memref<112x32xf32, #tpu.memory_space<vmem>>, vector<8x32xf32>
    %cst_142 = arith.constant dense<0.000000e+00> : vector<2x32xf32>
    %222 = tpu.matmul %220, %221, %cst_142 {dimension_numbers = #tpu.dot_dimension_numbers<[1], [0], [0], [1], [0, 0, 1, 1], [], []>} : vector<2x8xf32>, vector<8x32xf32>, vector<2x32xf32> -> vector<2x32xf32>
    %223 = arith.addf %219, %222 : vector<2x32xf32>
    %c4_143 = arith.constant 4 : index
    %c0_144 = arith.constant 0 : index
    %224 = tpu.strided_load %arg33[%c4_143, %c0_144] {strides = array<i32: 14, 1>} : memref<28x8xf32, #tpu.memory_space<vmem>>, vector<2x8xf32>
    %c32 = arith.constant 32 : index
    %c0_145 = arith.constant 0 : index
    %225 = vector.load %arg13[%c32, %c0_145] : memref<112x32xf32, #tpu.memory_space<vmem>>, vector<8x32xf32>
    %cst_146 = arith.constant dense<0.000000e+00> : vector<2x32xf32>
    %226 = tpu.matmul %224, %225, %cst_146 {dimension_numbers = #tpu.dot_dimension_numbers<[1], [0], [0], [1], [0, 0, 1, 1], [], []>} : vector<2x8xf32>, vector<8x32xf32>, vector<2x32xf32> -> vector<2x32xf32>
    %227 = arith.addf %223, %226 : vector<2x32xf32>
    %c5 = arith.constant 5 : index
    %c0_147 = arith.constant 0 : index
    %228 = tpu.strided_load %arg33[%c5, %c0_147] {strides = array<i32: 14, 1>} : memref<28x8xf32, #tpu.memory_space<vmem>>, vector<2x8xf32>
    %c40 = arith.constant 40 : index
    %c0_148 = arith.constant 0 : index
    %229 = vector.load %arg13[%c40, %c0_148] : memref<112x32xf32, #tpu.memory_space<vmem>>, vector<8x32xf32>
    %cst_149 = arith.constant dense<0.000000e+00> : vector<2x32xf32>
    %230 = tpu.matmul %228, %229, %cst_149 {dimension_numbers = #tpu.dot_dimension_numbers<[1], [0], [0], [1], [0, 0, 1, 1], [], []>} : vector<2x8xf32>, vector<8x32xf32>, vector<2x32xf32> -> vector<2x32xf32>
    %231 = arith.addf %227, %230 : vector<2x32xf32>
    %c6 = arith.constant 6 : index
    %c0_150 = arith.constant 0 : index
    %232 = tpu.strided_load %arg33[%c6, %c0_150] {strides = array<i32: 14, 1>} : memref<28x8xf32, #tpu.memory_space<vmem>>, vector<2x8xf32>
    %c48 = arith.constant 48 : index
    %c0_151 = arith.constant 0 : index
    %233 = vector.load %arg13[%c48, %c0_151] : memref<112x32xf32, #tpu.memory_space<vmem>>, vector<8x32xf32>
    %cst_152 = arith.constant dense<0.000000e+00> : vector<2x32xf32>
    %234 = tpu.matmul %232, %233, %cst_152 {dimension_numbers = #tpu.dot_dimension_numbers<[1], [0], [0], [1], [0, 0, 1, 1], [], []>} : vector<2x8xf32>, vector<8x32xf32>, vector<2x32xf32> -> vector<2x32xf32>
    %235 = arith.addf %231, %234 : vector<2x32xf32>
    %c7 = arith.constant 7 : index
    %c0_153 = arith.constant 0 : index
    %236 = tpu.strided_load %arg33[%c7, %c0_153] {strides = array<i32: 14, 1>} : memref<28x8xf32, #tpu.memory_space<vmem>>, vector<2x8xf32>
    %c56 = arith.constant 56 : index
    %c0_154 = arith.constant 0 : index
    %237 = vector.load %arg13[%c56, %c0_154] : memref<112x32xf32, #tpu.memory_space<vmem>>, vector<8x32xf32>
    %cst_155 = arith.constant dense<0.000000e+00> : vector<2x32xf32>
    %238 = tpu.matmul %236, %237, %cst_155 {dimension_numbers = #tpu.dot_dimension_numbers<[1], [0], [0], [1], [0, 0, 1, 1], [], []>} : vector<2x8xf32>, vector<8x32xf32>, vector<2x32xf32> -> vector<2x32xf32>
    %239 = arith.addf %235, %238 : vector<2x32xf32>
    %c8_156 = arith.constant 8 : index
    %c0_157 = arith.constant 0 : index
    %240 = tpu.strided_load %arg33[%c8_156, %c0_157] {strides = array<i32: 14, 1>} : memref<28x8xf32, #tpu.memory_space<vmem>>, vector<2x8xf32>
    %c64 = arith.constant 64 : index
    %c0_158 = arith.constant 0 : index
    %241 = vector.load %arg13[%c64, %c0_158] : memref<112x32xf32, #tpu.memory_space<vmem>>, vector<8x32xf32>
    %cst_159 = arith.constant dense<0.000000e+00> : vector<2x32xf32>
    %242 = tpu.matmul %240, %241, %cst_159 {dimension_numbers = #tpu.dot_dimension_numbers<[1], [0], [0], [1], [0, 0, 1, 1], [], []>} : vector<2x8xf32>, vector<8x32xf32>, vector<2x32xf32> -> vector<2x32xf32>
    %243 = arith.addf %239, %242 : vector<2x32xf32>
    %c9 = arith.constant 9 : index
    %c0_160 = arith.constant 0 : index
    %244 = tpu.strided_load %arg33[%c9, %c0_160] {strides = array<i32: 14, 1>} : memref<28x8xf32, #tpu.memory_space<vmem>>, vector<2x8xf32>
    %c72 = arith.constant 72 : index
    %c0_161 = arith.constant 0 : index
    %245 = vector.load %arg13[%c72, %c0_161] : memref<112x32xf32, #tpu.memory_space<vmem>>, vector<8x32xf32>
    %cst_162 = arith.constant dense<0.000000e+00> : vector<2x32xf32>
    %246 = tpu.matmul %244, %245, %cst_162 {dimension_numbers = #tpu.dot_dimension_numbers<[1], [0], [0], [1], [0, 0, 1, 1], [], []>} : vector<2x8xf32>, vector<8x32xf32>, vector<2x32xf32> -> vector<2x32xf32>
    %247 = arith.addf %243, %246 : vector<2x32xf32>
    %c10 = arith.constant 10 : index
    %c0_163 = arith.constant 0 : index
    %248 = tpu.strided_load %arg33[%c10, %c0_163] {strides = array<i32: 14, 1>} : memref<28x8xf32, #tpu.memory_space<vmem>>, vector<2x8xf32>
    %c80 = arith.constant 80 : index
    %c0_164 = arith.constant 0 : index
    %249 = vector.load %arg13[%c80, %c0_164] : memref<112x32xf32, #tpu.memory_space<vmem>>, vector<8x32xf32>
    %cst_165 = arith.constant dense<0.000000e+00> : vector<2x32xf32>
    %250 = tpu.matmul %248, %249, %cst_165 {dimension_numbers = #tpu.dot_dimension_numbers<[1], [0], [0], [1], [0, 0, 1, 1], [], []>} : vector<2x8xf32>, vector<8x32xf32>, vector<2x32xf32> -> vector<2x32xf32>
    %251 = arith.addf %247, %250 : vector<2x32xf32>
    %c11 = arith.constant 11 : index
    %c0_166 = arith.constant 0 : index
    %252 = tpu.strided_load %arg33[%c11, %c0_166] {strides = array<i32: 14, 1>} : memref<28x8xf32, #tpu.memory_space<vmem>>, vector<2x8xf32>
    %c88 = arith.constant 88 : index
    %c0_167 = arith.constant 0 : index
    %253 = vector.load %arg13[%c88, %c0_167] : memref<112x32xf32, #tpu.memory_space<vmem>>, vector<8x32xf32>
    %cst_168 = arith.constant dense<0.000000e+00> : vector<2x32xf32>
    %254 = tpu.matmul %252, %253, %cst_168 {dimension_numbers = #tpu.dot_dimension_numbers<[1], [0], [0], [1], [0, 0, 1, 1], [], []>} : vector<2x8xf32>, vector<8x32xf32>, vector<2x32xf32> -> vector<2x32xf32>
    %255 = arith.addf %251, %254 : vector<2x32xf32>
    %c12 = arith.constant 12 : index
    %c0_169 = arith.constant 0 : index
    %256 = tpu.strided_load %arg33[%c12, %c0_169] {strides = array<i32: 14, 1>} : memref<28x8xf32, #tpu.memory_space<vmem>>, vector<2x8xf32>
    %c96 = arith.constant 96 : index
    %c0_170 = arith.constant 0 : index
    %257 = vector.load %arg13[%c96, %c0_170] : memref<112x32xf32, #tpu.memory_space<vmem>>, vector<8x32xf32>
    %cst_171 = arith.constant dense<0.000000e+00> : vector<2x32xf32>
    %258 = tpu.matmul %256, %257, %cst_171 {dimension_numbers = #tpu.dot_dimension_numbers<[1], [0], [0], [1], [0, 0, 1, 1], [], []>} : vector<2x8xf32>, vector<8x32xf32>, vector<2x32xf32> -> vector<2x32xf32>
    %259 = arith.addf %255, %258 : vector<2x32xf32>
    %c13 = arith.constant 13 : index
    %c0_172 = arith.constant 0 : index
    %260 = tpu.strided_load %arg33[%c13, %c0_172] {strides = array<i32: 14, 1>} : memref<28x8xf32, #tpu.memory_space<vmem>>, vector<2x8xf32>
    %c104 = arith.constant 104 : index
    %c0_173 = arith.constant 0 : index
    %261 = vector.load %arg13[%c104, %c0_173] : memref<112x32xf32, #tpu.memory_space<vmem>>, vector<8x32xf32>
    %cst_174 = arith.constant dense<0.000000e+00> : vector<2x32xf32>
    %262 = tpu.matmul %260, %261, %cst_174 {dimension_numbers = #tpu.dot_dimension_numbers<[1], [0], [0], [1], [0, 0, 1, 1], [], []>} : vector<2x8xf32>, vector<8x32xf32>, vector<2x32xf32> -> vector<2x32xf32>
    %263 = arith.addf %259, %262 : vector<2x32xf32>
    %c0_175 = arith.constant 0 : index
    %c0_176 = arith.constant 0 : index
    %264 = vector.load %arg14[%c0_175, %c0_176] : memref<1x32xf32, #tpu.memory_space<vmem>>, vector<1x32xf32>
    %265 = vector.broadcast %264 : vector<1x32xf32> to vector<2x32xf32>
    %266 = arith.addf %263, %265 : vector<2x32xf32>
    %c0_177 = arith.constant 0 : index
    %c0_178 = arith.constant 0 : index
    %267 = vector.load %arg15[%c0_177, %c0_178] : memref<1x32xf32, #tpu.memory_space<vmem>>, vector<1x32xf32>
    %c0_179 = arith.constant 0 : index
    %c0_180 = arith.constant 0 : index
    %268 = vector.load %arg16[%c0_179, %c0_180] : memref<1x32xf32, #tpu.memory_space<vmem>>, vector<1x32xf32>
    %cst_181 = arith.constant dense<0.000000e+00> : vector<32xf32>
    %269 = vector.multi_reduction <add>, %266, %cst_181 [0] : vector<2x32xf32> to vector<32xf32>
    %270 = vector.shape_cast %269 : vector<32xf32> to vector<1x32xf32>
    %cst_182 = arith.constant 2.000000e+00 : f32
    %271 = vector.broadcast %cst_182 : f32 to vector<1x32xf32>
    %272 = arith.divf %270, %271 : vector<1x32xf32>
    %273 = vector.broadcast %272 : vector<1x32xf32> to vector<2x32xf32>
    %274 = arith.subf %266, %273 : vector<2x32xf32>
    %275 = arith.mulf %274, %274 : vector<2x32xf32>
    %cst_183 = arith.constant dense<0.000000e+00> : vector<32xf32>
    %276 = vector.multi_reduction <add>, %275, %cst_183 [0] : vector<2x32xf32> to vector<32xf32>
    %277 = vector.shape_cast %276 : vector<32xf32> to vector<1x32xf32>
    %cst_184 = arith.constant 2.000000e+00 : f32
    %278 = vector.broadcast %cst_184 : f32 to vector<1x32xf32>
    %279 = arith.divf %277, %278 : vector<1x32xf32>
    %280 = vector.broadcast %272 : vector<1x32xf32> to vector<2x32xf32>
    %281 = arith.subf %266, %280 : vector<2x32xf32>
    %cst_185 = arith.constant 9.99999974E-6 : f32
    %282 = vector.broadcast %cst_185 : f32 to vector<1x32xf32>
    %283 = arith.addf %279, %282 : vector<1x32xf32>
    %284 = math.rsqrt %283 : vector<1x32xf32>
    %285 = vector.broadcast %284 : vector<1x32xf32> to vector<2x32xf32>
    %286 = arith.mulf %281, %285 : vector<2x32xf32>
    %287 = vector.broadcast %267 : vector<1x32xf32> to vector<2x32xf32>
    %288 = arith.mulf %286, %287 : vector<2x32xf32>
    %289 = vector.broadcast %268 : vector<1x32xf32> to vector<2x32xf32>
    %290 = arith.addf %288, %289 : vector<2x32xf32>
    %cst_186 = arith.constant 0.000000e+00 : f32
    %291 = vector.broadcast %cst_186 : f32 to vector<2x32xf32>
    %292 = arith.cmpf ogt, %290, %291 : vector<2x32xf32>
    %cst_187 = arith.constant 0.00999999977 : f32
    %293 = vector.broadcast %cst_187 : f32 to vector<2x32xf32>
    %294 = arith.mulf %293, %290 : vector<2x32xf32>
    %295 = arith.select %292, %290, %294 : vector<2x32xi1>, vector<2x32xf32>
    %c0_188 = arith.constant 0 : index
    %c0_189 = arith.constant 0 : index
    %296 = vector.load %arg17[%c0_188, %c0_189] : memref<32x32xf32, #tpu.memory_space<vmem>>, vector<32x32xf32>
    %cst_190 = arith.constant dense<0.000000e+00> : vector<2x32xf32>
    %297 = tpu.matmul %295, %296, %cst_190 {dimension_numbers = #tpu.dot_dimension_numbers<[1], [0], [0], [1], [0, 0, 1, 1], [], []>} : vector<2x32xf32>, vector<32x32xf32>, vector<2x32xf32> -> vector<2x32xf32>
    %c0_191 = arith.constant 0 : index
    %c0_192 = arith.constant 0 : index
    %298 = vector.load %arg18[%c0_191, %c0_192] : memref<1x32xf32, #tpu.memory_space<vmem>>, vector<1x32xf32>
    %299 = vector.broadcast %298 : vector<1x32xf32> to vector<2x32xf32>
    %300 = arith.addf %297, %299 : vector<2x32xf32>
    %c0_193 = arith.constant 0 : index
    %c0_194 = arith.constant 0 : index
    %301 = vector.load %arg19[%c0_193, %c0_194] : memref<1x32xf32, #tpu.memory_space<vmem>>, vector<1x32xf32>
    %c0_195 = arith.constant 0 : index
    %c0_196 = arith.constant 0 : index
    %302 = vector.load %arg20[%c0_195, %c0_196] : memref<1x32xf32, #tpu.memory_space<vmem>>, vector<1x32xf32>
    %cst_197 = arith.constant dense<0.000000e+00> : vector<32xf32>
    %303 = vector.multi_reduction <add>, %300, %cst_197 [0] : vector<2x32xf32> to vector<32xf32>
    %304 = vector.shape_cast %303 : vector<32xf32> to vector<1x32xf32>
    %cst_198 = arith.constant 2.000000e+00 : f32
    %305 = vector.broadcast %cst_198 : f32 to vector<1x32xf32>
    %306 = arith.divf %304, %305 : vector<1x32xf32>
    %307 = vector.broadcast %306 : vector<1x32xf32> to vector<2x32xf32>
    %308 = arith.subf %300, %307 : vector<2x32xf32>
    %309 = arith.mulf %308, %308 : vector<2x32xf32>
    %cst_199 = arith.constant dense<0.000000e+00> : vector<32xf32>
    %310 = vector.multi_reduction <add>, %309, %cst_199 [0] : vector<2x32xf32> to vector<32xf32>
    %311 = vector.shape_cast %310 : vector<32xf32> to vector<1x32xf32>
    %cst_200 = arith.constant 2.000000e+00 : f32
    %312 = vector.broadcast %cst_200 : f32 to vector<1x32xf32>
    %313 = arith.divf %311, %312 : vector<1x32xf32>
    %314 = vector.broadcast %306 : vector<1x32xf32> to vector<2x32xf32>
    %315 = arith.subf %300, %314 : vector<2x32xf32>
    %cst_201 = arith.constant 9.99999974E-6 : f32
    %316 = vector.broadcast %cst_201 : f32 to vector<1x32xf32>
    %317 = arith.addf %313, %316 : vector<1x32xf32>
    %318 = math.rsqrt %317 : vector<1x32xf32>
    %319 = vector.broadcast %318 : vector<1x32xf32> to vector<2x32xf32>
    %320 = arith.mulf %315, %319 : vector<2x32xf32>
    %321 = vector.broadcast %301 : vector<1x32xf32> to vector<2x32xf32>
    %322 = arith.mulf %320, %321 : vector<2x32xf32>
    %323 = vector.broadcast %302 : vector<1x32xf32> to vector<2x32xf32>
    %324 = arith.addf %322, %323 : vector<2x32xf32>
    %cst_202 = arith.constant 0.000000e+00 : f32
    %325 = vector.broadcast %cst_202 : f32 to vector<2x32xf32>
    %326 = arith.cmpf ogt, %324, %325 : vector<2x32xf32>
    %cst_203 = arith.constant 0.00999999977 : f32
    %327 = vector.broadcast %cst_203 : f32 to vector<2x32xf32>
    %328 = arith.mulf %327, %324 : vector<2x32xf32>
    %329 = arith.select %326, %324, %328 : vector<2x32xi1>, vector<2x32xf32>
    %c0_204 = arith.constant 0 : index
    %c0_205 = arith.constant 0 : index
    %330 = vector.load %arg21[%c0_204, %c0_205] : memref<32x32xf32, #tpu.memory_space<vmem>>, vector<32x32xf32>
    %cst_206 = arith.constant dense<0.000000e+00> : vector<2x32xf32>
    %331 = tpu.matmul %329, %330, %cst_206 {dimension_numbers = #tpu.dot_dimension_numbers<[1], [0], [0], [1], [0, 0, 1, 1], [], []>} : vector<2x32xf32>, vector<32x32xf32>, vector<2x32xf32> -> vector<2x32xf32>
    %c0_207 = arith.constant 0 : index
    %c0_208 = arith.constant 0 : index
    %332 = vector.load %arg22[%c0_207, %c0_208] : memref<1x32xf32, #tpu.memory_space<vmem>>, vector<1x32xf32>
    %333 = vector.broadcast %332 : vector<1x32xf32> to vector<2x32xf32>
    %334 = arith.addf %331, %333 : vector<2x32xf32>
    %c0_209 = arith.constant 0 : index
    %c0_210 = arith.constant 0 : index
    %335 = vector.load %arg23[%c0_209, %c0_210] : memref<1x32xf32, #tpu.memory_space<vmem>>, vector<1x32xf32>
    %c0_211 = arith.constant 0 : index
    %c0_212 = arith.constant 0 : index
    %336 = vector.load %arg24[%c0_211, %c0_212] : memref<1x32xf32, #tpu.memory_space<vmem>>, vector<1x32xf32>
    %cst_213 = arith.constant dense<0.000000e+00> : vector<32xf32>
    %337 = vector.multi_reduction <add>, %334, %cst_213 [0] : vector<2x32xf32> to vector<32xf32>
    %338 = vector.shape_cast %337 : vector<32xf32> to vector<1x32xf32>
    %cst_214 = arith.constant 2.000000e+00 : f32
    %339 = vector.broadcast %cst_214 : f32 to vector<1x32xf32>
    %340 = arith.divf %338, %339 : vector<1x32xf32>
    %341 = vector.broadcast %340 : vector<1x32xf32> to vector<2x32xf32>
    %342 = arith.subf %334, %341 : vector<2x32xf32>
    %343 = arith.mulf %342, %342 : vector<2x32xf32>
    %cst_215 = arith.constant dense<0.000000e+00> : vector<32xf32>
    %344 = vector.multi_reduction <add>, %343, %cst_215 [0] : vector<2x32xf32> to vector<32xf32>
    %345 = vector.shape_cast %344 : vector<32xf32> to vector<1x32xf32>
    %cst_216 = arith.constant 2.000000e+00 : f32
    %346 = vector.broadcast %cst_216 : f32 to vector<1x32xf32>
    %347 = arith.divf %345, %346 : vector<1x32xf32>
    %348 = vector.broadcast %340 : vector<1x32xf32> to vector<2x32xf32>
    %349 = arith.subf %334, %348 : vector<2x32xf32>
    %cst_217 = arith.constant 9.99999974E-6 : f32
    %350 = vector.broadcast %cst_217 : f32 to vector<1x32xf32>
    %351 = arith.addf %347, %350 : vector<1x32xf32>
    %352 = math.rsqrt %351 : vector<1x32xf32>
    %353 = vector.broadcast %352 : vector<1x32xf32> to vector<2x32xf32>
    %354 = arith.mulf %349, %353 : vector<2x32xf32>
    %355 = vector.broadcast %335 : vector<1x32xf32> to vector<2x32xf32>
    %356 = arith.mulf %354, %355 : vector<2x32xf32>
    %357 = vector.broadcast %336 : vector<1x32xf32> to vector<2x32xf32>
    %358 = arith.addf %356, %357 : vector<2x32xf32>
    %cst_218 = arith.constant 0.000000e+00 : f32
    %359 = vector.broadcast %cst_218 : f32 to vector<2x32xf32>
    %360 = arith.cmpf ogt, %358, %359 : vector<2x32xf32>
    %cst_219 = arith.constant 0.00999999977 : f32
    %361 = vector.broadcast %cst_219 : f32 to vector<2x32xf32>
    %362 = arith.mulf %361, %358 : vector<2x32xf32>
    %363 = arith.select %360, %358, %362 : vector<2x32xi1>, vector<2x32xf32>
    %c0_220 = arith.constant 0 : index
    %c0_221 = arith.constant 0 : index
    %364 = vector.load %arg25[%c0_220, %c0_221] : memref<32x4xf32, #tpu.memory_space<vmem>>, vector<32x4xf32>
    %cst_222 = arith.constant dense<0.000000e+00> : vector<2x4xf32>
    %365 = tpu.matmul %363, %364, %cst_222 {dimension_numbers = #tpu.dot_dimension_numbers<[1], [0], [0], [1], [0, 0, 1, 1], [], []>} : vector<2x32xf32>, vector<32x4xf32>, vector<2x4xf32> -> vector<2x4xf32>
    %c0_223 = arith.constant 0 : index
    %c0_224 = arith.constant 0 : index
    %366 = vector.load %arg26[%c0_223, %c0_224] : memref<1x4xf32, #tpu.memory_space<vmem>>, vector<1x4xf32>
    %367 = vector.broadcast %366 : vector<1x4xf32> to vector<2x4xf32>
    %368 = arith.addf %365, %367 : vector<2x4xf32>
    %cst_225 = arith.constant 0.000000e+00 : f32
    %369 = vector.broadcast %cst_225 : f32 to vector<2x4xf32>
    %370 = arith.cmpf ogt, %368, %369 : vector<2x4xf32>
    %cst_226 = arith.constant 0.00999999977 : f32
    %371 = vector.broadcast %cst_226 : f32 to vector<2x4xf32>
    %372 = arith.mulf %371, %368 : vector<2x4xf32>
    %373 = arith.select %370, %368, %372 : vector<2x4xi1>, vector<2x4xf32>
    %cst_227 = arith.constant dense<0xFF800000> : vector<2xf32>
    %374 = vector.multi_reduction <maximumf>, %373, %cst_227 [1] : vector<2x4xf32> to vector<2xf32>
    %375 = vector.shape_cast %374 : vector<2xf32> to vector<2x1xf32>
    %376 = vector.broadcast %375 : vector<2x1xf32> to vector<2x4xf32>
    %377 = arith.subf %373, %376 : vector<2x4xf32>
    %378 = math.exp %377 : vector<2x4xf32>
    %cst_228 = arith.constant dense<0.000000e+00> : vector<2xf32>
    %379 = vector.multi_reduction <add>, %378, %cst_228 [1] : vector<2x4xf32> to vector<2xf32>
    %380 = vector.shape_cast %379 : vector<2xf32> to vector<2x1xf32>
    %381 = tpu.reciprocal %380 {approx = true} : vector<2x1xf32> -> vector<2x1xf32>
    %382 = vector.broadcast %381 : vector<2x1xf32> to vector<2x4xf32>
    %383 = arith.mulf %378, %382 : vector<2x4xf32>
    %c0_229 = arith.constant 0 : index
    %c0_230 = arith.constant 0 : index
    %384 = vector.load %arg27[%c0_229, %c0_230] : memref<2x4xf32, #tpu.memory_space<vmem>>, vector<2x4xf32>
    tpu.vector_store %arg27[%c0_229, %c0_230], %383 {strides = array<i32>} : memref<2x4xf32, #tpu.memory_space<vmem>>, vector<2x4xf32>,
    return
  }
}

</mosaic_0001>

<bundles_post_ra>
// kernel: _lambda_.1
= control target key start
LH: loop header
LB: loop body
LE: loop exit
PB: predicated region body
PF: predicated region fallthrough
CT: control target
= control target key end

     0   :  { %s6578_s0 = inlined_call_operand.vmem [shape: f32[256,4], index: 0, kind: input, shape index: {}]   ;;  %s6579_s1 = inlined_call_operand.vmem [shape: f32[20,8], index: 1, kind: input, shape index: {}]   ;;  %s6580_s2 = inlined_call_operand.vmem [shape: f32[1,8], index: 2, kind: input, shape index: {}]   ;;  %s6581_s3 = inlined_call_operand.vmem [shape: f32[62,8], index: 3, kind: input, shape index: {}]   ;;  %s6582_s4 = inlined_call_operand.vmem [shape: f32[62,8], index: 4, kind: input, shape index: {}]   ;;  %s6583_s5 = inlined_call_operand.vmem [shape: f32[24,8], index: 5, kind: input, shape index: {}]   ;;  %s6584_s6 = inlined_call_operand.vmem [shape: f32[1,8], index: 6, kind: input, shape index: {}]   ;;  %s6585_s7 = inlined_call_operand.vmem [shape: f32[30,8], index: 7, kind: input, shape index: {}]   ;;  %s6586_s8 = inlined_call_operand.vmem [shape: f32[30,8], index: 8, kind: input, shape index: {}]   ;;  %s6587_s9 = inlined_call_operand.vmem [shape: f32[24,8], index: 9, kind: input, shape index: {}]   ;;  %s6588_s10 = inlined_call_operand.vmem [shape: f32[1,8], index: 10, kind: input, shape index: {}]   ;;  %s6589_s11 = inlined_call_operand.vmem [shape: f32[14,8], index: 11, kind: input, shape index: {}]   ;;  %s6590_s12 = inlined_call_operand.vmem [shape: f32[14,8], index: 12, kind: input, shape index: {}]   ;;  %s6591_s13 = inlined_call_operand.vmem [shape: f32[112,32], index: 13, kind: input, shape index: {}]   ;;  %s6592_s14 = inlined_call_operand.vmem [shape: f32[1,32], index: 14, kind: input, shape index: {}]   ;;  %s6593_s15 = inlined_call_operand.vmem [shape: f32[1,32], index: 15, kind: input, shape index: {}]   ;;  %s6594_s16 = inlined_call_operand.vmem [shape: f32[1,32], index: 16, kind: input, shape index: {}]   ;;  %s6595_s17 = inlined_call_operand.vmem [shape: f32[32,32], index: 17, kind: input, shape index: {}]   ;;  %s6596_s18 = inlined_call_operand.vmem [shape: f32[1,32], index: 18, kind: input, shape index: {}]   ;;  %s6597_s19 = inlined_call_operand.vmem [shape: f32[1,32], index: 19, kind: input, shape index: {}]   ;;  %s6598_s20 = inlined_call_operand.vmem [shape: f32[1,32], index: 20, kind: input, shape index: {}]   ;;  %s6599_s21 = inlined_call_operand.vmem [shape: f32[32,32], index: 21, kind: input, shape index: {}]   ;;  %s6600_s22 = inlined_call_operand.vmem [shape: f32[1,32], index: 22, kind: input, shape index: {}]   ;;  %s6601_s23 = inlined_call_operand.vmem [shape: f32[1,32], index: 23, kind: input, shape index: {}]   ;;  %s6602_s24 = inlined_call_operand.vmem [shape: f32[1,32], index: 24, kind: input, shape index: {}]   ;;  %s6603_s25 = inlined_call_operand.vmem [shape: f32[32,4], index: 25, kind: input, shape index: {}]   ;;  %s6604_s26 = inlined_call_operand.vmem [shape: f32[1,4], index: 26, kind: input, shape index: {}]   ;;  %s6605_s27 = inlined_call_operand.hbm [shape: f32[2,4], index: 27, kind: output, shape index: {}]  }
   0x1   :  { %6617 = sst [smem:[#allocation11_spill]] %s6578_s0 }
   0x2   :  { %6618 = sst [smem:[#allocation12_spill]] %s6579_s1 }
   0x3   :  { %6619 = sst [smem:[#allocation13_spill]] %s6580_s2 }
   0x4   :  { %6620 = sst [smem:[#allocation14_spill]] %s6581_s3 }
   0x5   :  { %6621 = sst [smem:[#allocation15_spill]] %s6582_s4 }
   0x6   :  { %6622 = sst [smem:[#allocation16_spill]] %s6583_s5 }
   0x7   :  { %6623 = sst [smem:[#allocation17_spill]] %s6584_s6 }
   0x8   :  { %6624 = sst [smem:[#allocation18_spill]] %s6585_s7 }
   0x9   :  { %6625 = sst [smem:[#allocation19_spill]] %s6586_s8 }
   0xa   :  { %6626 = sst [smem:[#allocation20_spill]] %s6587_s9 }
   0xb   :  { %6627 = sst [smem:[#allocation21_spill]] %s6588_s10 }
   0xc   :  { %6628 = sst [smem:[#allocation22_spill]] %s6589_s11 }
   0xd   :  { %s6629_s8 = sld [smem:[#allocation11_spill]]  ;;  %s4735_s5 = smov 8   ;;  %vm998_vm0 = vcmask 1043456  }
   0xe   :  { %s4736_s28 = smov 4   ;;  %s4737_s7 = smov 12  }
   0xf   :  { %s6615_s10 = smov 16   ;;  %s6630_s2 = sld [smem:[#allocation12_spill]] }
  0x13   :  { %v151_v0 = vld [vmem:[%s6629_s8 + $0x2] sm:$0xff]  ;;  %v152_v2 = vld [vmem:[%s6629_s8 + $0xa] sm:$0xff]  ;;  %v122_v8 = vld [vmem:[%s6629_s8 + $0x19] sm:$0xff] }
  0x14   :  { %v119_v1 = vld [vmem:[%s6629_s8 + $0x1] sm:$0xff]  ;;  %407 = vrot.lane.b32.xlu1 %v151_v0, %s4735_s5  ;;  %v120_v3 = vld [vmem:[%s6629_s8 + $0x9] sm:$0xff]  ;;  %v121_v6 = vld [vmem:[%s6629_s8 + $0x11] sm:$0xff] }
  0x15   :  { %279 = vrot.lane.b32.xlu0 %v119_v1, %s4736_s28  ;;  %v184_v4 = vld [vmem:[%s6629_s8 + $0xb] sm:$0xff]  ;;  %v183_v5 = vld [vmem:[%s6629_s8 + $0x3] sm:$0xff]  ;;  %v154_v10 = vld [vmem:[%s6629_s8 + $0x1a] sm:$0xff] }
  0x16   :  { %v215_v7 = vld [vmem:[%s6629_s8 + $0x4] sm:$0xff]  ;;  %v216_v9 = vld [vmem:[%s6629_s8 + $0xc] sm:$0xff]  ;;  %v186_v12 = vld [vmem:[%s6629_s8 + $0x1b] sm:$0xff] }
  0x17   :  { %v153_v11 = vld [vmem:[%s6629_s8 + $0x12] sm:$0xff]  ;;  %v891_v14 = vld [vmem:[%s6630_s2] sm:$0xff]  ;;  %v892_v15 = vld [vmem:[%s6630_s2 + $0x8] sm:$0xff] }
  0x18   :  { %409 = vrot.lane.b32.xlu1 %v152_v2, %s4735_s5  ;;  %v185_v13 = vld [vmem:[%s6629_s8 + $0x13] sm:$0xff]  ;;  %v4651_v16 = vpack.c.bf16 %v892_v15, %v891_v14  ;;  %v123_v17 = vld [vmem:[%s6629_s8 + $0x21] sm:$0xff]  ;;  %v124_v20 = vld [vmem:[%s6629_s8 + $0x29] sm:$0xff] }
  0x19   :  { %281 = vrot.lane.b32.xlu0 %v120_v3, %s4736_s28  ;;  %v217_v18 = vld [vmem:[%s6629_s8 + $0x14] sm:$0xff]  ;;  %v893_v19 = vld [vmem:[%s6630_s2 + $0x10] sm:$0xf]  ;;  %v218_v21 = vld [vmem:[%s6629_s8 + $0x1c] sm:$0xff] }
  0x1a   :  { %4652 = vmatprep.subr.bf16.mxu0 %v4651_v16 }
  0x1b   :  { %4654 = vmatpush3.bf16.msra.mxu0 %v4651_v16 }
  0x1c   :  { %537 = vrot.lane.b32.xlu1 %v184_v4, %s4737_s7  ;;  %4450 = vmatprep.subr.msk.mxu0 %vm998_vm0, %v893_v19 }
  0x1d   :  { %535 = vrot.lane.b32.xlu0 %v183_v5, %s4737_s7 }
  0x1f   :  { %4451 = vmatpush3.msk.msra.mxu0 %vm998_vm0, %v893_v19 }
  0x20   :  { %283 = vrot.lane.b32.xlu1 %v121_v6, %s4736_s28 }
  0x21   :  { %663 = vrot.lane.b32.xlu0 %v215_v7, %s6615_s10 }
  0x24   :  { %285 = vrot.lane.b32.xlu1 %v122_v8, %s4736_s28 }
  0x25   :  { %665 = vrot.lane.b32.xlu0 %v216_v9, %s6615_s10  ;;  %s6631_s10 = smov 16  }
  0x28   :  { %413 = vrot.lane.b32.xlu1 %v154_v10, %s4735_s5 }
  0x29   :  { %411 = vrot.lane.b32.xlu0 %v153_v11, %s4735_s5 }
  0x2c   :  { %541 = vrot.lane.b32.xlu1 %v186_v12, %s4737_s7 }
  0x2d   :  { %539 = vrot.lane.b32.xlu0 %v185_v13, %s4737_s7 }
  0x30   :  { %287 = vrot.lane.b32.xlu1 %v123_v17, %s4736_s28 }
  0x31   :  { %667 = vrot.lane.b32.xlu0 %v217_v18, %s6631_s10 }
  0x34   :  { %289 = vrot.lane.b32.xlu1 %v124_v20, %s4736_s28 }
  0x35   :  { %669 = vrot.lane.b32.xlu0 %v218_v21, %s6631_s10 }
  0x36   :  { %32 = vsyncpa [#allocation9], 0  ;;  %v156_v22 = vld [vmem:[%s6629_s8 + $0x2a] sm:$0xff]  ;;  %v155_v23 = vld [vmem:[%s6629_s8 + $0x22] sm:$0xff]  ;;  %vm759_vm1 = vcmask 31744   ;;  %vm792_vm2 = vcmask 64512  }
  0x37   :  { %v188_v24 = vld [vmem:[%s6629_s8 + $0x2b] sm:$0xff]  ;;  %v187_v25 = vld [vmem:[%s6629_s8 + $0x23] sm:$0xff]  ;;  %v126_v28 = vld [vmem:[%s6629_s8 + $0x39] sm:$0xff]  ;;  %vm825_vm3 = vcmask 97280   ;;  %vm858_vm4 = vcmask 130048   ;;  %vm901_vm5 = vcmask 162816  }
  0x38   :  { %417 = vrot.lane.b32.xlu1 %v156_v22, %s4735_s5  ;;  %v125_v26 = vld [vmem:[%s6629_s8 + $0x31] sm:$0xff]  ;;  %v219_v27 = vld [vmem:[%s6629_s8 + $0x24] sm:$0xff]  ;;  %v158_v30 = vld [vmem:[%s6629_s8 + $0x3a] sm:$0xff]  ;;  %s6633_s30 = sld [smem:[#allocation14_spill]]  ;;  %s6634_s29 = sld [smem:[#allocation15_spill]] }
  0x39   :  { %415 = vrot.lane.b32.xlu0 %v155_v23, %s4735_s5  ;;  %v220_v29 = vld [vmem:[%s6629_s8 + $0x2c] sm:$0xff]  ;;  %v190_v32 = vld [vmem:[%s6629_s8 + $0x3b] sm:$0xff]  ;;  %v191_v41 = vld [vmem:[%s6629_s8 + $0x43] sm:$0xff]  ;;  %s6637_s11 = sld [smem:[#allocation18_spill]]  ;;  %s6638_s0 = sld [smem:[#allocation19_spill]] }
  0x3a   :  { %v157_v31 = vld [vmem:[%s6629_s8 + $0x32] sm:$0xff]  ;;  %v127_v34 = vld [vmem:[%s6629_s8 + $0x41] sm:$0xff]  ;;  %v128_v36 = vld [vmem:[%s6629_s8 + $0x49] sm:$0xff]  ;;  %s6639_s9 = sld [smem:[#allocation20_spill]]  ;;  %s6641_s2 = sld [smem:[#allocation22_spill]] }
  0x3b   :  { %v189_v33 = vld [vmem:[%s6629_s8 + $0x33] sm:$0xff]  ;;  %v222_v37 = vld [vmem:[%s6629_s8 + $0x3c] sm:$0xff]  ;;  %v160_v38 = vld [vmem:[%s6629_s8 + $0x4a] sm:$0xff] }
  0x3c   :  { %545 = vrot.lane.b32.xlu1 %v188_v24, %s4737_s7  ;;  %v221_v35 = vld [vmem:[%s6629_s8 + $0x34] sm:$0xff]  ;;  %v159_v39 = vld [vmem:[%s6629_s8 + $0x42] sm:$0xff]  ;;  %v192_v40 = vld [vmem:[%s6629_s8 + $0x4b] sm:$0xff] }
  0x3d   :  { %543 = vrot.lane.b32.xlu0 %v187_v25, %s4737_s7  ;;  %v129_v42 = vld [vmem:[%s6629_s8 + $0x51] sm:$0xff]  ;;  %v223_v43 = vld [vmem:[%s6629_s8 + $0x44] sm:$0xff]  ;;  %v130_v44 = vld [vmem:[%s6629_s8 + $0x59] sm:$0xff] }
  0x3e   :  { %v224_v45 = vld [vmem:[%s6629_s8 + $0x4c] sm:$0xff]  ;;  %v162_v46 = vld [vmem:[%s6629_s8 + $0x5a] sm:$0xff]  ;;  %v163_v55 = vld [vmem:[%s6629_s8 + $0x62] sm:$0xff] }
  0x3f   :  { %v161_v47 = vld [vmem:[%s6629_s8 + $0x52] sm:$0xff]  ;;  %v194_v48 = vld [vmem:[%s6629_s8 + $0x5b] sm:$0xff]  ;;  %v132_v52 = vld [vmem:[%s6629_s8 + $0x69] sm:$0xff] }
  0x40   :  { %291 = vrot.lane.b32.xlu1 %v125_v26, %s4736_s28  ;;  %v193_v49 = vld [vmem:[%s6629_s8 + $0x53] sm:$0xff]  ;;  %v131_v50 = vld [vmem:[%s6629_s8 + $0x61] sm:$0xff]  ;;  %v164_v54 = vld [vmem:[%s6629_s8 + $0x6a] sm:$0xff] }
  0x41   :  { %671 = vrot.lane.b32.xlu0 %v219_v27, %s6631_s10  ;;  %v225_v51 = vld [vmem:[%s6629_s8 + $0x54] sm:$0xff]  ;;  %v226_v53 = vld [vmem:[%s6629_s8 + $0x5c] sm:$0xff]  ;;  %v196_v56 = vld [vmem:[%s6629_s8 + $0x6b] sm:$0xff] }
  0x42   :  { %v195_v57 = vld [vmem:[%s6629_s8 + $0x63] sm:$0xff]  ;;  %v133_v58 = vld [vmem:[%s6629_s8 + $0x71] sm:$0xff]  ;;  %v134_v60 = vld [vmem:[%s6629_s8 + $0x79] sm:$0xff] }
  0x43   :  { %v227_v59 = vld [vmem:[%s6629_s8 + $0x64] sm:$0xff]  ;;  %v228_v61 = vld [vmem:[%s6629_s8 + $0x6c] sm:$0xff]  ;;  %v166_v62 = vld [vmem:[%s6629_s8 + $0x7a] sm:$0xff] }
  0x44   :  { %293 = vrot.lane.b32.xlu1 %v126_v28, %s4736_s28  ;;  %v165_v63 = vld [vmem:[%s6629_s8 + $0x72] sm:$0xff]  ;;  %v198_v2 = vld [vmem:[%s6629_s8 + $0x7b] sm:$0xff]  ;;  %v88_v12 = vld [vmem:[%s6629_s8 + $0x8] sm:$0xff] }
  0x45   :  { %673 = vrot.lane.b32.xlu0 %v220_v29, %s6631_s10  ;;  %v197_v3 = vld [vmem:[%s6629_s8 + $0x73] sm:$0xff]  ;;  %v87_v6 = vld [vmem:[%s6629_s8] sm:$0xff]  ;;  %v136_v14 = vld [vmem:[%s6629_s8 + $0x89] sm:$0xff] }
  0x46   :  { %v135_v7 = vld [vmem:[%s6629_s8 + $0x81] sm:$0xff]  ;;  %v229_v8 = vld [vmem:[%s6629_s8 + $0x74] sm:$0xff]  ;;  %v168_v22 = vld [vmem:[%s6629_s8 + $0x8a] sm:$0xff] }
  0x47   :  { %v230_v15 = vld [vmem:[%s6629_s8 + $0x7c] sm:$0xff]  ;;  %v200_v28 = vld [vmem:[%s6629_s8 + $0x8b] sm:$0xff] }
  0x48   :  { %421 = vrot.lane.b32.xlu1 %v158_v30, %s4735_s5  ;;  %v167_v23 = vld [vmem:[%s6629_s8 + $0x82] sm:$0xff] }
  0x49   :  { %419 = vrot.lane.b32.xlu0 %v157_v31, %s4735_s5  ;;  %v199_v29 = vld [vmem:[%s6629_s8 + $0x83] sm:$0xff] }
  0x4c   :  { %549 = vrot.lane.b32.xlu1 %v190_v32, %s4737_s7  ;;  %v89_v32 = vld [vmem:[%s6629_s8 + $0x10] sm:$0xff] }
  0x4d   :  { %547 = vrot.lane.b32.xlu0 %v189_v33, %s4737_s7  ;;  %v137_v33 = vld [vmem:[%s6629_s8 + $0x91] sm:$0xff] }
  0x50   :  { %295 = vrot.lane.b32.xlu1 %v127_v34, %s4736_s28  ;;  %v231_v34 = vld [vmem:[%s6629_s8 + $0x84] sm:$0xff] }
  0x51   :  { %675 = vrot.lane.b32.xlu0 %v221_v35, %s6631_s10 }
  0x54   :  { %297 = vrot.lane.b32.xlu1 %v128_v36, %s4736_s28 }
  0x55   :  { %677 = vrot.lane.b32.xlu0 %v222_v37, %s6631_s10 }
  0x58   :  { %425 = vrot.lane.b32.xlu1 %v160_v38, %s4735_s5  ;;  %v90_v38 = vld [vmem:[%s6629_s8 + $0x18] sm:$0xff] }
  0x59   :  { %423 = vrot.lane.b32.xlu0 %v159_v39, %s4735_s5 }
  0x5c   :  { %553 = vrot.lane.b32.xlu1 %v192_v40, %s4737_s7  ;;  %v138_v40 = vld [vmem:[%s6629_s8 + $0x99] sm:$0xff] }
  0x5d   :  { %551 = vrot.lane.b32.xlu0 %v191_v41, %s4737_s7  ;;  %v232_v41 = vld [vmem:[%s6629_s8 + $0x8c] sm:$0xff] }
  0x60   :  { %299 = vrot.lane.b32.xlu1 %v129_v42, %s4736_s28 }
  0x61   :  { %679 = vrot.lane.b32.xlu0 %v223_v43, %s6631_s10 }
  0x64   :  { %301 = vrot.lane.b32.xlu1 %v130_v44, %s4736_s28 }
  0x65   :  { %681 = vrot.lane.b32.xlu0 %v224_v45, %s6631_s10 }
  0x68   :  { %429 = vrot.lane.b32.xlu1 %v162_v46, %s4735_s5 }
  0x69   :  { %427 = vrot.lane.b32.xlu0 %v161_v47, %s4735_s5 }
  0x6c   :  { %557 = vrot.lane.b32.xlu1 %v194_v48, %s4737_s7  ;;  %v170_v48 = vld [vmem:[%s6629_s8 + $0x9a] sm:$0xff] }
  0x6d   :  { %555 = vrot.lane.b32.xlu0 %v193_v49, %s4737_s7  ;;  %v169_v49 = vld [vmem:[%s6629_s8 + $0x92] sm:$0xff] }
  0x70   :  { %303 = vrot.lane.b32.xlu1 %v131_v50, %s4736_s28 }
  0x71   :  { %683 = vrot.lane.b32.xlu0 %v225_v51, %s6631_s10 }
  0x74   :  { %305 = vrot.lane.b32.xlu1 %v132_v52, %s4736_s28 }
  0x75   :  { %685 = vrot.lane.b32.xlu0 %v226_v53, %s6631_s10 }
  0x78   :  { %433 = vrot.lane.b32.xlu1 %v164_v54, %s4735_s5  ;;  %v202_v54 = vld [vmem:[%s6629_s8 + $0x9b] sm:$0xff] }
  0x79   :  { %431 = vrot.lane.b32.xlu0 %v163_v55, %s4735_s5  ;;  %v201_v55 = vld [vmem:[%s6629_s8 + $0x93] sm:$0xff] }
  0x7c   :  { %561 = vrot.lane.b32.xlu1 %v196_v56, %s4737_s7 }
  0x7d   :  { %559 = vrot.lane.b32.xlu0 %v195_v57, %s4737_s7 }
  0x80   :  { %307 = vrot.lane.b32.xlu1 %v133_v58, %s4736_s28  ;;  %v91_v58 = vld [vmem:[%s6629_s8 + $0x20] sm:$0xff] }
  0x81   :  { %687 = vrot.lane.b32.xlu0 %v227_v59, %s6631_s10  ;;  %v139_v59 = vld [vmem:[%s6629_s8 + $0xa1] sm:$0xff] }
  0x84   :  { %309 = vrot.lane.b32.xlu1 %v134_v60, %s4736_s28  ;;  %v233_v60 = vld [vmem:[%s6629_s8 + $0x94] sm:$0xff] }
  0x85   :  { %689 = vrot.lane.b32.xlu0 %v228_v61, %s6631_s10 }
  0x86   :  { %v408_v0 = vpop.permute.xlu1 %407 }
  0x87   :  { %v280_v1 = vpop.permute.xlu0 %279 }
  0x88   :  { %437 = vrot.lane.b32.xlu1 %v166_v62, %s4735_s5  ;;  %v760_v9 = vsel %vm759_vm1, %v87_v6, %v280_v1 }
  0x89   :  { %435 = vrot.lane.b32.xlu0 %v165_v63, %s4735_s5  ;;  %v793_v13 = vsel %vm792_vm2, %v760_v9, %v408_v0  ;;  %v92_v0 = vld [vmem:[%s6629_s8 + $0x28] sm:$0xff] }
  0x8a   :  { %v410_v4 = vpop.permute.xlu1 %409 }
  0x8b   :  { %v282_v5 = vpop.permute.xlu0 %281 }
  0x8c   :  { %565 = vrot.lane.b32.xlu1 %v198_v2, %s4737_s7  ;;  %v761_v16 = vsel %vm759_vm1, %v88_v12, %v282_v5  ;;  %v140_v2 = vld [vmem:[%s6629_s8 + $0xa9] sm:$0xff] }
  0x8d   :  { %563 = vrot.lane.b32.xlu0 %v197_v3, %s4737_s7  ;;  %v794_v21 = vsel %vm792_vm2, %v761_v16, %v410_v4  ;;  %v234_v3 = vld [vmem:[%s6629_s8 + $0x9c] sm:$0xff]  ;;  %v204_v16 = vld [vmem:[%s6629_s8 + $0xab] sm:$0xff] }
  0x8e   :  { %v538_v10 = vpop.permute.xlu1 %537 }
  0x8f   :  { %v536_v11 = vpop.permute.xlu0 %535  ;;  %v827_v24 = vsel %vm825_vm3, %v794_v21, %v538_v10  ;;  %v172_v10 = vld [vmem:[%s6629_s8 + $0xaa] sm:$0xff] }
  0x90   :  { %311 = vrot.lane.b32.xlu1 %v135_v7, %s4736_s28  ;;  %v826_v17 = vsel %vm825_vm3, %v793_v13, %v536_v11  ;;  %v171_v11 = vld [vmem:[%s6629_s8 + $0xa2] sm:$0xff]  ;;  %v141_v21 = vld [vmem:[%s6629_s8 + $0xb1] sm:$0xff] }
  0x91   :  { %691 = vrot.lane.b32.xlu0 %v229_v8, %s6631_s10 }
  0x92   :  { %v284_v18 = vpop.permute.xlu1 %283 }
  0x93   :  { %v664_v19 = vpop.permute.xlu0 %663  ;;  %v762_v37 = vsel %vm759_vm1, %v89_v32, %v284_v18 }
  0x94   :  { %v859_v20 = vsel %vm858_vm4, %v826_v17, %v664_v19  ;;  %313 = vrot.lane.b32.xlu1 %v136_v14, %s4736_s28  ;;  %v203_v17 = vld [vmem:[%s6629_s8 + $0xa3] sm:$0xff] }
  0x95   :  { %693 = vrot.lane.b32.xlu0 %v230_v15, %s6631_s10  ;;  %4452 = vmatprep.mubr.msk.f32.mxu0 %vm901_vm5, %v859_v20  ;;  %v93_v20 = vld [vmem:[%s6629_s8 + $0x30] sm:$0xff] }
  0x96   :  { %v286_v25 = vpop.permute.xlu1 %285 }
  0x97   :  { %v666_v26 = vpop.permute.xlu0 %665  ;;  %v763_v46 = vsel %vm759_vm1, %v90_v38, %v286_v25 }
  0x98   :  { %v860_v27 = vsel %vm858_vm4, %v827_v24, %v666_v26  ;;  %441 = vrot.lane.b32.xlu1 %v168_v22, %s4735_s5  ;;  %v235_v22 = vld [vmem:[%s6629_s8 + $0xa4] sm:$0xff]  ;;  %v94_v26 = vld [vmem:[%s6629_s8 + $0x38] sm:$0xff] }
  0x99   :  { %439 = vrot.lane.b32.xlu0 %v167_v23, %s4735_s5  ;;  %4453 = vmatmul.mubr.msk.f32.vlgmr.msra.gmra.mrb[0].mxu0 %vm901_vm5, %v860_v27 }
  0x9a   :  { %v414_v30 = vpop.permute.xlu1 %413 }
  0x9b   :  { %v412_v31 = vpop.permute.xlu0 %411  ;;  %v796_v47 = vsel %vm792_vm2, %v763_v46, %v414_v30  ;;  %v95_v46 = vld [vmem:[%s6629_s8 + $0x40] sm:$0xff] }
  0x9c   :  { %569 = vrot.lane.b32.xlu1 %v200_v28, %s4737_s7  ;;  %v795_v39 = vsel %vm792_vm2, %v762_v37, %v412_v31  ;;  %v142_v28 = vld [vmem:[%s6629_s8 + $0xb9] sm:$0xff] }
  0x9d   :  { %567 = vrot.lane.b32.xlu0 %v199_v29, %s4737_s7  ;;  %v236_v29 = vld [vmem:[%s6629_s8 + $0xac] sm:$0xff] }
  0x9e   :  { %v542_v35 = vpop.permute.xlu1 %541  ;;  %v173_v37 = vld [vmem:[%s6629_s8 + $0xb2] sm:$0xff] }
  0x9f   :  { %v540_v36 = vpop.permute.xlu0 %539  ;;  %v829_v50 = vsel %vm825_vm3, %v796_v47, %v542_v35  ;;  %v143_v47 = vld [vmem:[%s6629_s8 + $0xc1] sm:$0xff] }
  0xa0   :  { %315 = vrot.lane.b32.xlu1 %v137_v33, %s4736_s28  ;;  %v828_v42 = vsel %vm825_vm3, %v795_v39, %v540_v36  ;;  %v174_v36 = vld [vmem:[%s6629_s8 + $0xba] sm:$0xff] }
  0xa1   :  { %695 = vrot.lane.b32.xlu0 %v231_v34, %s6631_s10 }
  0xa2   :  { %v288_v43 = vpop.permute.xlu1 %287 }
  0xa3   :  { %v668_v44 = vpop.permute.xlu0 %667  ;;  %v764_v63 = vsel %vm759_vm1, %v91_v58, %v288_v43  ;;  %v205_v43 = vld [vmem:[%s6629_s8 + $0xb3] sm:$0xff] }
  0xa4   :  { %v861_v45 = vsel %vm858_vm4, %v828_v42, %v668_v44  ;;  %317 = vrot.lane.b32.xlu1 %v138_v40, %s4736_s28  ;;  %v206_v42 = vld [vmem:[%s6629_s8 + $0xbb] sm:$0xff] }
  0xa5   :  { %697 = vrot.lane.b32.xlu0 %v232_v41, %s6631_s10  ;;  %4455 = vmatprep.mubr.msk.f32.mxu0 %vm901_vm5, %v861_v45 }
  0xa6   :  { %v290_v51 = vpop.permute.xlu1 %289 }
  0xa7   :  { %v670_v52 = vpop.permute.xlu0 %669  ;;  %v765_v8 = vsel %vm759_vm1, %v92_v0, %v290_v51 }
  0xa8   :  { %v862_v53 = vsel %vm858_vm4, %v829_v50, %v670_v52  ;;  %445 = vrot.lane.b32.xlu1 %v170_v48, %s4735_s5  ;;  %v237_v48 = vld [vmem:[%s6629_s8 + $0xb4] sm:$0xff]  ;;  %v96_v52 = vld [vmem:[%s6629_s8 + $0x48] sm:$0xff] }
  0xa9   :  { %443 = vrot.lane.b32.xlu0 %v169_v49, %s4735_s5  ;;  %4456 = vmatmul.mubr.msk.f32.gmra.mrb[2].mxu0 %vm901_vm5, %v862_v53 }
  0xaa   :  { %v418_v56 = vpop.permute.xlu1 %417 }
  0xab   :  { %v416_v57 = vpop.permute.xlu0 %415  ;;  %v798_v9 = vsel %vm792_vm2, %v765_v8, %v418_v56  ;;  %v97_v8 = vld [vmem:[%s6629_s8 + $0x50] sm:$0xff] }
  0xac   :  { %573 = vrot.lane.b32.xlu1 %v202_v54, %s4737_s7  ;;  %v797_v1 = vsel %vm792_vm2, %v764_v63, %v416_v57  ;;  %v144_v54 = vld [vmem:[%s6629_s8 + $0xc9] sm:$0xff] }
  0xad   :  { %571 = vrot.lane.b32.xlu0 %v201_v55, %s4737_s7  ;;  %v238_v55 = vld [vmem:[%s6629_s8 + $0xbc] sm:$0xff] }
  0xae   :  { %v546_v61 = vpop.permute.xlu1 %545  ;;  %v175_v63 = vld [vmem:[%s6629_s8 + $0xc2] sm:$0xff] }
  0xaf   :  { %v544_v62 = vpop.permute.xlu0 %543  ;;  %v831_v12 = vsel %vm825_vm3, %v798_v9, %v546_v61  ;;  %v145_v9 = vld [vmem:[%s6629_s8 + $0xd1] sm:$0xff] }
  0xb0   :  { %319 = vrot.lane.b32.xlu1 %v139_v59, %s4736_s28  ;;  %v830_v4 = vsel %vm825_vm3, %v797_v1, %v544_v62  ;;  %v176_v62 = vld [vmem:[%s6629_s8 + $0xca] sm:$0xff] }
  0xb1   :  { %699 = vrot.lane.b32.xlu0 %v233_v60, %s6631_s10 }
  0xb2   :  { %v292_v5 = vpop.permute.xlu1 %291 }
  0xb3   :  { %v672_v6 = vpop.permute.xlu0 %671  ;;  %v766_v25 = vsel %vm759_vm1, %v93_v20, %v292_v5  ;;  %v207_v5 = vld [vmem:[%s6629_s8 + $0xc3] sm:$0xff] }
  0xb4   :  { %v863_v7 = vsel %vm858_vm4, %v830_v4, %v672_v6  ;;  %321 = vrot.lane.b32.xlu1 %v140_v2, %s4736_s28  ;;  %v208_v4 = vld [vmem:[%s6629_s8 + $0xcb] sm:$0xff] }
  0xb5   :  { %701 = vrot.lane.b32.xlu0 %v234_v3, %s6631_s10  ;;  %4458 = vmatprep.mubr.msk.f32.mxu0 %vm901_vm5, %v863_v7 }
  0xb6   :  { %v294_v13 = vpop.permute.xlu1 %293 }
  0xb7   :  { %v674_v14 = vpop.permute.xlu0 %673  ;;  %v767_v34 = vsel %vm759_vm1, %v94_v26, %v294_v13 }
  0xb8   :  { %v864_v15 = vsel %vm858_vm4, %v831_v12, %v674_v14  ;;  %449 = vrot.lane.b32.xlu1 %v172_v10, %s4735_s5  ;;  %v239_v10 = vld [vmem:[%s6629_s8 + $0xc4] sm:$0xff]  ;;  %v98_v14 = vld [vmem:[%s6629_s8 + $0x58] sm:$0xff] }
  0xb9   :  { %447 = vrot.lane.b32.xlu0 %v171_v11, %s4735_s5  ;;  %4459 = vmatmul.mubr.msk.f32.gmra.mrb[4].mxu0 %vm901_vm5, %v864_v15 }
  0xba   :  { %v422_v18 = vpop.permute.xlu1 %421 }
  0xbb   :  { %v420_v19 = vpop.permute.xlu0 %419  ;;  %v800_v35 = vsel %vm792_vm2, %v767_v34, %v422_v18  ;;  %v99_v34 = vld [vmem:[%s6629_s8 + $0x60] sm:$0xff] }
  0xbc   :  { %577 = vrot.lane.b32.xlu1 %v204_v16, %s4737_s7  ;;  %v799_v27 = vsel %vm792_vm2, %v766_v25, %v420_v19  ;;  %v146_v16 = vld [vmem:[%s6629_s8 + $0xd9] sm:$0xff] }
  0xbd   :  { %575 = vrot.lane.b32.xlu0 %v203_v17, %s4737_s7  ;;  %v240_v17 = vld [vmem:[%s6629_s8 + $0xcc] sm:$0xff] }
  0xbe   :  { %v550_v23 = vpop.permute.xlu1 %549  ;;  %v177_v25 = vld [vmem:[%s6629_s8 + $0xd2] sm:$0xff] }
  0xbf   :  { %v548_v24 = vpop.permute.xlu0 %547  ;;  %v833_v38 = vsel %vm825_vm3, %v800_v35, %v550_v23  ;;  %v147_v35 = vld [vmem:[%s6629_s8 + $0xe1] sm:$0xff] }
  0xc0   :  { %323 = vrot.lane.b32.xlu1 %v141_v21, %s4736_s28  ;;  %v832_v30 = vsel %vm825_vm3, %v799_v27, %v548_v24  ;;  %v178_v24 = vld [vmem:[%s6629_s8 + $0xda] sm:$0xff] }
  0xc1   :  { %703 = vrot.lane.b32.xlu0 %v235_v22, %s6631_s10 }
  0xc2   :  { %v296_v31 = vpop.permute.xlu1 %295 }
  0xc3   :  { %v676_v32 = vpop.permute.xlu0 %675  ;;  %v768_v51 = vsel %vm759_vm1, %v95_v46, %v296_v31  ;;  %v209_v31 = vld [vmem:[%s6629_s8 + $0xd3] sm:$0xff] }
  0xc4   :  { %v865_v33 = vsel %vm858_vm4, %v832_v30, %v676_v32  ;;  %325 = vrot.lane.b32.xlu1 %v142_v28, %s4736_s28  ;;  %v210_v30 = vld [vmem:[%s6629_s8 + $0xdb] sm:$0xff] }
  0xc5   :  { %705 = vrot.lane.b32.xlu0 %v236_v29, %s6631_s10  ;;  %4461 = vmatprep.mubr.msk.f32.mxu0 %vm901_vm5, %v865_v33 }
  0xc6   :  { %v298_v39 = vpop.permute.xlu1 %297 }
  0xc7   :  { %v678_v40 = vpop.permute.xlu0 %677  ;;  %v769_v60 = vsel %vm759_vm1, %v96_v52, %v298_v39 }
  0xc8   :  { %v866_v41 = vsel %vm858_vm4, %v833_v38, %v678_v40  ;;  %453 = vrot.lane.b32.xlu1 %v174_v36, %s4735_s5  ;;  %v241_v36 = vld [vmem:[%s6629_s8 + $0xd4] sm:$0xff]  ;;  %v100_v40 = vld [vmem:[%s6629_s8 + $0x68] sm:$0xff] }
  0xc9   :  { %451 = vrot.lane.b32.xlu0 %v173_v37, %s4735_s5  ;;  %4462 = vmatmul.mubr.msk.f32.gmra.mrb[6].mxu0 %vm901_vm5, %v866_v41 }
  0xca   :  { %v426_v44 = vpop.permute.xlu1 %425 }
  0xcb   :  { %v424_v45 = vpop.permute.xlu0 %423  ;;  %v802_v61 = vsel %vm792_vm2, %v769_v60, %v426_v44  ;;  %v101_v60 = vld [vmem:[%s6629_s8 + $0x70] sm:$0xff] }
  0xcc   :  { %581 = vrot.lane.b32.xlu1 %v206_v42, %s4737_s7  ;;  %v801_v53 = vsel %vm792_vm2, %v768_v51, %v424_v45  ;;  %v148_v42 = vld [vmem:[%s6629_s8 + $0xe9] sm:$0xff] }
  0xcd   :  { %579 = vrot.lane.b32.xlu0 %v205_v43, %s4737_s7  ;;  %v242_v43 = vld [vmem:[%s6629_s8 + $0xdc] sm:$0xff] }
  0xce   :  { %v554_v49 = vpop.permute.xlu1 %553  ;;  %v179_v51 = vld [vmem:[%s6629_s8 + $0xe2] sm:$0xff] }
  0xcf   :  { %v552_v50 = vpop.permute.xlu0 %551  ;;  %v835_v0 = vsel %vm825_vm3, %v802_v61, %v554_v49  ;;  %v149_v61 = vld [vmem:[%s6629_s8 + $0xf1] sm:$0xff] }
  0xd0   :  { %327 = vrot.lane.b32.xlu1 %v143_v47, %s4736_s28  ;;  %v834_v56 = vsel %vm825_vm3, %v801_v53, %v552_v50  ;;  %v180_v50 = vld [vmem:[%s6629_s8 + $0xea] sm:$0xff] }
  0xd1   :  { %707 = vrot.lane.b32.xlu0 %v237_v48, %s6631_s10 }
  0xd2   :  { %v300_v57 = vpop.permute.xlu1 %299 }
  0xd3   :  { %v680_v58 = vpop.permute.xlu0 %679  ;;  %v770_v13 = vsel %vm759_vm1, %v97_v8, %v300_v57  ;;  %v211_v57 = vld [vmem:[%s6629_s8 + $0xe3] sm:$0xff] }
  0xd4   :  { %v867_v59 = vsel %vm858_vm4, %v834_v56, %v680_v58  ;;  %329 = vrot.lane.b32.xlu1 %v144_v54, %s4736_s28  ;;  %v212_v56 = vld [vmem:[%s6629_s8 + $0xeb] sm:$0xff] }
  0xd5   :  { %709 = vrot.lane.b32.xlu0 %v238_v55, %s6631_s10  ;;  %4464 = vmatprep.mubr.msk.f32.mxu0 %vm901_vm5, %v867_v59 }
  0xd6   :  { %v302_v1 = vpop.permute.xlu1 %301 }
  0xd7   :  { %v682_v2 = vpop.permute.xlu0 %681  ;;  %v771_v22 = vsel %vm759_vm1, %v98_v14, %v302_v1 }
  0xd8   :  { %v868_v3 = vsel %vm858_vm4, %v835_v0, %v682_v2  ;;  %457 = vrot.lane.b32.xlu1 %v176_v62, %s4735_s5  ;;  %v243_v62 = vld [vmem:[%s6629_s8 + $0xe4] sm:$0xff]  ;;  %v102_v2 = vld [vmem:[%s6629_s8 + $0x78] sm:$0xff] }
  0xd9   :  { %455 = vrot.lane.b32.xlu0 %v175_v63, %s4735_s5  ;;  %4465 = vmatmul.mubr.msk.f32.gmra.mrb[8].mxu0 %vm901_vm5, %v868_v3 }
  0xda   :  { %v430_v6 = vpop.permute.xlu1 %429 }
  0xdb   :  { %v428_v7 = vpop.permute.xlu0 %427  ;;  %v804_v23 = vsel %vm792_vm2, %v771_v22, %v430_v6  ;;  %v103_v22 = vld [vmem:[%s6629_s8 + $0x80] sm:$0xff] }
  0xdc   :  { %585 = vrot.lane.b32.xlu1 %v208_v4, %s4737_s7  ;;  %v803_v15 = vsel %vm792_vm2, %v770_v13, %v428_v7  ;;  %v150_v4 = vld [vmem:[%s6629_s8 + $0xf9] sm:$0xf] }
  0xdd   :  { %583 = vrot.lane.b32.xlu0 %v207_v5, %s4737_s7  ;;  %v244_v5 = vld [vmem:[%s6629_s8 + $0xec] sm:$0xff] }
  0xde   :  { %v558_v11 = vpop.permute.xlu1 %557  ;;  %v181_v13 = vld [vmem:[%s6629_s8 + $0xf2] sm:$0xff] }
  0xdf   :  { %v556_v12 = vpop.permute.xlu0 %555  ;;  %v837_v26 = vsel %vm825_vm3, %v804_v23, %v558_v11  ;;  %v246_v23 = vld [vmem:[%s6629_s8 + $0xfc] sm:$0xf] }
  0xe0   :  { %331 = vrot.lane.b32.xlu1 %v145_v9, %s4736_s28  ;;  %v836_v18 = vsel %vm825_vm3, %v803_v15, %v556_v12  ;;  %v182_v12 = vld [vmem:[%s6629_s8 + $0xfa] sm:$0xf] }
  0xe1   :  { %711 = vrot.lane.b32.xlu0 %v239_v10, %s6631_s10 }
  0xe2   :  { %v304_v19 = vpop.permute.xlu1 %303 }
  0xe3   :  { %v684_v20 = vpop.permute.xlu0 %683  ;;  %v772_v39 = vsel %vm759_vm1, %v99_v34, %v304_v19  ;;  %v213_v19 = vld [vmem:[%s6629_s8 + $0xf3] sm:$0xff] }
  0xe4   :  { %v869_v21 = vsel %vm858_vm4, %v836_v18, %v684_v20  ;;  %333 = vrot.lane.b32.xlu1 %v146_v16, %s4736_s28  ;;  %v214_v18 = vld [vmem:[%s6629_s8 + $0xfb] sm:$0xf] }
  0xe5   :  { %713 = vrot.lane.b32.xlu0 %v240_v17, %s6631_s10  ;;  %4467 = vmatprep.mubr.msk.f32.mxu0 %vm901_vm5, %v869_v21 }
  0xe6   :  { %v306_v27 = vpop.permute.xlu1 %305 }
  0xe7   :  { %v686_v28 = vpop.permute.xlu0 %685  ;;  %v773_v48 = vsel %vm759_vm1, %v100_v40, %v306_v27 }
  0xe8   :  { %v870_v29 = vsel %vm858_vm4, %v837_v26, %v686_v28  ;;  %461 = vrot.lane.b32.xlu1 %v178_v24, %s4735_s5  ;;  %v245_v24 = vld [vmem:[%s6629_s8 + $0xf4] sm:$0xff]  ;;  %v104_v28 = vld [vmem:[%s6629_s8 + $0x88] sm:$0xff] }
  0xe9   :  { %459 = vrot.lane.b32.xlu0 %v177_v25, %s4735_s5  ;;  %4468 = vmatmul.mubr.msk.f32.gmra.mrb[10].mxu0 %vm901_vm5, %v870_v29 }
  0xea   :  { %v434_v32 = vpop.permute.xlu1 %433 }
  0xeb   :  { %v432_v33 = vpop.permute.xlu0 %431  ;;  %v806_v49 = vsel %vm792_vm2, %v773_v48, %v434_v32 }
  0xec   :  { %589 = vrot.lane.b32.xlu1 %v210_v30, %s4737_s7  ;;  %v805_v41 = vsel %vm792_vm2, %v772_v39, %v432_v33 }
  0xed   :  { %587 = vrot.lane.b32.xlu0 %v209_v31, %s4737_s7 }
  0xee   :  { %v562_v37 = vpop.permute.xlu1 %561 }
  0xef   :  { %v560_v38 = vpop.permute.xlu0 %559  ;;  %v839_v52 = vsel %vm825_vm3, %v806_v49, %v562_v37 }
  0xf0   :  { %335 = vrot.lane.b32.xlu1 %v147_v35, %s4736_s28  ;;  %v838_v44 = vsel %vm825_vm3, %v805_v41, %v560_v38 }
  0xf1   :  { %715 = vrot.lane.b32.xlu0 %v241_v36, %s6631_s10 }
  0xf2   :  { %v308_v45 = vpop.permute.xlu1 %307 }
  0xf3   :  { %v688_v46 = vpop.permute.xlu0 %687  ;;  %v774_v1 = vsel %vm759_vm1, %v101_v60, %v308_v45  ;;  %v107_v60 = vld [vmem:[%s6629_s8 + $0xa0] sm:$0xff] }
  0xf4   :  { %v871_v47 = vsel %vm858_vm4, %v838_v44, %v688_v46  ;;  %337 = vrot.lane.b32.xlu1 %v148_v42, %s4736_s28  ;;  %v105_v42 = vld [vmem:[%s6629_s8 + $0x90] sm:$0xff]  ;;  %v106_v46 = vld [vmem:[%s6629_s8 + $0x98] sm:$0xff] }
  0xf5   :  { %717 = vrot.lane.b32.xlu0 %v242_v43, %s6631_s10  ;;  %4470 = vmatprep.mubr.msk.f32.mxu0 %vm901_vm5, %v871_v47 }
  0xf6   :  { %v310_v53 = vpop.permute.xlu1 %309 }
  0xf7   :  { %v690_v54 = vpop.permute.xlu0 %689  ;;  %v775_v10 = vsel %vm759_vm1, %v102_v2, %v310_v53 }
  0xf8   :  { %v872_v55 = vsel %vm858_vm4, %v839_v52, %v690_v54  ;;  %465 = vrot.lane.b32.xlu1 %v180_v50, %s4735_s5 }
  0xf9   :  { %463 = vrot.lane.b32.xlu0 %v179_v51, %s4735_s5  ;;  %4471 = vmatmul.mubr.msk.f32.gmra.mrb[12].mxu0 %vm901_vm5, %v872_v55 }
  0xfa   :  { %v438_v58 = vpop.permute.xlu1 %437 }
  0xfb   :  { %v436_v59 = vpop.permute.xlu0 %435  ;;  %v808_v11 = vsel %vm792_vm2, %v775_v10, %v438_v58 }
  0xfc   :  { %593 = vrot.lane.b32.xlu1 %v212_v56, %s4737_s7  ;;  %v807_v3 = vsel %vm792_vm2, %v774_v1, %v436_v59 }
  0xfd   :  { %591 = vrot.lane.b32.xlu0 %v211_v57, %s4737_s7 }
  0xfe   :  { %v566_v63 = vpop.permute.xlu1 %565 }
  0xff   :  { %v564_v0 = vpop.permute.xlu0 %563  ;;  %v841_v14 = vsel %vm825_vm3, %v808_v11, %v566_v63 }
 0x100   :  { %339 = vrot.lane.b32.xlu1 %v149_v61, %s4736_s28  ;;  %v840_v6 = vsel %vm825_vm3, %v807_v3, %v564_v0  ;;  %v108_v0 = vld [vmem:[%s6629_s8 + $0xa8] sm:$0xff] }
 0x101   :  { %719 = vrot.lane.b32.xlu0 %v243_v62, %s6631_s10 }
 0x102   :  { %v312_v7 = vpop.permute.xlu1 %311 }
 0x103   :  { %v692_v8 = vpop.permute.xlu0 %691  ;;  %v776_v27 = vsel %vm759_vm1, %v103_v22, %v312_v7 }
 0x104   :  { %v873_v9 = vsel %vm858_vm4, %v840_v6, %v692_v8  ;;  %341 = vrot.lane.b32.xlu1 %v150_v4, %s4736_s28  ;;  %s6636_s28 = sld [smem:[#allocation17_spill]] }
 0x105   :  { %721 = vrot.lane.b32.xlu0 %v244_v5, %s6631_s10  ;;  %4473 = vmatprep.mubr.msk.f32.mxu0 %vm901_vm5, %v873_v9 }
 0x106   :  { %v314_v15 = vpop.permute.xlu1 %313 }
 0x107   :  { %v694_v16 = vpop.permute.xlu0 %693  ;;  %v777_v34 = vsel %vm759_vm1, %v104_v28, %v314_v15 }
 0x108   :  { %v874_v17 = vsel %vm858_vm4, %v841_v14, %v694_v16  ;;  %469 = vrot.lane.b32.xlu1 %v182_v12, %s4735_s5  ;;  %v109_v14 = vld [vmem:[%s6629_s8 + $0xb0] sm:$0xff] }
 0x109   :  { %467 = vrot.lane.b32.xlu0 %v181_v13, %s4735_s5  ;;  %4474 = vmatmul.mubr.msk.f32.gmra.mrb[14].mxu0 %vm901_vm5, %v874_v17 }
 0x10a   :  { %v442_v20 = vpop.permute.xlu1 %441 }
 0x10b   :  { %v440_v21 = vpop.permute.xlu0 %439  ;;  %v810_v35 = vsel %vm792_vm2, %v777_v34, %v442_v20 }
 0x10c   :  { %597 = vrot.lane.b32.xlu1 %v214_v18, %s4737_s7  ;;  %v809_v29 = vsel %vm792_vm2, %v776_v27, %v440_v21  ;;  %v110_v18 = vld [vmem:[%s6629_s8 + $0xb8] sm:$0xff] }
 0x10d   :  { %595 = vrot.lane.b32.xlu0 %v213_v19, %s4737_s7  ;;  %s6632_s7 = sld [smem:[#allocation13_spill]] }
 0x10e   :  { %v570_v25 = vpop.permute.xlu1 %569 }
 0x10f   :  { %v568_v26 = vpop.permute.xlu0 %567  ;;  %v843_v36 = vsel %vm825_vm3, %v810_v35, %v570_v25 }
 0x110   :  { %725 = vrot.lane.b32.xlu1 %v246_v23, %s6631_s10  ;;  %v842_v30 = vsel %vm825_vm3, %v809_v29, %v568_v26 }
 0x111   :  { %723 = vrot.lane.b32.xlu0 %v245_v24, %s6631_s10 }
 0x112   :  { %v316_v31 = vpop.permute.xlu1 %315 }
 0x113   :  { %v696_v32 = vpop.permute.xlu0 %695  ;;  %v778_v45 = vsel %vm759_vm1, %v105_v42, %v316_v31 }
 0x114   :  { %v875_v33 = vsel %vm858_vm4, %v842_v30, %v696_v32  ;;  %v111_v32 = vld [vmem:[%s6629_s8 + $0xc0] sm:$0xff] }
 0x115   :  { %4476 = vmatprep.mubr.msk.f32.mxu0 %vm901_vm5, %v875_v33 }
 0x116   :  { %v318_v37 = vpop.permute.xlu1 %317 }
 0x117   :  { %v698_v38 = vpop.permute.xlu0 %697  ;;  %v779_v52 = vsel %vm759_vm1, %v106_v46, %v318_v37 }
 0x118   :  { %v876_v39 = vsel %vm858_vm4, %v843_v36, %v698_v38  ;;  %v112_v36 = vld [vmem:[%s6629_s8 + $0xc8] sm:$0xff] }
 0x119   :  { %4477 = vmatmul.mubr.msk.f32.gmra.mrb[16].mxu0 %vm901_vm5, %v876_v39 }
 0x11a   :  { %v446_v40 = vpop.permute.xlu1 %445 }
 0x11b   :  { %v444_v41 = vpop.permute.xlu0 %443  ;;  %v812_v53 = vsel %vm792_vm2, %v779_v52, %v446_v40 }
 0x11c   :  { %v811_v47 = vsel %vm792_vm2, %v778_v45, %v444_v41 }
 0x11e   :  { %v574_v43 = vpop.permute.xlu1 %573 }
 0x11f   :  { %v572_v44 = vpop.permute.xlu0 %571  ;;  %v845_v54 = vsel %vm825_vm3, %v812_v53, %v574_v43 }
 0x120   :  { %v844_v48 = vsel %vm825_vm3, %v811_v47, %v572_v44 }
 0x122   :  { %v320_v49 = vpop.permute.xlu1 %319 }
 0x123   :  { %v700_v50 = vpop.permute.xlu0 %699  ;;  %v780_v63 = vsel %vm759_vm1, %v107_v60, %v320_v49 }
 0x124   :  { %v877_v51 = vsel %vm858_vm4, %v844_v48, %v700_v50  ;;  %v113_v50 = vld [vmem:[%s6629_s8 + $0xd0] sm:$0xff] }
 0x125   :  { %4479 = vmatprep.mubr.msk.f32.mxu0 %vm901_vm5, %v877_v51 }
 0x126   :  { %v322_v55 = vpop.permute.xlu1 %321 }
 0x127   :  { %v702_v56 = vpop.permute.xlu0 %701  ;;  %v781_v6 = vsel %vm759_vm1, %v108_v0, %v322_v55 }
 0x128   :  { %v878_v57 = vsel %vm858_vm4, %v845_v54, %v702_v56  ;;  %v114_v54 = vld [vmem:[%s6629_s8 + $0xd8] sm:$0xff] }
 0x129   :  { %4480 = vmatmul.mubr.msk.f32.gmra.mrb[18].mxu0 %vm901_vm5, %v878_v57 }
 0x12a   :  { %v450_v58 = vpop.permute.xlu1 %449 }
 0x12b   :  { %v448_v59 = vpop.permute.xlu0 %447  ;;  %v814_v7 = vsel %vm792_vm2, %v781_v6, %v450_v58  ;;  %v115_v6 = vld [vmem:[%s6629_s8 + $0xe0] sm:$0xff] }
 0x12c   :  { %v813_v1 = vsel %vm792_vm2, %v780_v63, %v448_v59 }
 0x12e   :  { %v578_v61 = vpop.permute.xlu1 %577 }
 0x12f   :  { %v576_v62 = vpop.permute.xlu0 %575  ;;  %v847_v8 = vsel %vm825_vm3, %v814_v7, %v578_v61 }
 0x130   :  { %v846_v2 = vsel %vm825_vm3, %v813_v1, %v576_v62 }
 0x132   :  { %v324_v3 = vpop.permute.xlu1 %323 }
 0x133   :  { %v704_v4 = vpop.permute.xlu0 %703  ;;  %v782_v17 = vsel %vm759_vm1, %v109_v14, %v324_v3 }
 0x134   :  { %v879_v5 = vsel %vm858_vm4, %v846_v2, %v704_v4  ;;  %v5631_v4 = vld [vmem:[%s6632_s7] ss:$0 sm:$0xff] }
 0x135   :  { %4482 = vmatprep.mubr.msk.f32.mxu0 %vm901_vm5, %v879_v5 }
 0x136   :  { %v326_v9 = vpop.permute.xlu1 %325 }
 0x137   :  { %v706_v10 = vpop.permute.xlu0 %705  ;;  %v783_v24 = vsel %vm759_vm1, %v110_v18, %v326_v9 }
 0x138   :  { %v880_v11 = vsel %vm858_vm4, %v847_v8, %v706_v10 }
 0x139   :  { %4483 = vmatmul.mubr.msk.f32.gmra.mrb[20].mxu0 %vm901_vm5, %v880_v11 }
 0x13a   :  { %v454_v12 = vpop.permute.xlu1 %453 }
 0x13b   :  { %v452_v13 = vpop.permute.xlu0 %451  ;;  %v816_v25 = vsel %vm792_vm2, %v783_v24, %v454_v12 }
 0x13c   :  { %v815_v19 = vsel %vm792_vm2, %v782_v17, %v452_v13 }
 0x13e   :  { %v582_v15 = vpop.permute.xlu1 %581 }
 0x13f   :  { %v580_v16 = vpop.permute.xlu0 %579  ;;  %v849_v26 = vsel %vm825_vm3, %v816_v25, %v582_v15  ;;  %v116_v15 = vld [vmem:[%s6629_s8 + $0xe8] sm:$0xff] }
 0x140   :  { %v848_v20 = vsel %vm825_vm3, %v815_v19, %v580_v16 }
 0x142   :  { %v328_v21 = vpop.permute.xlu1 %327 }
 0x143   :  { %v708_v22 = vpop.permute.xlu0 %707  ;;  %v784_v35 = vsel %vm759_vm1, %v111_v32, %v328_v21 }
 0x144   :  { %v881_v23 = vsel %vm858_vm4, %v848_v20, %v708_v22 }
 0x145   :  { %4485 = vmatprep.mubr.msk.f32.mxu0 %vm901_vm5, %v881_v23 }
 0x146   :  { %v330_v27 = vpop.permute.xlu1 %329 }
 0x147   :  { %v710_v28 = vpop.permute.xlu0 %709  ;;  %v785_v42 = vsel %vm759_vm1, %v112_v36, %v330_v27  ;;  %v118_v36 = vld [vmem:[%s6629_s8 + $0xf8] sm:$0xf] }
 0x148   :  { %v882_v29 = vsel %vm858_vm4, %v849_v26, %v710_v28 }
 0x149   :  { %4486 = vmatmul.mubr.msk.f32.gmra.mrb[22].mxu0 %vm901_vm5, %v882_v29 }
 0x14a   :  { %v458_v30 = vpop.permute.xlu1 %457 }
 0x14b   :  { %v456_v31 = vpop.permute.xlu0 %455  ;;  %v818_v43 = vsel %vm792_vm2, %v785_v42, %v458_v30 }
 0x14c   :  { %v817_v37 = vsel %vm792_vm2, %v784_v35, %v456_v31  ;;  %v117_v35 = vld [vmem:[%s6629_s8 + $0xf0] sm:$0xff]  ;;  %s6635_s8 = sld [smem:[#allocation16_spill]] }
 0x14e   :  { %v586_v33 = vpop.permute.xlu1 %585 }
 0x14f   :  { %v584_v34 = vpop.permute.xlu0 %583  ;;  %v851_v44 = vsel %vm825_vm3, %v818_v43, %v586_v33 }
 0x150   :  { %v850_v38 = vsel %vm825_vm3, %v817_v37, %v584_v34 }
 0x152   :  { %v332_v39 = vpop.permute.xlu1 %331 }
 0x153   :  { %v712_v40 = vpop.permute.xlu0 %711  ;;  %v786_v53 = vsel %vm759_vm1, %v113_v50, %v332_v39 }
 0x154   :  { %v883_v41 = vsel %vm858_vm4, %v850_v38, %v712_v40 }
 0x155   :  { %4488 = vmatprep.mubr.msk.f32.mxu0 %vm901_vm5, %v883_v41 }
 0x156   :  { %v334_v45 = vpop.permute.xlu1 %333 }
 0x157   :  { %v714_v46 = vpop.permute.xlu0 %713  ;;  %v787_v60 = vsel %vm759_vm1, %v114_v54, %v334_v45 }
 0x158   :  { %v884_v47 = vsel %vm858_vm4, %v851_v44, %v714_v46 }
 0x159   :  { %4489 = vmatmul.mubr.msk.f32.gmra.mrb[24].mxu0 %vm901_vm5, %v884_v47 }
 0x15a   :  { %v462_v48 = vpop.permute.xlu1 %461 }
 0x15b   :  { %v460_v49 = vpop.permute.xlu0 %459  ;;  %v820_v61 = vsel %vm792_vm2, %v787_v60, %v462_v48 }
 0x15c   :  { %v819_v55 = vsel %vm792_vm2, %v786_v53, %v460_v49 }
 0x15e   :  { %v590_v51 = vpop.permute.xlu1 %589 }
 0x15f   :  { %v588_v52 = vpop.permute.xlu0 %587  ;;  %v853_v62 = vsel %vm825_vm3, %v820_v61, %v590_v51 }
 0x160   :  { %v852_v56 = vsel %vm825_vm3, %v819_v55, %v588_v52 }
 0x162   :  { %v336_v57 = vpop.permute.xlu1 %335 }
 0x163   :  { %v716_v58 = vpop.permute.xlu0 %715  ;;  %v788_v13 = vsel %vm759_vm1, %v115_v6, %v336_v57 }
 0x164   :  { %v885_v59 = vsel %vm858_vm4, %v852_v56, %v716_v58 }
 0x165   :  { %4491 = vmatprep.mubr.msk.f32.mxu0 %vm901_vm5, %v885_v59 }
 0x166   :  { %v338_v63 = vpop.permute.xlu1 %337 }
 0x167   :  { %v718_v0 = vpop.permute.xlu0 %717  ;;  %v789_v23 = vsel %vm759_vm1, %v116_v15, %v338_v63 }
 0x168   :  { %v886_v1 = vsel %vm858_vm4, %v853_v62, %v718_v0 }
 0x169   :  { %4492 = vmatmul.mubr.msk.f32.gmra.mrb[26].mxu0 %vm901_vm5, %v886_v1 }
 0x16a   :  { %v466_v2 = vpop.permute.xlu1 %465 }
 0x16b   :  { %v464_v3 = vpop.permute.xlu0 %463  ;;  %v822_v24 = vsel %vm792_vm2, %v789_v23, %v466_v2 }
 0x16c   :  { %v4454_v5 = vpop.f32.mrb[0].mxu0  ;;  %v821_v16 = vsel %vm792_vm2, %v788_v13, %v464_v3 }
 0x16d   :  { %v1074_v7 = vadd.f32 %v4454_v5, %v5631_v4  ;;  %v1068_v8 = vpop.f32.mrb[1].mxu0 }
 0x16e   :  { %v1069_v9 = vadd.f32 %v5631_v4, %v1068_v8  ;;  %v594_v10 = vpop.permute.xlu1 %593 }
 0x16f   :  { %v592_v11 = vpop.permute.xlu0 %591  ;;  %vm1228_vm6 = vcmp.gt.f32.partialorder %v1074_v7, 0.0  ;;  %v1260_v12 = vmul.f32 0.01, %v1074_v7  ;;  %v855_v25 = vsel %vm825_vm3, %v822_v24, %v594_v10 }
 0x170   :  { %vm1227_vm7 = vcmp.gt.f32.partialorder %v1069_v9, 0.0  ;;  %v1259_v14 = vmul.f32 0.01, %v1069_v9  ;;  %v854_v19 = vsel %vm825_vm3, %v821_v16, %v592_v11 }
 0x171   :  { %v1292_v17 = vsel %vm1228_vm6, %v1074_v7, %v1260_v12 }
 0x172   :  { %1324 = vst.msk [vmem:[#allocation2 + $0x8] sm:$0xff] %vm792_vm2, %v1292_v17  ;;  %v1291_v18 = vsel %vm1227_vm7, %v1069_v9, %v1259_v14  ;;  %v340_v20 = vpop.permute.xlu1 %339 }
 0x173   :  { %v720_v21 = vpop.permute.xlu0 %719  ;;  %1323 = vst.msk [vmem:[#allocation2] sm:$0xff] %vm792_vm2, %v1291_v18  ;;  %v790_v44 = vsel %vm759_vm1, %v117_v35, %v340_v20 }
 0x174   :  { %v887_v22 = vsel %vm858_vm4, %v854_v19, %v720_v21 }
 0x175   :  { %4494 = vmatprep.mubr.msk.f32.mxu0 %vm901_vm5, %v887_v22 }
 0x176   :  { %v342_v26 = vpop.permute.xlu1 %341 }
 0x177   :  { %v722_v27 = vpop.permute.xlu0 %721  ;;  %v791_v45 = vsel %vm759_vm1, %v118_v36, %v342_v26 }
 0x178   :  { %v888_v28 = vsel %vm858_vm4, %v855_v25, %v722_v27 }
 0x179   :  { %4495 = vmatmul.mubr.msk.f32.gmra.mrb[28].mxu0 %vm901_vm5, %v888_v28 }
 0x17a   :  { %v470_v29 = vpop.permute.xlu1 %469  ;;  %v1372_v31 = vld [vmem:[#allocation2] ss:$2 sm:$0xff]  ;;  %v1388_v32 = vld [vmem:[#allocation2 + $0x1] ss:$2 sm:$0xff] }
 0x17b   :  { %v468_v30 = vpop.permute.xlu0 %467  ;;  %v5653_v33 = vmax.f32 %v1372_v31, %v1388_v32  ;;  %v824_v47 = vsel %vm792_vm2, %v791_v45, %v470_v29 }
 0x17c   :  { %v4457_v34 = vpop.f32.mrb[2].mxu0  ;;  %v823_v48 = vsel %vm792_vm2, %v790_v44, %v468_v30 }
 0x17d   :  { %v1084_v37 = vadd.f32 %v4457_v34, %v5631_v4  ;;  %v1078_v38 = vpop.f32.mrb[3].mxu0  ;;  %v1411_v39 = vsel %vm792_vm2, %v5653_v33, 0.0 }
 0x17e   :  { %v1079_v40 = vadd.f32 %v5631_v4, %v1078_v38  ;;  %1412 = vadd.xlane.f32.xlu0 %v1411_v39  ;;  %v598_v41 = vpop.permute.xlu1 %597 }
 0x17f   :  { %v596_v42 = vpop.permute.xlu0 %595  ;;  %vm1230_vm8 = vcmp.gt.f32.partialorder %v1084_v37, 0.0  ;;  %v1262_v43 = vmul.f32 0.01, %v1084_v37  ;;  %v857_v51 = vsel %vm825_vm3, %v824_v47, %v598_v41 }
 0x180   :  { %vm1229_vm9 = vcmp.gt.f32.partialorder %v1079_v40, 0.0  ;;  %v1261_v46 = vmul.f32 0.01, %v1079_v40  ;;  %v856_v52 = vsel %vm825_vm3, %v823_v48, %v596_v42 }
 0x181   :  { %v1294_v49 = vsel %vm1230_vm8, %v1084_v37, %v1262_v43  ;;  %vm1432_vm8 = vcmask 62464  }
 0x182   :  { %1326 = vst.msk [vmem:[#allocation2 + $0x18] sm:$0xff] %vm792_vm2, %v1294_v49  ;;  %v1293_v50 = vsel %vm1229_vm9, %v1079_v40, %v1261_v46  ;;  %v726_v53 = vpop.permute.xlu1 %725 }
 0x183   :  { %v724_v54 = vpop.permute.xlu0 %723  ;;  %1325 = vst.msk [vmem:[#allocation2 + $0x10] sm:$0xff] %vm792_vm2, %v1293_v50  ;;  %v890_v55 = vsel %vm858_vm4, %v857_v51, %v726_v53 }
 0x184   :  { %v889_v56 = vsel %vm858_vm4, %v856_v52, %v724_v54 }
 0x185   :  { %4497 = vmatprep.mubr.msk.f32.mxu0 %vm901_vm5, %v889_v56 }
 0x186   :  { %4498 = vmatmul.mubr.msk.f32.gmra.mrb[30].mxu0 %vm901_vm5, %v890_v55 }
 0x18a   :  { %v1374_v57 = vld [vmem:[#allocation2 + $0x10] ss:$2 sm:$0xff]  ;;  %v1390_v58 = vld [vmem:[#allocation2 + $0x11] ss:$2 sm:$0xff] }
 0x18b   :  { %v5677_v59 = vmax.f32 %v1374_v57, %v1390_v58 }
 0x18c   :  { %v4460_v60 = vpop.f32.mrb[4].mxu0 }
 0x18d   :  { %v1094_v61 = vadd.f32 %v4460_v60, %v5631_v4  ;;  %v1088_v62 = vpop.f32.mrb[5].mxu0  ;;  %v1414_v63 = vsel %vm792_vm2, %v5677_v59, 0.0 }
 0x18e   :  { %v1089_v0 = vadd.f32 %v5631_v4, %v1088_v62  ;;  %1415 = vadd.xlane.f32.xlu1 %v1414_v63 }
 0x18f   :  { %vm1232_vm10 = vcmp.gt.f32.partialorder %v1094_v61, 0.0  ;;  %v1264_v1 = vmul.f32 0.01, %v1094_v61 }
 0x190   :  { %vm1231_vm11 = vcmp.gt.f32.partialorder %v1089_v0, 0.0  ;;  %v1263_v2 = vmul.f32 0.01, %v1089_v0 }
 0x191   :  { %v1296_v3 = vsel %vm1232_vm10, %v1094_v61, %v1264_v1 }
 0x192   :  { %1328 = vst.msk [vmem:[#allocation2 + $0x28] sm:$0xff] %vm792_vm2, %v1296_v3  ;;  %v1295_v5 = vsel %vm1231_vm11, %v1089_v0, %v1263_v2 }
 0x193   :  { %1327 = vst.msk [vmem:[#allocation2 + $0x20] sm:$0xff] %vm792_vm2, %v1295_v5 }
 0x19a   :  { %v1376_v6 = vld [vmem:[#allocation2 + $0x20] ss:$2 sm:$0xff]  ;;  %v1392_v7 = vld [vmem:[#allocation2 + $0x21] ss:$2 sm:$0xff] }
 0x19b   :  { %v5685_v8 = vmax.f32 %v1376_v6, %v1392_v7 }
 0x19c   :  { %v4463_v9 = vpop.f32.mrb[6].mxu0 }
 0x19d   :  { %v1104_v10 = vadd.f32 %v4463_v9, %v5631_v4  ;;  %v1098_v11 = vpop.f32.mrb[7].mxu0  ;;  %v1417_v12 = vsel %vm792_vm2, %v5685_v8, 0.0 }
 0x19e   :  { %v1099_v13 = vadd.f32 %v5631_v4, %v1098_v11  ;;  %1418 = vadd.xlane.f32.xlu0 %v1417_v12 }
 0x19f   :  { %vm1234_vm12 = vcmp.gt.f32.partialorder %v1104_v10, 0.0  ;;  %v1266_v14 = vmul.f32 0.01, %v1104_v10 }
 0x1a0   :  { %vm1233_vm13 = vcmp.gt.f32.partialorder %v1099_v13, 0.0  ;;  %v1265_v15 = vmul.f32 0.01, %v1099_v13 }
 0x1a1   :  { %v1298_v16 = vsel %vm1234_vm12, %v1104_v10, %v1266_v14 }
 0x1a2   :  { %1330 = vst.msk [vmem:[#allocation2 + $0x38] sm:$0xff] %vm792_vm2, %v1298_v16  ;;  %v1297_v17 = vsel %vm1233_vm13, %v1099_v13, %v1265_v15 }
 0x1a3   :  { %1329 = vst.msk [vmem:[#allocation2 + $0x30] sm:$0xff] %vm792_vm2, %v1297_v17 }
 0x1aa   :  { %v1378_v18 = vld [vmem:[#allocation2 + $0x30] ss:$2 sm:$0xff]  ;;  %v1394_v19 = vld [vmem:[#allocation2 + $0x31] ss:$2 sm:$0xff] }
 0x1ab   :  { %v5693_v20 = vmax.f32 %v1378_v18, %v1394_v19 }
 0x1ac   :  { %v4466_v21 = vpop.f32.mrb[8].mxu0 }
 0x1ad   :  { %v1114_v22 = vadd.f32 %v4466_v21, %v5631_v4  ;;  %v1108_v23 = vpop.f32.mrb[9].mxu0  ;;  %v1420_v24 = vsel %vm792_vm2, %v5693_v20, 0.0 }
 0x1ae   :  { %v1109_v25 = vadd.f32 %v5631_v4, %v1108_v23  ;;  %1421 = vadd.xlane.f32.xlu0 %v1420_v24 }
 0x1af   :  { %vm1236_vm14 = vcmp.gt.f32.partialorder %v1114_v22, 0.0  ;;  %v1268_v26 = vmul.f32 0.01, %v1114_v22 }
 0x1b0   :  { %vm1235_vm15 = vcmp.gt.f32.partialorder %v1109_v25, 0.0  ;;  %v1267_v27 = vmul.f32 0.01, %v1109_v25 }
 0x1b1   :  { %v1300_v28 = vsel %vm1236_vm14, %v1114_v22, %v1268_v26 }
 0x1b2   :  { %1332 = vst.msk [vmem:[#allocation2 + $0x48] sm:$0xff] %vm792_vm2, %v1300_v28  ;;  %v1299_v29 = vsel %vm1235_vm15, %v1109_v25, %v1267_v27 }
 0x1b3   :  { %1331 = vst.msk [vmem:[#allocation2 + $0x40] sm:$0xff] %vm792_vm2, %v1299_v29 }
 0x1ba   :  { %v1380_v30 = vld [vmem:[#allocation2 + $0x40] ss:$2 sm:$0xff]  ;;  %v1396_v31 = vld [vmem:[#allocation2 + $0x41] ss:$2 sm:$0xff] }
 0x1bb   :  { %v5701_v32 = vmax.f32 %v1380_v30, %v1396_v31 }
 0x1bc   :  { %v4469_v34 = vpop.f32.mrb[10].mxu0 }
 0x1bd   :  { %v1124_v35 = vadd.f32 %v4469_v34, %v5631_v4  ;;  %v1118_v36 = vpop.f32.mrb[11].mxu0  ;;  %v1423_v37 = vsel %vm792_vm2, %v5701_v32, 0.0 }
 0x1be   :  { %v1119_v38 = vadd.f32 %v5631_v4, %v1118_v36  ;;  %1424 = vadd.xlane.f32.xlu1 %v1423_v37 }
 0x1bf   :  { %vm1238_vm0 = vcmp.gt.f32.partialorder %v1124_v35, 0.0  ;;  %v1270_v39 = vmul.f32 0.01, %v1124_v35 }
 0x1c0   :  { %vm1237_vm1 = vcmp.gt.f32.partialorder %v1119_v38, 0.0  ;;  %v1269_v40 = vmul.f32 0.01, %v1119_v38 }
 0x1c1   :  { %v1302_v41 = vsel %vm1238_vm0, %v1124_v35, %v1270_v39 }
 0x1c2   :  { %1334 = vst.msk [vmem:[#allocation2 + $0x58] sm:$0xff] %vm792_vm2, %v1302_v41  ;;  %v1301_v42 = vsel %vm1237_vm1, %v1119_v38, %v1269_v40 }
 0x1c3   :  { %1333 = vst.msk [vmem:[#allocation2 + $0x50] sm:$0xff] %vm792_vm2, %v1301_v42 }
 0x1ca   :  { %v1382_v43 = vld [vmem:[#allocation2 + $0x50] ss:$2 sm:$0xff]  ;;  %v1398_v44 = vld [vmem:[#allocation2 + $0x51] ss:$2 sm:$0xff] }
 0x1cb   :  { %v5709_v45 = vmax.f32 %v1382_v43, %v1398_v44 }
 0x1cc   :  { %v4472_v46 = vpop.f32.mrb[12].mxu0 }
 0x1cd   :  { %v1134_v47 = vadd.f32 %v4472_v46, %v5631_v4  ;;  %v1128_v48 = vpop.f32.mrb[13].mxu0  ;;  %v1426_v49 = vsel %vm792_vm2, %v5709_v45, 0.0 }
 0x1ce   :  { %v1129_v50 = vadd.f32 %v5631_v4, %v1128_v48  ;;  %1427 = vadd.xlane.f32.xlu0 %v1426_v49 }
 0x1cf   :  { %vm1240_vm3 = vcmp.gt.f32.partialorder %v1134_v47, 0.0  ;;  %v1272_v51 = vmul.f32 0.01, %v1134_v47 }
 0x1d0   :  { %vm1239_vm5 = vcmp.gt.f32.partialorder %v1129_v50, 0.0  ;;  %v1271_v52 = vmul.f32 0.01, %v1129_v50 }
 0x1d1   :  { %v1304_v53 = vsel %vm1240_vm3, %v1134_v47, %v1272_v51 }
 0x1d2   :  { %1336 = vst.msk [vmem:[#allocation2 + $0x68] sm:$0xff] %vm792_vm2, %v1304_v53  ;;  %v1303_v54 = vsel %vm1239_vm5, %v1129_v50, %v1271_v52 }
 0x1d3   :  { %1335 = vst.msk [vmem:[#allocation2 + $0x60] sm:$0xff] %vm792_vm2, %v1303_v54 }
 0x1da   :  { %v1384_v55 = vld [vmem:[#allocation2 + $0x60] ss:$2 sm:$0xff]  ;;  %v1400_v56 = vld [vmem:[#allocation2 + $0x61] ss:$2 sm:$0xff] }
 0x1db   :  { %v5717_v57 = vmax.f32 %v1384_v55, %v1400_v56 }
 0x1dc   :  { %v4475_v58 = vpop.f32.mrb[14].mxu0 }
 0x1dd   :  { %v1144_v60 = vadd.f32 %v4475_v58, %v5631_v4  ;;  %v1138_v61 = vpop.f32.mrb[15].mxu0  ;;  %v1429_v62 = vsel %vm792_vm2, %v5717_v57, 0.0 }
 0x1de   :  { %v1139_v63 = vadd.f32 %v5631_v4, %v1138_v61  ;;  %1430 = vadd.xlane.f32.xlu1 %v1429_v62 }
 0x1df   :  { %vm1242_vm6 = vcmp.gt.f32.partialorder %v1144_v60, 0.0  ;;  %v1274_v0 = vmul.f32 0.01, %v1144_v60 }
 0x1e0   :  { %vm1241_vm7 = vcmp.gt.f32.partialorder %v1139_v63, 0.0  ;;  %v1273_v1 = vmul.f32 0.01, %v1139_v63 }
 0x1e1   :  { %v1306_v2 = vsel %vm1242_vm6, %v1144_v60, %v1274_v0 }
 0x1e2   :  { %1338 = vst.msk [vmem:[#allocation2 + $0x78] sm:$0xff] %vm792_vm2, %v1306_v2  ;;  %v1305_v3 = vsel %vm1241_vm7, %v1139_v63, %v1273_v1 }
 0x1e3   :  { %1337 = vst.msk [vmem:[#allocation2 + $0x70] sm:$0xff] %vm792_vm2, %v1305_v3 }
 0x1ea   :  { %v1386_v5 = vld [vmem:[#allocation2 + $0x70] ss:$2 sm:$0x3f]  ;;  %v1402_v6 = vld [vmem:[#allocation2 + $0x71] ss:$2 sm:$0x3f] }
 0x1eb   :  { %v5725_v9 = vmax.f32 %v1386_v5, %v1402_v6 }
 0x1ec   :  { %v4478_v7 = vpop.f32.mrb[16].mxu0 }
 0x1ed   :  { %v1154_v10 = vadd.f32 %v4478_v7, %v5631_v4  ;;  %v1148_v11 = vpop.f32.mrb[17].mxu0  ;;  %v1433_v13 = vsel %vm1432_vm8, %v5725_v9, 0.0 }
 0x1ee   :  { %v1149_v12 = vadd.f32 %v5631_v4, %v1148_v11  ;;  %1434 = vadd.xlane.f32.xlu0 %v1433_v13 }
 0x1ef   :  { %vm1244_vm9 = vcmp.gt.f32.partialorder %v1154_v10, 0.0  ;;  %v1276_v14 = vmul.f32 0.01, %v1154_v10 }
 0x1f0   :  { %vm1243_vm10 = vcmp.gt.f32.partialorder %v1149_v12, 0.0  ;;  %v1275_v15 = vmul.f32 0.01, %v1149_v12 }
 0x1f1   :  { %v1308_v16 = vsel %vm1244_vm9, %v1154_v10, %v1276_v14 }
 0x1f2   :  { %1340 = vst.msk [vmem:[#allocation2 + $0x88] sm:$0xff] %vm792_vm2, %v1308_v16  ;;  %v1307_v17 = vsel %vm1243_vm10, %v1149_v12, %v1275_v15 }
 0x1f3   :  { %1339 = vst.msk [vmem:[#allocation2 + $0x80] sm:$0xff] %vm792_vm2, %v1307_v17 }
 0x1fa   :  { %v1542_v18 = vld [vmem:[#allocation2 + $0x80] ss:$2 sm:$0xff]  ;;  %v1558_v19 = vld [vmem:[#allocation2 + $0x81] ss:$2 sm:$0xff] }
 0x1fb   :  { %v5733_v21 = vmax.f32 %v1542_v18, %v1558_v19 }
 0x1fc   :  { %v4481_v22 = vpop.f32.mrb[18].mxu0 }
 0x1fd   :  { %v1164_v23 = vadd.f32 %v4481_v22, %v5631_v4  ;;  %v1158_v24 = vpop.f32.mrb[19].mxu0  ;;  %v1581_v25 = vsel %vm792_vm2, %v5733_v21, 0.0 }
 0x1fe   :  { %v1159_v26 = vadd.f32 %v5631_v4, %v1158_v24  ;;  %1582 = vadd.xlane.f32.xlu1 %v1581_v25 }
 0x1ff   :  { %vm1246_vm11 = vcmp.gt.f32.partialorder %v1164_v23, 0.0  ;;  %v1278_v27 = vmul.f32 0.01, %v1164_v23 }
 0x200   :  { %vm1245_vm12 = vcmp.gt.f32.partialorder %v1159_v26, 0.0  ;;  %v1277_v28 = vmul.f32 0.01, %v1159_v26 }
 0x201   :  { %v1310_v29 = vsel %vm1246_vm11, %v1164_v23, %v1278_v27  ;;  %vm1354_vm11 = vcmask 60416  }
 0x202   :  { %1342 = vst.msk [vmem:[#allocation2 + $0x98] sm:$0xff] %vm792_vm2, %v1310_v29  ;;  %v1309_v30 = vsel %vm1245_vm12, %v1159_v26, %v1277_v28 }
 0x203   :  { %1341 = vst.msk [vmem:[#allocation2 + $0x90] sm:$0xff] %vm792_vm2, %v1309_v30 }
 0x20a   :  { %v1544_v31 = vld [vmem:[#allocation2 + $0x90] ss:$2 sm:$0xff]  ;;  %v1560_v34 = vld [vmem:[#allocation2 + $0x91] ss:$2 sm:$0xff] }
 0x20b   :  { %v5741_v35 = vmax.f32 %v1544_v31, %v1560_v34 }
 0x20c   :  { %v4484_v36 = vpop.f32.mrb[20].mxu0 }
 0x20d   :  { %v1174_v37 = vadd.f32 %v4484_v36, %v5631_v4  ;;  %v1168_v38 = vpop.f32.mrb[21].mxu0  ;;  %v1584_v39 = vsel %vm792_vm2, %v5741_v35, 0.0 }
 0x20e   :  { %v1169_v40 = vadd.f32 %v5631_v4, %v1168_v38  ;;  %1585 = vadd.xlane.f32.xlu0 %v1584_v39 }
 0x20f   :  { %vm1248_vm13 = vcmp.gt.f32.partialorder %v1174_v37, 0.0  ;;  %v1280_v41 = vmul.f32 0.01, %v1174_v37 }
 0x210   :  { %vm1247_vm14 = vcmp.gt.f32.partialorder %v1169_v40, 0.0  ;;  %v1279_v42 = vmul.f32 0.01, %v1169_v40 }
 0x211   :  { %v1312_v43 = vsel %vm1248_vm13, %v1174_v37, %v1280_v41  ;;  %vm1442_vm13 = vcmask 1045504  }
 0x212   :  { %1344 = vst.msk [vmem:[#allocation2 + $0xa8] sm:$0xff] %vm792_vm2, %v1312_v43  ;;  %v1311_v44 = vsel %vm1247_vm14, %v1169_v40, %v1279_v42  ;;  %vm1927_vm14 = vcmask 195584  }
 0x213   :  { %1343 = vst.msk [vmem:[#allocation2 + $0xa0] sm:$0xff] %vm792_vm2, %v1311_v44 }
 0x21a   :  { %v1546_v46 = vld [vmem:[#allocation2 + $0xa0] ss:$2 sm:$0xff]  ;;  %v1562_v47 = vld [vmem:[#allocation2 + $0xa1] ss:$2 sm:$0xff] }
 0x21b   :  { %v5749_v48 = vmax.f32 %v1546_v46, %v1562_v47 }
 0x21c   :  { %v4487_v49 = vpop.f32.mrb[22].mxu0 }
 0x21d   :  { %v1184_v50 = vadd.f32 %v4487_v49, %v5631_v4  ;;  %v1178_v51 = vpop.f32.mrb[23].mxu0  ;;  %v1587_v52 = vsel %vm792_vm2, %v5749_v48, 0.0 }
 0x21e   :  { %v1179_v53 = vadd.f32 %v5631_v4, %v1178_v51  ;;  %1588 = vadd.xlane.f32.xlu1 %v1587_v52 }
 0x21f   :  { %vm1250_vm15 = vcmp.gt.f32.partialorder %v1184_v50, 0.0  ;;  %v1282_v54 = vmul.f32 0.01, %v1184_v50 }
 0x220   :  { %vm1249_vm0 = vcmp.gt.f32.partialorder %v1179_v53, 0.0  ;;  %v1281_v55 = vmul.f32 0.01, %v1179_v53 }
 0x221   :  { %v1314_v56 = vsel %vm1250_vm15, %v1184_v50, %v1282_v54 }
 0x222   :  { %1346 = vst.msk [vmem:[#allocation2 + $0xb8] sm:$0xff] %vm792_vm2, %v1314_v56  ;;  %v1313_v58 = vsel %vm1249_vm0, %v1179_v53, %v1281_v55 }
 0x223   :  { %1345 = vst.msk [vmem:[#allocation2 + $0xb0] sm:$0xff] %vm792_vm2, %v1313_v58  ;;  %v1413_v58 = vpop.xlane.xlu0 %1412 }
 0x22a   :  { %v1548_v60 = vld [vmem:[#allocation2 + $0xb0] ss:$2 sm:$0xff]  ;;  %v1564_v61 = vld [vmem:[#allocation2 + $0xb1] ss:$2 sm:$0xff] }
 0x22b   :  { %v5757_v62 = vmax.f32 %v1548_v60, %v1564_v61  ;;  %v1416_v60 = vpop.xlane.xlu1 %1415  ;;  %v1419_v61 = vpop.xlane.xlu0 %1418 }
 0x22c   :  { %v4490_v63 = vpop.f32.mrb[24].mxu0 }
 0x22d   :  { %v1194_v0 = vadd.f32 %v4490_v63, %v5631_v4  ;;  %v1188_v1 = vpop.f32.mrb[25].mxu0  ;;  %v1590_v2 = vsel %vm792_vm2, %v5757_v62, 0.0  ;;  %v1436_v63 = vadd.f32 %v1416_v60, %v1413_v58 }
 0x22e   :  { %v1189_v3 = vadd.f32 %v5631_v4, %v1188_v1  ;;  %1591 = vadd.xlane.f32.xlu0 %v1590_v2 }
 0x22f   :  { %vm1252_vm1 = vcmp.gt.f32.partialorder %v1194_v0, 0.0  ;;  %v1284_v5 = vmul.f32 0.01, %v1194_v0  ;;  %v1437_v1 = vadd.f32 %v1436_v63, %v1419_v61 }
 0x230   :  { %vm1251_vm3 = vcmp.gt.f32.partialorder %v1189_v3, 0.0  ;;  %v1283_v6 = vmul.f32 0.01, %v1189_v3 }
 0x231   :  { %v1316_v7 = vsel %vm1252_vm1, %v1194_v0, %v1284_v5 }
 0x232   :  { %1348 = vst.msk [vmem:[#allocation2 + $0xc8] sm:$0xff] %vm792_vm2, %v1316_v7  ;;  %v1315_v10 = vsel %vm1251_vm3, %v1189_v3, %v1283_v6 }
 0x233   :  { %1347 = vst.msk [vmem:[#allocation2 + $0xc0] sm:$0xff] %vm792_vm2, %v1315_v10 }
 0x23a   :  { %v1550_v11 = vld [vmem:[#allocation2 + $0xc0] ss:$2 sm:$0xff]  ;;  %v1566_v12 = vld [vmem:[#allocation2 + $0xc1] ss:$2 sm:$0xff] }
 0x23b   :  { %v5765_v13 = vmax.f32 %v1550_v11, %v1566_v12  ;;  %v1422_v0 = vpop.xlane.xlu0 %1421 }
 0x23c   :  { %v4493_v14 = vpop.f32.mrb[26].mxu0  ;;  %v1438_v3 = vadd.f32 %v1437_v1, %v1422_v0 }
 0x23d   :  { %v1204_v15 = vadd.f32 %v4493_v14, %v5631_v4  ;;  %v1198_v16 = vpop.f32.mrb[27].mxu0  ;;  %v1593_v17 = vsel %vm792_vm2, %v5765_v13, 0.0 }
 0x23e   :  { %v1199_v18 = vadd.f32 %v5631_v4, %v1198_v16  ;;  %1594 = vadd.xlane.f32.xlu1 %v1593_v17 }
 0x23f   :  { %vm1254_vm5 = vcmp.gt.f32.partialorder %v1204_v15, 0.0  ;;  %v1286_v19 = vmul.f32 0.01, %v1204_v15 }
 0x240   :  { %vm1253_vm6 = vcmp.gt.f32.partialorder %v1199_v18, 0.0  ;;  %v1285_v22 = vmul.f32 0.01, %v1199_v18 }
 0x241   :  { %v1318_v23 = vsel %vm1254_vm5, %v1204_v15, %v1286_v19 }
 0x242   :  { %1350 = vst.msk [vmem:[#allocation2 + $0xd8] sm:$0xff] %vm792_vm2, %v1318_v23  ;;  %v1317_v24 = vsel %vm1253_vm6, %v1199_v18, %v1285_v22 }
 0x243   :  { %1349 = vst.msk [vmem:[#allocation2 + $0xd0] sm:$0xff] %vm792_vm2, %v1317_v24 }
 0x24a   :  { %v1552_v25 = vld [vmem:[#allocation2 + $0xd0] ss:$2 sm:$0xff]  ;;  %v1568_v26 = vld [vmem:[#allocation2 + $0xd1] ss:$2 sm:$0xff] }
 0x24b   :  { %v5773_v27 = vmax.f32 %v1552_v25, %v1568_v26  ;;  %v1425_v2 = vpop.xlane.xlu1 %1424 }
 0x24c   :  { %v4496_v28 = vpop.f32.mrb[28].mxu0  ;;  %v1439_v6 = vadd.f32 %v1438_v3, %v1425_v2 }
 0x24d   :  { %v1214_v29 = vadd.f32 %v4496_v28, %v5631_v4  ;;  %v1208_v30 = vpop.f32.mrb[29].mxu0  ;;  %v1596_v31 = vsel %vm792_vm2, %v5773_v27, 0.0 }
 0x24e   :  { %v1209_v34 = vadd.f32 %v5631_v4, %v1208_v30  ;;  %1597 = vadd.xlane.f32.xlu0 %v1596_v31 }
 0x24f   :  { %vm1256_vm7 = vcmp.gt.f32.partialorder %v1214_v29, 0.0  ;;  %v1288_v36 = vmul.f32 0.01, %v1214_v29 }
 0x250   :  { %vm1255_vm9 = vcmp.gt.f32.partialorder %v1209_v34, 0.0  ;;  %v1287_v37 = vmul.f32 0.01, %v1209_v34 }
 0x251   :  { %v1320_v38 = vsel %vm1256_vm7, %v1214_v29, %v1288_v36 }
 0x252   :  { %1352 = vst.msk [vmem:[#allocation2 + $0xe8] sm:$0xff] %vm792_vm2, %v1320_v38  ;;  %v1319_v39 = vsel %vm1255_vm9, %v1209_v34, %v1287_v37 }
 0x253   :  { %1351 = vst.msk [vmem:[#allocation2 + $0xe0] sm:$0xff] %vm792_vm2, %v1319_v39 }
 0x259   :  { %v4499_v40 = vpop.f32.mrb[30].mxu0 }
 0x25a   :  { %v1224_v41 = vadd.f32 %v4499_v40, %v5631_v4  ;;  %v1218_v42 = vpop.f32.mrb[31].mxu0  ;;  %v1554_v43 = vld [vmem:[#allocation2 + $0xe0] ss:$2 sm:$0xff]  ;;  %v1570_v44 = vld [vmem:[#allocation2 + $0xe1] ss:$2 sm:$0xff] }
 0x25b   :  { %v1219_v46 = vadd.f32 %v5631_v4, %v1218_v42  ;;  %v5783_v47 = vmax.f32 %v1554_v43, %v1570_v44  ;;  %v1428_v5 = vpop.xlane.xlu0 %1427 }
 0x25c   :  { %vm1258_vm10 = vcmp.gt.f32.partialorder %v1224_v41, 0.0  ;;  %v1290_v49 = vmul.f32 0.01, %v1224_v41  ;;  %v1440_v10 = vadd.f32 %v1439_v6, %v1428_v5 }
 0x25d   :  { %vm1257_vm12 = vcmp.gt.f32.partialorder %v1219_v46, 0.0  ;;  %v1289_v50 = vmul.f32 0.01, %v1219_v46  ;;  %v1599_v51 = vsel %vm792_vm2, %v5783_v47, 0.0 }
 0x25e   :  { %v1322_v52 = vsel %vm1258_vm10, %v1224_v41, %v1290_v49  ;;  %1600 = vadd.xlane.f32.xlu1 %v1599_v51 }
 0x25f   :  { %1355 = vst.msk [vmem:[#allocation2 + $0xf8] sm:$0xf] %vm1354_vm11, %v1322_v52  ;;  %v1321_v53 = vsel %vm1257_vm12, %v1219_v46, %v1289_v50 }
 0x260   :  { %1353 = vst.msk [vmem:[#allocation2 + $0xf0] sm:$0xff] %vm792_vm2, %v1321_v53 }
 0x267   :  { %v1556_v54 = vld [vmem:[#allocation2 + $0xf0] ss:$2 sm:$0x3f]  ;;  %v1572_v55 = vld [vmem:[#allocation2 + $0xf1] ss:$2 sm:$0x3f] }
 0x268   :  { %v5788_v56 = vmax.f32 %v1556_v54, %v1572_v55 }
 0x26a   :  { %v1602_v4 = vsel %vm1432_vm8, %v5788_v56, 0.0 }
 0x26b   :  { %1603 = vadd.xlane.f32.xlu0 %v1602_v4  ;;  %v1431_v7 = vpop.xlane.xlu1 %1430 }
 0x26c   :  { %v1441_v11 = vadd.f32 %v1440_v10, %v1431_v7 }
 0x27b   :  { %v1435_v12 = vpop.xlane.xlu0 %1434 }
 0x27c   :  { %v1443_v14 = vsel %vm1442_vm13, %v1435_v12, 0.0 }
 0x27d   :  { %v1444_v15 = vadd.f32 %v1443_v14, %v1441_v11 }
 0x27f   :  { %v1445_v16 = vrot.slane %v1444_v15, 4 }
 0x281   :  { %v1446_v17 = vadd.f32 %v1445_v16, %v1444_v15 }
 0x283   :  { %v1447_v18 = vrot.slane %v1446_v17, 2 }
 0x285   :  { %v1448_v19 = vadd.f32 %v1447_v18, %v1446_v17 }
 0x287   :  { %v1449_v22 = vrot.slane %v1448_v19, 1 }
 0x289   :  { %v1450_v23 = vadd.f32 %v1449_v22, %v1448_v19 }
 0x28b   :  { %v1451_v24 = vmul.f32 0.002016129, %v1450_v23  ;;  %v1583_v46 = vpop.xlane.xlu1 %1582 }
 0x28d   :  { %v5794_v25 = vsub.f32 %v5677_v59, %v1451_v24  ;;  %v5797_v26 = vsub.f32 %v5653_v33, %v1451_v24  ;;  %v5800_v28 = vsub.f32 %v5693_v20, %v1451_v24  ;;  %v5803_v29 = vsub.f32 %v5685_v8, %v1451_v24 }
 0x28e   :  { %v5810_v34 = vsub.f32 %v5709_v45, %v1451_v24  ;;  %v5813_v59 = vsub.f32 %v5701_v32, %v1451_v24  ;;  %v5822_v37 = vsub.f32 %v5725_v9, %v1451_v24  ;;  %v5825_v45 = vsub.f32 %v5717_v57, %v1451_v24 }
 0x28f   :  { %v1461_v30 = vmul.f32 %v5794_v25, %v5794_v25  ;;  %v1460_v31 = vmul.f32 %v5797_v26, %v5797_v26  ;;  %v1463_v8 = vmul.f32 %v5800_v28, %v5800_v28  ;;  %v1462_v36 = vmul.f32 %v5803_v29, %v5803_v29 }
 0x290   :  { %v1465_v39 = vmul.f32 %v5810_v34, %v5810_v34  ;;  %v1464_v40 = vmul.f32 %v5813_v59, %v5813_v59  ;;  %v1467_v57 = vmul.f32 %v5822_v37, %v5822_v37  ;;  %v1466_v42 = vmul.f32 %v5825_v45, %v5825_v45 }
 0x291   :  { %v1471_v33 = vsel %vm792_vm2, %v1461_v30, 0.0  ;;  %v1468_v20 = vsel %vm792_vm2, %v1460_v31, 0.0  ;;  %v1477_v32 = vsel %vm792_vm2, %v1463_v8, 0.0  ;;  %v1474_v38 = vsel %vm792_vm2, %v1462_v36, 0.0 }
 0x292   :  { %1472 = vadd.xlane.f32.xlu0 %v1471_v33  ;;  %1469 = vadd.xlane.f32.xlu1 %v1468_v20  ;;  %v1483_v41 = vsel %vm792_vm2, %v1465_v39, 0.0  ;;  %v1480_v9 = vsel %vm792_vm2, %v1464_v40, 0.0  ;;  %v1489_v43 = vsel %vm1432_vm8, %v1467_v57, 0.0  ;;  %v1486_v44 = vsel %vm792_vm2, %v1466_v42, 0.0 }
 0x296   :  { %1478 = vadd.xlane.f32.xlu0 %v1477_v32  ;;  %1475 = vadd.xlane.f32.xlu1 %v1474_v38 }
 0x29a   :  { %1484 = vadd.xlane.f32.xlu0 %v1483_v41  ;;  %1481 = vadd.xlane.f32.xlu1 %v1480_v9 }
 0x29b   :  { %v1586_v49 = vpop.xlane.xlu0 %1585 }
 0x29c   :  { %v1605_v51 = vadd.f32 %v1586_v49, %v1583_v46 }
 0x29e   :  { %1490 = vadd.xlane.f32.xlu0 %v1489_v43  ;;  %1487 = vadd.xlane.f32.xlu1 %v1486_v44 }
 0x2ab   :  { %v1589_v50 = vpop.xlane.xlu1 %1588 }
 0x2ac   :  { %v1606_v53 = vadd.f32 %v1605_v51, %v1589_v50 }
 0x2bb   :  { %v1592_v52 = vpop.xlane.xlu0 %1591 }
 0x2bc   :  { %v1607_v55 = vadd.f32 %v1606_v53, %v1592_v52 }
 0x2cb   :  { %v1595_v54 = vpop.xlane.xlu1 %1594 }
 0x2cc   :  { %v1608_v58 = vadd.f32 %v1607_v55, %v1595_v54 }
 0x2db   :  { %v1598_v4 = vpop.xlane.xlu0 %1597 }
 0x2dc   :  { %v1609_v61 = vadd.f32 %v1608_v58, %v1598_v4 }
 0x2eb   :  { %v1601_v60 = vpop.xlane.xlu1 %1600 }
 0x2ec   :  { %v1610_v63 = vadd.f32 %v1609_v61, %v1601_v60 }
 0x2f8   :  { %v1604_v0 = vpop.xlane.xlu0 %1603 }
 0x2f9   :  { %v1611_v1 = vsel %vm1442_vm13, %v1604_v0, 0.0 }
 0x2fa   :  { %v1612_v2 = vadd.f32 %v1611_v1, %v1610_v63 }
 0x2fc   :  { %v1613_v3 = vrot.slane %v1612_v2, 4 }
 0x2fe   :  { %v1614_v5 = vadd.f32 %v1613_v3, %v1612_v2  ;;  %v5894_v2 = vld [vmem:[%s6633_s30 + $0x8] sm:$0xff]  ;;  %v5899_v3 = vld [vmem:[%s6633_s30 + $0x10] sm:$0xff] }
 0x300   :  { %v1615_v6 = vrot.slane %v1614_v5, 2 }
 0x302   :  { %v1616_v7 = vadd.f32 %v1615_v6, %v1614_v5  ;;  %v5904_v6 = vld [vmem:[%s6634_s29 + $0x8] sm:$0xff] }
 0x304   :  { %v1617_v10 = vrot.slane %v1616_v7, 1 }
 0x306   :  { %v1618_v11 = vadd.f32 %v1617_v10, %v1616_v7  ;;  %v5909_v7 = vld [vmem:[%s6634_s29 + $0x10] sm:$0xff]  ;;  %v5914_v10 = vld [vmem:[%s6633_s30] sm:$0xff] }
 0x308   :  { %v1619_v12 = vmul.f32 0.002016129, %v1618_v11  ;;  %v5919_v11 = vld [vmem:[%s6633_s30 + $0x18] sm:$0xff] }
 0x30a   :  { %v5843_v14 = vsub.f32 %v5741_v35, %v1619_v12  ;;  %v5846_v15 = vsub.f32 %v5733_v21, %v1619_v12  ;;  %v5849_v16 = vsub.f32 %v5757_v62, %v1619_v12  ;;  %v5852_v17 = vsub.f32 %v5749_v48, %v1619_v12 }
 0x30b   :  { %v5859_v22 = vsub.f32 %v5773_v27, %v1619_v12  ;;  %v5862_v35 = vsub.f32 %v5765_v13, %v1619_v12  ;;  %v5871_v24 = vsub.f32 %v5788_v56, %v1619_v12  ;;  %v5874_v27 = vsub.f32 %v5783_v47, %v1619_v12  ;;  %v5924_v12 = vld [vmem:[%s6633_s30 + $0x20] sm:$0xff] }
 0x30c   :  { %v1629_v18 = vmul.f32 %v5843_v14, %v5843_v14  ;;  %v1628_v19 = vmul.f32 %v5846_v15, %v5846_v15  ;;  %v1631_v48 = vmul.f32 %v5849_v16, %v5849_v16  ;;  %v1630_v23 = vmul.f32 %v5852_v17, %v5852_v17 }
 0x30d   :  { %v1633_v31 = vmul.f32 %v5859_v22, %v5859_v22  ;;  %v1632_v33 = vmul.f32 %v5862_v35, %v5862_v35  ;;  %v1635_v47 = vmul.f32 %v5871_v24, %v5871_v24  ;;  %v1634_v8 = vmul.f32 %v5874_v27, %v5874_v27 }
 0x30e   :  { %v1639_v21 = vsel %vm792_vm2, %v1629_v18, 0.0  ;;  %v1636_v62 = vsel %vm792_vm2, %v1628_v19, 0.0  ;;  %v1645_v13 = vsel %vm792_vm2, %v1631_v48, 0.0  ;;  %v1642_v30 = vsel %vm792_vm2, %v1630_v23, 0.0  ;;  %v5933_v48 = vld [vmem:[%s6633_s30 + $0x28] sm:$0xff]  ;;  %v5938_v23 = vld [vmem:[%s6633_s30 + $0x30] sm:$0xff] }
 0x30f   :  { %1640 = vadd.xlane.f32.xlu0 %v1639_v21  ;;  %1637 = vadd.xlane.f32.xlu1 %v1636_v62  ;;  %v1651_v20 = vsel %vm792_vm2, %v1633_v31, 0.0  ;;  %v1648_v56 = vsel %vm792_vm2, %v1632_v33, 0.0  ;;  %v1657_v36 = vsel %vm1432_vm8, %v1635_v47, 0.0  ;;  %v1654_v32 = vsel %vm792_vm2, %v1634_v8, 0.0 }
 0x313   :  { %1646 = vadd.xlane.f32.xlu0 %v1645_v13  ;;  %1643 = vadd.xlane.f32.xlu1 %v1642_v30 }
 0x317   :  { %1652 = vadd.xlane.f32.xlu0 %v1651_v20  ;;  %1649 = vadd.xlane.f32.xlu1 %v1648_v56 }
 0x31b   :  { %1658 = vadd.xlane.f32.xlu0 %v1657_v36  ;;  %1655 = vadd.xlane.f32.xlu1 %v1654_v32  ;;  %v5971_v36 = vld [vmem:[%s6634_s29 + $0x28] sm:$0xff] }
 0x31f   :  { %v1470_v38 = vpop.xlane.xlu1 %1469  ;;  %v1473_v39 = vpop.xlane.xlu0 %1472 }
 0x320   :  { %v1492_v40 = vadd.f32 %v1473_v39, %v1470_v38  ;;  %v1917_v39 = vld [vmem:[%s6635_s8] sm:$0xff] }
 0x323   :  { %v1476_v41 = vpop.xlane.xlu1 %1475  ;;  %v1479_v9 = vpop.xlane.xlu0 %1478 }
 0x324   :  { %v1493_v57 = vadd.f32 %v1492_v40, %v1476_v41  ;;  %v1918_v40 = vld [vmem:[%s6635_s8 + $0x8] sm:$0xff] }
 0x326   :  { %v1494_v42 = vadd.f32 %v1493_v57, %v1479_v9 }
 0x327   :  { %v1482_v43 = vpop.xlane.xlu1 %1481  ;;  %v1485_v44 = vpop.xlane.xlu0 %1484 }
 0x328   :  { %v1495_v46 = vadd.f32 %v1494_v42, %v1482_v43 }
 0x32a   :  { %v1496_v49 = vadd.f32 %v1495_v46, %v1485_v44 }
 0x32b   :  { %v1488_v50 = vpop.xlane.xlu1 %1487  ;;  %v1491_v51 = vpop.xlane.xlu0 %1490 }
 0x32c   :  { %v1497_v52 = vadd.f32 %v1496_v49, %v1488_v50  ;;  %v1498_v53 = vsel %vm1442_vm13, %v1491_v51, 0.0  ;;  %v4655_v50 = vpack.c.bf16 %v1918_v40, %v1917_v39  ;;  %v1919_v51 = vld [vmem:[%s6635_s8 + $0x10] sm:$0xff] }
 0x32e   :  { %v1499_v54 = vadd.f32 %v1498_v53, %v1497_v52  ;;  %4656 = vmatprep.subr.bf16.mxu1 %v4655_v50 }
 0x32f   :  { %4658 = vmatpush3.bf16.msra.mxu1 %v4655_v50 }
 0x330   :  { %v1500_v55 = vrot.slane %v1499_v54, 4  ;;  %4504 = vmatprep.subr.mxu1 %v1919_v51 }
 0x332   :  { %v1501_v4 = vadd.f32 %v1500_v55, %v1499_v54 }
 0x333   :  { %4505 = vmatpush3.msra.mxu1 %v1919_v51 }
 0x334   :  { %v1502_v58 = vrot.slane %v1501_v4, 2 }
 0x336   :  { %v1503_v60 = vadd.f32 %v1502_v58, %v1501_v4 }
 0x338   :  { %v1504_v61 = vrot.slane %v1503_v60, 1 }
 0x33a   :  { %v1505_v63 = vadd.f32 %v1504_v61, %v1503_v60 }
 0x33c   :  { %v1506_v0 = vmul.f32 0.002016129, %v1505_v63 }
 0x33e   :  { %v1507_v1 = vadd.f32 1e-05, %v1506_v0 }
 0x340   :  { %4689 = vrsqrt.f32 %v1507_v1 }
 0x34a   :  { %v4690_v5 = vpop.eup %4689 }
 0x34b   :  { %v1510_v18 = vmul.f32 %v4690_v5, %v5794_v25  ;;  %v1511_v19 = vmul.f32 %v4690_v5, %v5803_v29  ;;  %v1509_v21 = vmul.f32 %v4690_v5, %v5797_v26  ;;  %v1512_v62 = vmul.f32 %v4690_v5, %v5800_v28  ;;  %v5943_v25 = vld [vmem:[%s6633_s30 + $0x38] sm:$0x3f]  ;;  %v5948_v26 = vld [vmem:[%s6634_s29] sm:$0xff] }
 0x34c   :  { %v5953_v28 = vld [vmem:[%s6634_s29 + $0x18] sm:$0xff]  ;;  %v5958_v29 = vld [vmem:[%s6634_s29 + $0x20] sm:$0xff]  ;;  %v1513_v13 = vmul.f32 %v4690_v5, %v5813_v59  ;;  %v1514_v30 = vmul.f32 %v4690_v5, %v5810_v34  ;;  %v1515_v31 = vmul.f32 %v4690_v5, %v5825_v45  ;;  %v1516_v33 = vmul.f32 %v4690_v5, %v5822_v37  ;;  %v5976_v34 = vld [vmem:[%s6634_s29 + $0x30] sm:$0xff] }
 0x34d   :  { %v1518_v20 = vmul.f32 %v1510_v18, %v5894_v2  ;;  %v1519_v56 = vmul.f32 %v1511_v19, %v5899_v3  ;;  %v1517_v47 = vmul.f32 %v1509_v21, %v5914_v10  ;;  %v1520_v8 = vmul.f32 %v1512_v62, %v5919_v11  ;;  %v5981_v59 = vld [vmem:[%s6634_s29 + $0x38] sm:$0x3f] }
 0x34e   :  { %v1521_v37 = vmul.f32 %v1513_v13, %v5924_v12  ;;  %v1522_v45 = vmul.f32 %v1514_v30, %v5933_v48  ;;  %v1523_v32 = vmul.f32 %v1515_v31, %v5938_v23  ;;  %v1524_v38 = vmul.f32 %v1516_v33, %v5943_v25 }
 0x34f   :  { %v1526_v41 = vadd.f32 %v1518_v20, %v5904_v6  ;;  %v1527_v9 = vadd.f32 %v1519_v56, %v5909_v7  ;;  %v1525_v57 = vadd.f32 %v1517_v47, %v5948_v26  ;;  %v1528_v42 = vadd.f32 %v1520_v8, %v5953_v28 }
 0x350   :  { %v1529_v43 = vadd.f32 %v1521_v37, %v5958_v29  ;;  %v1530_v44 = vadd.f32 %v1522_v45, %v5971_v36  ;;  %v1531_v46 = vadd.f32 %v1523_v32, %v5976_v34  ;;  %v1532_v49 = vadd.f32 %v1524_v38, %v5981_v59 }
 0x351   :  { %1534 = vst.msk [vmem:[#allocation3 + $0x8] sm:$0xff] %vm792_vm2, %v1526_v41  ;;  %1535 = vst.msk [vmem:[#allocation3 + $0x10] sm:$0xff] %vm792_vm2, %v1527_v9 }
 0x352   :  { %1533 = vst.msk [vmem:[#allocation3] sm:$0xff] %vm792_vm2, %v1525_v57  ;;  %1536 = vst.msk [vmem:[#allocation3 + $0x18] sm:$0xff] %vm792_vm2, %v1528_v42 }
 0x353   :  { %1537 = vst.msk [vmem:[#allocation3 + $0x20] sm:$0xff] %vm792_vm2, %v1529_v43  ;;  %1538 = vst.msk [vmem:[#allocation3 + $0x28] sm:$0xff] %vm792_vm2, %v1530_v44 }
 0x354   :  { %1539 = vst.msk [vmem:[#allocation3 + $0x30] sm:$0xff] %vm792_vm2, %v1531_v46 }
 0x355   :  { %1540 = vst.msk [vmem:[#allocation3 + $0x38] sm:$0x3f] %vm1432_vm8, %v1532_v49 }
 0x358   :  { %v1726_v52 = vld [vmem:[#allocation3 + $0x9] sm:$0xff] }
 0x359   :  { %v1725_v53 = vld [vmem:[#allocation3 + $0x1] sm:$0xff]  ;;  %1775 = vrot.lane.b32.xlu0 %v1726_v52, %s4735_s5  ;;  %v1727_v54 = vld [vmem:[#allocation3 + $0x11] sm:$0xff] }
 0x35a   :  { %1773 = vrot.lane.b32.xlu1 %v1725_v53, %s4735_s5  ;;  %v1741_v55 = vld [vmem:[#allocation3 + $0x2] sm:$0xff]  ;;  %v1743_v4 = vld [vmem:[#allocation3 + $0x12] sm:$0xff]  ;;  %v1742_v58 = vld [vmem:[#allocation3 + $0xa] sm:$0xff] }
 0x35b   :  { %v1729_v60 = vld [vmem:[#allocation3 + $0x21] sm:$0xff]  ;;  %v1728_v61 = vld [vmem:[#allocation3 + $0x19] sm:$0xff]  ;;  %v1730_v5 = vld [vmem:[#allocation3 + $0x29] sm:$0xff] }
 0x35c   :  { %v1745_v63 = vld [vmem:[#allocation3 + $0x22] sm:$0xff]  ;;  %v1744_v0 = vld [vmem:[#allocation3 + $0x1a] sm:$0xff]  ;;  %v1731_v1 = vld [vmem:[#allocation3 + $0x31] sm:$0xff] }
 0x35d   :  { %1777 = vrot.lane.b32.xlu0 %v1727_v54, %s4735_s5  ;;  %v1747_v18 = vld [vmem:[#allocation3 + $0x32] sm:$0xff]  ;;  %v1746_v19 = vld [vmem:[#allocation3 + $0x2a] sm:$0xff] }
 0x35e   :  { %1837 = vrot.lane.b32.xlu1 %v1741_v55, %s6631_s10 }
 0x361   :  { %1841 = vrot.lane.b32.xlu0 %v1743_v4, %s6631_s10 }
 0x362   :  { %1839 = vrot.lane.b32.xlu1 %v1742_v58, %s6631_s10 }
 0x365   :  { %1781 = vrot.lane.b32.xlu0 %v1729_v60, %s4735_s5 }
 0x366   :  { %1779 = vrot.lane.b32.xlu1 %v1728_v61, %s4735_s5 }
 0x369   :  { %1845 = vrot.lane.b32.xlu0 %v1745_v63, %s6631_s10 }
 0x36a   :  { %1843 = vrot.lane.b32.xlu1 %v1744_v0, %s6631_s10 }
 0x36d   :  { %1785 = vrot.lane.b32.xlu0 %v1731_v1, %s4735_s5 }
 0x36e   :  { %1783 = vrot.lane.b32.xlu1 %v1730_v5, %s4735_s5 }
 0x371   :  { %1849 = vrot.lane.b32.xlu0 %v1747_v18, %s6631_s10 }
 0x372   :  { %1847 = vrot.lane.b32.xlu1 %v1746_v19, %s6631_s10 }
 0x39c   :  { %v1638_v21 = vpop.xlane.xlu1 %1637  ;;  %v1641_v62 = vpop.xlane.xlu0 %1640 }
 0x39d   :  { %v1660_v13 = vadd.f32 %v1641_v62, %v1638_v21 }
 0x3a0   :  { %v1644_v30 = vpop.xlane.xlu1 %1643  ;;  %v1647_v31 = vpop.xlane.xlu0 %1646 }
 0x3a1   :  { %v1661_v33 = vadd.f32 %v1660_v13, %v1644_v30 }
 0x3a3   :  { %v1662_v20 = vadd.f32 %v1661_v33, %v1647_v31 }
 0x3a4   :  { %v1650_v56 = vpop.xlane.xlu1 %1649  ;;  %v1653_v47 = vpop.xlane.xlu0 %1652 }
 0x3a5   :  { %v1663_v8 = vadd.f32 %v1662_v20, %v1650_v56  ;;  %v1712_v20 = vld [vmem:[#allocation3 + $0x18] sm:$0xff]  ;;  %v1713_v56 = vld [vmem:[#allocation3 + $0x20] sm:$0xff] }
 0x3a7   :  { %v1664_v37 = vadd.f32 %v1663_v8, %v1653_v47 }
 0x3a8   :  { %v1656_v45 = vpop.xlane.xlu1 %1655  ;;  %v1659_v32 = vpop.xlane.xlu0 %1658 }
 0x3a9   :  { %v1665_v38 = vadd.f32 %v1664_v37, %v1656_v45  ;;  %v1666_v39 = vsel %vm1442_vm13, %v1659_v32, 0.0 }
 0x3ab   :  { %v1667_v40 = vadd.f32 %v1666_v39, %v1665_v38 }
 0x3ad   :  { %v1668_v41 = vrot.slane %v1667_v40, 4 }
 0x3af   :  { %v1669_v9 = vadd.f32 %v1668_v41, %v1667_v40 }
 0x3b1   :  { %v1670_v57 = vrot.slane %v1669_v9, 2 }
 0x3b3   :  { %v1671_v42 = vadd.f32 %v1670_v57, %v1669_v9 }
 0x3b5   :  { %v1672_v43 = vrot.slane %v1671_v42, 1 }
 0x3b7   :  { %v1673_v44 = vadd.f32 %v1672_v43, %v1671_v42  ;;  %v1714_v43 = vld [vmem:[#allocation3 + $0x28] sm:$0xff] }
 0x3b9   :  { %v1674_v46 = vmul.f32 0.002016129, %v1673_v44  ;;  %v1715_v44 = vld [vmem:[#allocation3 + $0x30] sm:$0xff] }
 0x3bb   :  { %v1675_v49 = vadd.f32 1e-05, %v1674_v46 }
 0x3bd   :  { %4691 = vrsqrt.f32 %v1675_v49 }
 0x3c7   :  { %v4692_v50 = vpop.eup %4691 }
 0x3c8   :  { %v1677_v51 = vmul.f32 %v4692_v50, %v5846_v15  ;;  %v1678_v52 = vmul.f32 %v4692_v50, %v5843_v14  ;;  %v1679_v53 = vmul.f32 %v4692_v50, %v5852_v17  ;;  %v1680_v54 = vmul.f32 %v4692_v50, %v5849_v16 }
 0x3c9   :  { %v1681_v55 = vmul.f32 %v4692_v50, %v5862_v35  ;;  %v1682_v4 = vmul.f32 %v4692_v50, %v5859_v22  ;;  %v1683_v58 = vmul.f32 %v4692_v50, %v5874_v27  ;;  %v1684_v60 = vmul.f32 %v4692_v50, %v5871_v24 }
 0x3ca   :  { %v1685_v61 = vmul.f32 %v1677_v51, %v5914_v10  ;;  %v1686_v63 = vmul.f32 %v1678_v52, %v5894_v2  ;;  %v1687_v15 = vmul.f32 %v1679_v53, %v5899_v3  ;;  %v1688_v14 = vmul.f32 %v1680_v54, %v5919_v11 }
 0x3cb   :  { %v1689_v17 = vmul.f32 %v1681_v55, %v5924_v12  ;;  %v1690_v16 = vmul.f32 %v1682_v4, %v5933_v48  ;;  %v1691_v35 = vmul.f32 %v1683_v58, %v5938_v23  ;;  %v1692_v22 = vmul.f32 %v1684_v60, %v5943_v25  ;;  %v1776_v27 = vpop.permute.xlu0 %1775  ;;  %v1709_v23 = vld [vmem:[#allocation3] sm:$0xff] }
 0x3cc   :  { %v1774_v0 = vpop.permute.xlu1 %1773  ;;  %v1693_v24 = vadd.f32 %v1685_v61, %v5948_v26  ;;  %v1694_v10 = vadd.f32 %v1686_v63, %v5904_v6  ;;  %v1695_v2 = vadd.f32 %v1687_v15, %v5909_v7  ;;  %v1696_v3 = vadd.f32 %v1688_v14, %v5953_v28 }
 0x3cd   :  { %v1697_v11 = vadd.f32 %v1689_v17, %v5958_v29  ;;  %v1698_v12 = vadd.f32 %v1690_v16, %v5971_v36  ;;  %v1699_v48 = vadd.f32 %v1691_v35, %v5976_v34  ;;  %v1700_v6 = vadd.f32 %v1692_v22, %v5981_v59  ;;  %v1710_v29 = vld [vmem:[#allocation3 + $0x8] sm:$0xff]  ;;  %v1711_v36 = vld [vmem:[#allocation3 + $0x10] sm:$0xff] }
 0x3ce   :  { %1701 = vst.msk [vmem:[#allocation3 + $0x3e] sm:$0xff] %vm792_vm2, %v1693_v24  ;;  %1702 = vst.msk [vmem:[#allocation3 + $0x46] sm:$0xff] %vm792_vm2, %v1694_v10  ;;  %v1885_v7 = vsel %vm792_vm2, %v1709_v23, %v1774_v0  ;;  %v1886_v34 = vsel %vm792_vm2, %v1710_v29, %v1776_v27 }
 0x3cf   :  { %1703 = vst.msk [vmem:[#allocation3 + $0x4e] sm:$0xff] %vm792_vm2, %v1695_v2  ;;  %1704 = vst.msk [vmem:[#allocation3 + $0x56] sm:$0xff] %vm792_vm2, %v1696_v3  ;;  %v1778_v26 = vpop.permute.xlu0 %1777 }
 0x3d0   :  { %1705 = vst.msk [vmem:[#allocation3 + $0x5e] sm:$0xff] %vm792_vm2, %v1697_v11  ;;  %1706 = vst.msk [vmem:[#allocation3 + $0x66] sm:$0xff] %vm792_vm2, %v1698_v12  ;;  %v1838_v25 = vpop.permute.xlu1 %1837  ;;  %v1887_v59 = vsel %vm792_vm2, %v1711_v36, %v1778_v26 }
 0x3d1   :  { %1707 = vst.msk [vmem:[#allocation3 + $0x6e] sm:$0xff] %vm792_vm2, %v1699_v48  ;;  %v1901_v28 = vsel %vm858_vm4, %v1885_v7, %v1838_v25 }
 0x3d2   :  { %1708 = vst.msk [vmem:[#allocation3 + $0x76] sm:$0x3f] %vm1432_vm8, %v1700_v6  ;;  %4506 = vmatprep.mubr.msk.f32.mxu1 %vm1927_vm14, %v1901_v28 }
 0x3d3   :  { %v1842_v5 = vpop.permute.xlu0 %1841 }
 0x3d4   :  { %v1840_v1 = vpop.permute.xlu1 %1839  ;;  %v1903_v19 = vsel %vm858_vm4, %v1887_v59, %v1842_v5 }
 0x3d5   :  { %v1902_v18 = vsel %vm858_vm4, %v1886_v34, %v1840_v1  ;;  %v1733_v21 = vld [vmem:[#allocation3 + $0x41] sm:$0xff]  ;;  %v1732_v62 = vld [vmem:[#allocation3 + $0x39] sm:$0xff] }
 0x3d6   :  { %4507 = vmatmul.mubr.msk.f32.vlgmr.msra.gmra.mrb[0].mxu1 %vm1927_vm14, %v1902_v18  ;;  %1789 = vrot.lane.b32.xlu0 %v1733_v21, %s4735_s5  ;;  %v1749_v31 = vld [vmem:[#allocation3 + $0x42] sm:$0xff]  ;;  %v1748_v33 = vld [vmem:[#allocation3 + $0x3a] sm:$0xff]  ;;  %v1735_v39 = vld [vmem:[#allocation3 + $0x51] sm:$0xff] }
 0x3d7   :  { %1787 = vrot.lane.b32.xlu1 %v1732_v62, %s4735_s5  ;;  %4509 = vmatprep.mubr.msk.f32.mxu1 %vm1927_vm14, %v1903_v19  ;;  %v1782_v30 = vpop.permute.xlu0 %1781  ;;  %v1734_v40 = vld [vmem:[#allocation3 + $0x49] sm:$0xff]  ;;  %v1751_v57 = vld [vmem:[#allocation3 + $0x52] sm:$0xff]  ;;  %v1737_v54 = vld [vmem:[#allocation3 + $0x61] sm:$0xff] }
 0x3d8   :  { %v1780_v13 = vpop.permute.xlu1 %1779  ;;  %v1889_v8 = vsel %vm792_vm2, %v1713_v56, %v1782_v30  ;;  %v1750_v42 = vld [vmem:[#allocation3 + $0x4a] sm:$0xff]  ;;  %v1736_v55 = vld [vmem:[#allocation3 + $0x59] sm:$0xff]  ;;  %v1753_v4 = vld [vmem:[#allocation3 + $0x62] sm:$0xff] }
 0x3d9   :  { %v1888_v47 = vsel %vm792_vm2, %v1712_v20, %v1780_v13  ;;  %v1752_v58 = vld [vmem:[#allocation3 + $0x5a] sm:$0xff]  ;;  %v1739_v60 = vld [vmem:[#allocation3 + $0x71] sm:$0xff]  ;;  %v1738_v61 = vld [vmem:[#allocation3 + $0x69] sm:$0xff] }
 0x3da   :  { %1853 = vrot.lane.b32.xlu0 %v1749_v31, %s6631_s10  ;;  %v1755_v63 = vld [vmem:[#allocation3 + $0x72] sm:$0xff]  ;;  %v1754_v15 = vld [vmem:[#allocation3 + $0x6a] sm:$0xff]  ;;  %v1756_v17 = vld [vmem:[#allocation3 + $0x7a] sm:$0x3] }
 0x3db   :  { %1851 = vrot.lane.b32.xlu1 %v1748_v33, %s6631_s10  ;;  %v1846_v45 = vpop.permute.xlu0 %1845  ;;  %v1740_v14 = vld [vmem:[#allocation3 + $0x79] sm:$0x3]  ;;  %v1717_v22 = vld [vmem:[#allocation3 + $0x40] sm:$0xff]  ;;  %v1719_v6 = vld [vmem:[#allocation3 + $0x50] sm:$0xff] }
 0x3dc   :  { %v1844_v37 = vpop.permute.xlu1 %1843  ;;  %v1905_v38 = vsel %vm858_vm4, %v1889_v8, %v1846_v45  ;;  %v1716_v0 = vld [vmem:[#allocation3 + $0x38] sm:$0xff]  ;;  %v1718_v23 = vld [vmem:[#allocation3 + $0x48] sm:$0xff]  ;;  %v1721_v1 = vld [vmem:[#allocation3 + $0x60] sm:$0xff] }
 0x3dd   :  { %v1904_v32 = vsel %vm858_vm4, %v1888_v47, %v1844_v37  ;;  %v1720_v5 = vld [vmem:[#allocation3 + $0x58] sm:$0xff]  ;;  %v1723_v20 = vld [vmem:[#allocation3 + $0x70] sm:$0xff]  ;;  %v1722_v56 = vld [vmem:[#allocation3 + $0x68] sm:$0xff] }
 0x3de   :  { %4510 = vmatmul.mubr.msk.f32.gmra.mrb[2].mxu1 %vm1927_vm14, %v1904_v32  ;;  %1793 = vrot.lane.b32.xlu0 %v1735_v39, %s4735_s5 }
 0x3df   :  { %1791 = vrot.lane.b32.xlu1 %v1734_v40, %s4735_s5  ;;  %4512 = vmatprep.mubr.msk.f32.mxu1 %vm1927_vm14, %v1905_v38  ;;  %v1786_v9 = vpop.permute.xlu0 %1785  ;;  %v1724_v40 = vld [vmem:[#allocation3 + $0x78] sm:$0x3] }
 0x3e0   :  { %v1784_v41 = vpop.permute.xlu1 %1783  ;;  %v1891_v49 = vsel %vm792_vm2, %v1715_v44, %v1786_v9 }
 0x3e1   :  { %v1890_v46 = vsel %vm792_vm2, %v1714_v43, %v1784_v41 }
 0x3e2   :  { %1857 = vrot.lane.b32.xlu0 %v1751_v57, %s6631_s10 }
 0x3e3   :  { %1855 = vrot.lane.b32.xlu1 %v1750_v42, %s6631_s10  ;;  %v1850_v51 = vpop.permute.xlu0 %1849  ;;  %v6128_v42 = vld [vmem:[%s6636_s28] ss:$0 sm:$0xff]  ;;  %s6640_s28 = sld [smem:[#allocation21_spill]] }
 0x3e4   :  { %v1848_v50 = vpop.permute.xlu1 %1847  ;;  %v1907_v53 = vsel %vm858_vm4, %v1891_v49, %v1850_v51 }
 0x3e5   :  { %v1906_v52 = vsel %vm858_vm4, %v1890_v46, %v1848_v50 }
 0x3e6   :  { %4513 = vmatmul.mubr.msk.f32.gmra.mrb[4].mxu1 %vm1927_vm14, %v1906_v52  ;;  %1797 = vrot.lane.b32.xlu0 %v1737_v54, %s4735_s5 }
 0x3e7   :  { %1795 = vrot.lane.b32.xlu1 %v1736_v55, %s4735_s5  ;;  %4515 = vmatprep.mubr.msk.f32.mxu1 %vm1927_vm14, %v1907_v53 }
 0x3ea   :  { %1861 = vrot.lane.b32.xlu0 %v1753_v4, %s6631_s10 }
 0x3eb   :  { %1859 = vrot.lane.b32.xlu1 %v1752_v58, %s6631_s10 }
 0x3ee   :  { %1801 = vrot.lane.b32.xlu0 %v1739_v60, %s4735_s5 }
 0x3ef   :  { %1799 = vrot.lane.b32.xlu1 %v1738_v61, %s4735_s5 }
 0x3f2   :  { %1865 = vrot.lane.b32.xlu0 %v1755_v63, %s6631_s10 }
 0x3f3   :  { %1863 = vrot.lane.b32.xlu1 %v1754_v15, %s6631_s10 }
 0x3f7   :  { %1803 = vrot.lane.b32.xlu1 %v1740_v14, %s4735_s5 }
 0x3fb   :  { %1867 = vrot.lane.b32.xlu1 %v1756_v17, %s6631_s10 }
 0x448   :  { %v1790_v16 = vpop.permute.xlu0 %1789 }
 0x449   :  { %v1788_v35 = vpop.permute.xlu1 %1787  ;;  %v1893_v27 = vsel %vm792_vm2, %v1717_v22, %v1790_v16 }
 0x44a   :  { %v1892_v10 = vsel %vm792_vm2, %v1716_v0, %v1788_v35 }
 0x44c   :  { %v1854_v24 = vpop.permute.xlu0 %1853 }
 0x44d   :  { %v1852_v2 = vpop.permute.xlu1 %1851  ;;  %v1909_v3 = vsel %vm858_vm4, %v1893_v27, %v1854_v24 }
 0x44e   :  { %v1908_v11 = vsel %vm858_vm4, %v1892_v10, %v1852_v2 }
 0x44f   :  { %4516 = vmatmul.mubr.msk.f32.gmra.mrb[6].mxu1 %vm1927_vm14, %v1908_v11 }
 0x450   :  { %4518 = vmatprep.mubr.msk.f32.mxu1 %vm1927_vm14, %v1909_v3  ;;  %v1794_v12 = vpop.permute.xlu0 %1793 }
 0x451   :  { %v1792_v48 = vpop.permute.xlu1 %1791  ;;  %v1895_v7 = vsel %vm792_vm2, %v1719_v6, %v1794_v12 }
 0x452   :  { %v1894_v26 = vsel %vm792_vm2, %v1718_v23, %v1792_v48 }
 0x454   :  { %v1858_v25 = vpop.permute.xlu0 %1857 }
 0x455   :  { %v1856_v28 = vpop.permute.xlu1 %1855  ;;  %v1911_v29 = vsel %vm858_vm4, %v1895_v7, %v1858_v25 }
 0x456   :  { %v1910_v36 = vsel %vm858_vm4, %v1894_v26, %v1856_v28 }
 0x457   :  { %4519 = vmatmul.mubr.msk.f32.gmra.mrb[8].mxu1 %vm1927_vm14, %v1910_v36 }
 0x458   :  { %4521 = vmatprep.mubr.msk.f32.mxu1 %vm1927_vm14, %v1911_v29  ;;  %v1798_v34 = vpop.permute.xlu0 %1797 }
 0x459   :  { %v1796_v59 = vpop.permute.xlu1 %1795  ;;  %v1897_v18 = vsel %vm792_vm2, %v1721_v1, %v1798_v34 }
 0x45a   :  { %v1896_v21 = vsel %vm792_vm2, %v1720_v5, %v1796_v59 }
 0x45c   :  { %v1862_v19 = vpop.permute.xlu0 %1861 }
 0x45d   :  { %v1860_v62 = vpop.permute.xlu1 %1859  ;;  %v1913_v13 = vsel %vm858_vm4, %v1897_v18, %v1862_v19 }
 0x45e   :  { %v1912_v30 = vsel %vm858_vm4, %v1896_v21, %v1860_v62 }
 0x45f   :  { %4522 = vmatmul.mubr.msk.f32.gmra.mrb[10].mxu1 %vm1927_vm14, %v1912_v30 }
 0x460   :  { %4524 = vmatprep.mubr.msk.f32.mxu1 %vm1927_vm14, %v1913_v13  ;;  %v1802_v31 = vpop.permute.xlu0 %1801 }
 0x461   :  { %v1800_v33 = vpop.permute.xlu1 %1799  ;;  %v1899_v47 = vsel %vm792_vm2, %v1723_v20, %v1802_v31 }
 0x462   :  { %v1898_v37 = vsel %vm792_vm2, %v1722_v56, %v1800_v33 }
 0x464   :  { %v1866_v8 = vpop.permute.xlu0 %1865 }
 0x465   :  { %v1864_v45 = vpop.permute.xlu1 %1863  ;;  %v1915_v32 = vsel %vm858_vm4, %v1899_v47, %v1866_v8 }
 0x466   :  { %v1914_v38 = vsel %vm858_vm4, %v1898_v37, %v1864_v45 }
 0x467   :  { %4525 = vmatmul.mubr.msk.f32.gmra.mrb[12].mxu1 %vm1927_vm14, %v1914_v38 }
 0x468   :  { %4527 = vmatprep.mubr.msk.f32.mxu1 %vm1927_vm14, %v1915_v32 }
 0x469   :  { %v1804_v39 = vpop.permute.xlu1 %1803 }
 0x46a   :  { %v1900_v41 = vsel %vm792_vm2, %v1724_v40, %v1804_v39 }
 0x46d   :  { %v1868_v9 = vpop.permute.xlu1 %1867 }
 0x46e   :  { %v1916_v57 = vsel %vm858_vm4, %v1900_v41, %v1868_v9 }
 0x46f   :  { %4528 = vmatmul.mubr.msk.f32.gmra.mrb[14].mxu1 %vm1927_vm14, %v1916_v57 }
 0x4a9   :  { %v4508_v43 = vpop.f32.mrb[0].mxu1 }
 0x4aa   :  { %v2048_v44 = vadd.f32 %v4508_v43, %v6128_v42  ;;  %v2042_v46 = vpop.f32.mrb[1].mxu1 }
 0x4ab   :  { %v2043_v49 = vadd.f32 %v6128_v42, %v2042_v46 }
 0x4ac   :  { %vm2122_vm15 = vcmp.gt.f32.partialorder %v2048_v44, 0.0  ;;  %v2138_v50 = vmul.f32 0.01, %v2048_v44 }
 0x4ad   :  { %vm2121_vm0 = vcmp.gt.f32.partialorder %v2043_v49, 0.0  ;;  %v2137_v51 = vmul.f32 0.01, %v2043_v49 }
 0x4ae   :  { %v2154_v52 = vsel %vm2122_vm15, %v2048_v44, %v2138_v50 }
 0x4af   :  { %2170 = vst.msk [vmem:[#allocation4 + $0x8] sm:$0xff] %vm792_vm2, %v2154_v52  ;;  %v2153_v53 = vsel %vm2121_vm0, %v2043_v49, %v2137_v51 }
 0x4b0   :  { %2169 = vst.msk [vmem:[#allocation4] sm:$0xff] %vm792_vm2, %v2153_v53 }
 0x4b1   :  { %v4511_v54 = vpop.f32.mrb[2].mxu1 }
 0x4b2   :  { %v2058_v55 = vadd.f32 %v4511_v54, %v6128_v42  ;;  %v2052_v4 = vpop.f32.mrb[3].mxu1 }
 0x4b3   :  { %v2053_v58 = vadd.f32 %v6128_v42, %v2052_v4 }
 0x4b4   :  { %vm2124_vm1 = vcmp.gt.f32.partialorder %v2058_v55, 0.0  ;;  %v2140_v60 = vmul.f32 0.01, %v2058_v55 }
 0x4b5   :  { %vm2123_vm3 = vcmp.gt.f32.partialorder %v2053_v58, 0.0  ;;  %v2139_v61 = vmul.f32 0.01, %v2053_v58 }
 0x4b6   :  { %v2156_v63 = vsel %vm2124_vm1, %v2058_v55, %v2140_v60 }
 0x4b7   :  { %2172 = vst.msk [vmem:[#allocation4 + $0x18] sm:$0xff] %vm792_vm2, %v2156_v63  ;;  %v2155_v15 = vsel %vm2123_vm3, %v2053_v58, %v2139_v61  ;;  %v2194_v14 = vld [vmem:[#allocation4] ss:$2 sm:$0xff]  ;;  %v2202_v17 = vld [vmem:[#allocation4 + $0x1] ss:$2 sm:$0xff] }
 0x4b8   :  { %2171 = vst.msk [vmem:[#allocation4 + $0x10] sm:$0xff] %vm792_vm2, %v2155_v15  ;;  %v6138_v16 = vmax.f32 %v2194_v14, %v2202_v17 }
 0x4b9   :  { %v4514_v35 = vpop.f32.mrb[4].mxu1 }
 0x4ba   :  { %v2068_v22 = vadd.f32 %v4514_v35, %v6128_v42  ;;  %v2062_v0 = vpop.f32.mrb[5].mxu1  ;;  %v2213_v27 = vsel %vm792_vm2, %v6138_v16, 0.0 }
 0x4bb   :  { %v2063_v24 = vadd.f32 %v6128_v42, %v2062_v0  ;;  %2214 = vadd.xlane.f32.xlu0 %v2213_v27 }
 0x4bc   :  { %vm2126_vm5 = vcmp.gt.f32.partialorder %v2068_v22, 0.0  ;;  %v2142_v10 = vmul.f32 0.01, %v2068_v22 }
 0x4bd   :  { %vm2125_vm6 = vcmp.gt.f32.partialorder %v2063_v24, 0.0  ;;  %v2141_v2 = vmul.f32 0.01, %v2063_v24 }
 0x4be   :  { %v2158_v3 = vsel %vm2126_vm5, %v2068_v22, %v2142_v10  ;;  %vm2184_vm5 = vcmask 58368  }
 0x4bf   :  { %2174 = vst.msk [vmem:[#allocation4 + $0x28] sm:$0xff] %vm792_vm2, %v2158_v3  ;;  %v2157_v11 = vsel %vm2125_vm6, %v2063_v24, %v2141_v2  ;;  %v2196_v12 = vld [vmem:[#allocation4 + $0x10] ss:$2 sm:$0xff]  ;;  %v2204_v48 = vld [vmem:[#allocation4 + $0x11] ss:$2 sm:$0xff] }
 0x4c0   :  { %2173 = vst.msk [vmem:[#allocation4 + $0x20] sm:$0xff] %vm792_vm2, %v2157_v11  ;;  %v6146_v6 = vmax.f32 %v2196_v12, %v2204_v48 }
 0x4c2   :  { %v2216_v23 = vsel %vm792_vm2, %v6146_v6, 0.0 }
 0x4c3   :  { %2217 = vadd.xlane.f32.xlu1 %v2216_v23 }
 0x4c7   :  { %v2198_v7 = vld [vmem:[#allocation4 + $0x20] ss:$2 sm:$0xff]  ;;  %v2206_v25 = vld [vmem:[#allocation4 + $0x21] ss:$2 sm:$0xff] }
 0x4c8   :  { %v6150_v26 = vmax.f32 %v2198_v7, %v2206_v25 }
 0x4ca   :  { %v2219_v28 = vsel %vm792_vm2, %v6150_v26, 0.0 }
 0x4cb   :  { %2220 = vadd.xlane.f32.xlu0 %v2219_v28 }
 0x522   :  { %v4517_v29 = vpop.f32.mrb[6].mxu1 }
 0x523   :  { %v2078_v36 = vadd.f32 %v4517_v29, %v6128_v42  ;;  %v2072_v34 = vpop.f32.mrb[7].mxu1 }
 0x524   :  { %v2073_v59 = vadd.f32 %v6128_v42, %v2072_v34 }
 0x525   :  { %vm2128_vm7 = vcmp.gt.f32.partialorder %v2078_v36, 0.0  ;;  %v2144_v1 = vmul.f32 0.01, %v2078_v36 }
 0x526   :  { %vm2127_vm9 = vcmp.gt.f32.partialorder %v2073_v59, 0.0  ;;  %v2143_v5 = vmul.f32 0.01, %v2073_v59 }
 0x527   :  { %v2160_v18 = vsel %vm2128_vm7, %v2078_v36, %v2144_v1 }
 0x528   :  { %2176 = vst.msk [vmem:[#allocation4 + $0x38] sm:$0xff] %vm792_vm2, %v2160_v18  ;;  %v2159_v19 = vsel %vm2127_vm9, %v2073_v59, %v2143_v5 }
 0x529   :  { %2175 = vst.msk [vmem:[#allocation4 + $0x30] sm:$0xff] %vm792_vm2, %v2159_v19 }
 0x52a   :  { %v4520_v21 = vpop.f32.mrb[8].mxu1 }
 0x52b   :  { %v2088_v62 = vadd.f32 %v4520_v21, %v6128_v42  ;;  %v2082_v13 = vpop.f32.mrb[9].mxu1 }
 0x52c   :  { %v2083_v30 = vadd.f32 %v6128_v42, %v2082_v13 }
 0x52d   :  { %vm2130_vm10 = vcmp.gt.f32.partialorder %v2088_v62, 0.0  ;;  %v2146_v31 = vmul.f32 0.01, %v2088_v62 }
 0x52e   :  { %vm2129_vm11 = vcmp.gt.f32.partialorder %v2083_v30, 0.0  ;;  %v2145_v33 = vmul.f32 0.01, %v2083_v30 }
 0x52f   :  { %v2162_v20 = vsel %vm2130_vm10, %v2088_v62, %v2146_v31 }
 0x530   :  { %2178 = vst.msk [vmem:[#allocation4 + $0x48] sm:$0xff] %vm792_vm2, %v2162_v20  ;;  %v2161_v56 = vsel %vm2129_vm11, %v2083_v30, %v2145_v33  ;;  %v2200_v47 = vld [vmem:[#allocation4 + $0x30] ss:$2 sm:$0x3f] }
 0x531   :  { %v2208_v8 = vld [vmem:[#allocation4 + $0x31] ss:$2 sm:$0x3f]  ;;  %2177 = vst.msk [vmem:[#allocation4 + $0x40] sm:$0xff] %vm792_vm2, %v2161_v56 }
 0x532   :  { %v6162_v37 = vmax.f32 %v2200_v47, %v2208_v8  ;;  %v4523_v45 = vpop.f32.mrb[10].mxu1 }
 0x533   :  { %v2098_v32 = vadd.f32 %v4523_v45, %v6128_v42  ;;  %v2092_v38 = vpop.f32.mrb[11].mxu1 }
 0x534   :  { %v2222_v39 = vsel %vm1432_vm8, %v6162_v37, 0.0  ;;  %v2093_v40 = vadd.f32 %v6128_v42, %v2092_v38 }
 0x535   :  { %2223 = vadd.xlane.f32.xlu0 %v2222_v39  ;;  %vm2132_vm12 = vcmp.gt.f32.partialorder %v2098_v32, 0.0  ;;  %v2148_v41 = vmul.f32 0.01, %v2098_v32 }
 0x536   :  { %vm2131_vm15 = vcmp.gt.f32.partialorder %v2093_v40, 0.0  ;;  %v2147_v9 = vmul.f32 0.01, %v2093_v40 }
 0x537   :  { %v2164_v57 = vsel %vm2132_vm12, %v2098_v32, %v2148_v41 }
 0x538   :  { %2180 = vst.msk [vmem:[#allocation4 + $0x58] sm:$0xff] %vm792_vm2, %v2164_v57  ;;  %v2163_v43 = vsel %vm2131_vm15, %v2093_v40, %v2147_v9  ;;  %v2286_v44 = vld [vmem:[#allocation4 + $0x3e] ss:$2 sm:$0xff]  ;;  %v2294_v46 = vld [vmem:[#allocation4 + $0x3f] ss:$2 sm:$0xff] }
 0x539   :  { %2179 = vst.msk [vmem:[#allocation4 + $0x50] sm:$0xff] %vm792_vm2, %v2163_v43  ;;  %v6170_v49 = vmax.f32 %v2286_v44, %v2294_v46 }
 0x53a   :  { %v4526_v50 = vpop.f32.mrb[12].mxu1 }
 0x53b   :  { %v2108_v51 = vadd.f32 %v4526_v50, %v6128_v42  ;;  %v2102_v52 = vpop.f32.mrb[13].mxu1  ;;  %v2305_v53 = vsel %vm792_vm2, %v6170_v49, 0.0 }
 0x53c   :  { %v2103_v54 = vadd.f32 %v6128_v42, %v2102_v52  ;;  %2306 = vadd.xlane.f32.xlu1 %v2305_v53 }
 0x53d   :  { %vm2134_vm0 = vcmp.gt.f32.partialorder %v2108_v51, 0.0  ;;  %v2150_v55 = vmul.f32 0.01, %v2108_v51 }
 0x53e   :  { %vm2133_vm1 = vcmp.gt.f32.partialorder %v2103_v54, 0.0  ;;  %v2149_v4 = vmul.f32 0.01, %v2103_v54 }
 0x53f   :  { %v2166_v58 = vsel %vm2134_vm0, %v2108_v51, %v2150_v55  ;;  %vm4740_vm0 = vmmov 0  }
 0x540   :  { %2182 = vst.msk [vmem:[#allocation4 + $0x68] sm:$0xff] %vm792_vm2, %v2166_v58  ;;  %v2165_v60 = vsel %vm2133_vm1, %v2103_v54, %v2149_v4  ;;  %v2288_v61 = vld [vmem:[#allocation4 + $0x4e] ss:$2 sm:$0xff]  ;;  %v2296_v63 = vld [vmem:[#allocation4 + $0x4f] ss:$2 sm:$0xff] }
 0x541   :  { %2181 = vst.msk [vmem:[#allocation4 + $0x60] sm:$0xff] %vm792_vm2, %v2165_v60  ;;  %v6178_v15 = vmax.f32 %v2288_v61, %v2296_v63 }
 0x542   :  { %v4529_v14 = vpop.f32.mrb[14].mxu1 }
 0x543   :  { %v2118_v17 = vadd.f32 %v4529_v14, %v6128_v42  ;;  %v2112_v35 = vpop.f32.mrb[15].mxu1  ;;  %v2308_v22 = vsel %vm792_vm2, %v6178_v15, 0.0 }
 0x544   :  { %v2113_v0 = vadd.f32 %v6128_v42, %v2112_v35  ;;  %2309 = vadd.xlane.f32.xlu0 %v2308_v22 }
 0x545   :  { %vm2136_vm3 = vcmp.gt.f32.partialorder %v2118_v17, 0.0  ;;  %v2152_v27 = vmul.f32 0.01, %v2118_v17 }
 0x546   :  { %vm2135_vm6 = vcmp.gt.f32.partialorder %v2113_v0, 0.0  ;;  %v2151_v24 = vmul.f32 0.01, %v2113_v0 }
 0x547   :  { %v2168_v10 = vsel %vm2136_vm3, %v2118_v17, %v2152_v27 }
 0x548   :  { %2185 = vst.msk [vmem:[#allocation4 + $0x78] sm:$0x3] %vm2184_vm5, %v2168_v10  ;;  %v2167_v2 = vsel %vm2135_vm6, %v2113_v0, %v2151_v24  ;;  %v2290_v3 = vld [vmem:[#allocation4 + $0x5e] ss:$2 sm:$0xff]  ;;  %v2298_v11 = vld [vmem:[#allocation4 + $0x5f] ss:$2 sm:$0xff]  ;;  %v2215_v28 = vpop.xlane.xlu0 %2214 }
 0x549   :  { %2183 = vst.msk [vmem:[#allocation4 + $0x70] sm:$0xff] %vm792_vm2, %v2167_v2  ;;  %v2303_v12 = vmax.f32 %v2290_v3, %v2298_v11  ;;  %vm4224_vm6 = vcmask 25600  }
 0x54b   :  { %v2311_v48 = vsel %vm792_vm2, %v2303_v12, 0.0 }
 0x54c   :  { %2312 = vadd.xlane.f32.xlu1 %v2311_v48 }
 0x550   :  { %v2292_v23 = vld [vmem:[#allocation4 + $0x6e] ss:$2 sm:$0x3f]  ;;  %v2300_v42 = vld [vmem:[#allocation4 + $0x6f] ss:$2 sm:$0x3f]  ;;  %v2218_v29 = vpop.xlane.xlu1 %2217 }
 0x551   :  { %v2304_v7 = vmax.f32 %v2292_v23, %v2300_v42  ;;  %v2225_v34 = vadd.f32 %v2218_v29, %v2215_v28 }
 0x553   :  { %v2314_v25 = vsel %vm1432_vm8, %v2304_v7, 0.0 }
 0x554   :  { %2315 = vadd.xlane.f32.xlu0 %v2314_v25 }
 0x558   :  { %v2221_v36 = vpop.xlane.xlu0 %2220 }
 0x559   :  { %v2226_v59 = vadd.f32 %v2225_v34, %v2221_v36 }
 0x5c2   :  { %v2224_v1 = vpop.xlane.xlu0 %2223 }
 0x5c3   :  { %v2227_v5 = vsel %vm1442_vm13, %v2224_v1, 0.0 }
 0x5c4   :  { %v2228_v18 = vadd.f32 %v2227_v5, %v2226_v59 }
 0x5c6   :  { %v2229_v19 = vrot.slane %v2228_v18, 4 }
 0x5c8   :  { %v2230_v21 = vadd.f32 %v2229_v19, %v2228_v18  ;;  %v6240_v19 = vld [vmem:[%s6637_s11 + $0x8] sm:$0xff] }
 0x5ca   :  { %v2231_v62 = vrot.slane %v2230_v21, 2 }
 0x5cc   :  { %v2232_v13 = vadd.f32 %v2231_v62, %v2230_v21 }
 0x5ce   :  { %v2233_v30 = vrot.slane %v2232_v13, 1 }
 0x5d0   :  { %v2234_v31 = vadd.f32 %v2233_v30, %v2232_v13  ;;  %v6245_v13 = vld [vmem:[%s6637_s11 + $0x10] sm:$0xff]  ;;  %v2186_v30 = vld [vmem:[%s6637_s11] sm:$0xff] }
 0x5d1   :  { %v2310_v41 = vpop.xlane.xlu0 %2309 }
 0x5d2   :  { %v2235_v33 = vmul.f32 0.004166667, %v2234_v31  ;;  %v6253_v31 = vld [vmem:[%s6637_s11 + $0x18] sm:$0x3f] }
 0x5d4   :  { %v6190_v20 = vsub.f32 %v6146_v6, %v2235_v33  ;;  %v6193_v56 = vsub.f32 %v6138_v16, %v2235_v33  ;;  %v6196_v47 = vsub.f32 %v6162_v37, %v2235_v33  ;;  %v6199_v8 = vsub.f32 %v6150_v26, %v2235_v33  ;;  %v2307_v26 = vpop.xlane.xlu1 %2306 }
 0x5d5   :  { %v2317_v57 = vadd.f32 %v2310_v41, %v2307_v26 }
 0x5d6   :  { %v2241_v45 = vmul.f32 %v6190_v20, %v6190_v20  ;;  %v2240_v32 = vmul.f32 %v6193_v56, %v6193_v56  ;;  %v2243_v16 = vmul.f32 %v6196_v47, %v6196_v47  ;;  %v2242_v37 = vmul.f32 %v6199_v8, %v6199_v8 }
 0x5d8   :  { %v2247_v38 = vsel %vm792_vm2, %v2241_v45, 0.0  ;;  %v2244_v6 = vsel %vm792_vm2, %v2240_v32, 0.0  ;;  %v2253_v39 = vsel %vm1432_vm8, %v2243_v16, 0.0  ;;  %v2250_v40 = vsel %vm792_vm2, %v2242_v37, 0.0  ;;  %v2191_v32 = vld [vmem:[%s6638_s0 + $0x8] sm:$0xff]  ;;  %v2190_v37 = vld [vmem:[%s6638_s0] sm:$0xff] }
 0x5d9   :  { %2248 = vadd.xlane.f32.xlu0 %v2247_v38  ;;  %2245 = vadd.xlane.f32.xlu1 %v2244_v6  ;;  %v2313_v9 = vpop.xlane.xlu1 %2312  ;;  %v2192_v38 = vld [vmem:[%s6638_s0 + $0x10] sm:$0xff] }
 0x5da   :  { %v2318_v43 = vadd.f32 %v2317_v57, %v2313_v9  ;;  %v2193_v9 = vld [vmem:[%s6638_s0 + $0x18] sm:$0x3f] }
 0x5dd   :  { %2254 = vadd.xlane.f32.xlu0 %v2253_v39  ;;  %2251 = vadd.xlane.f32.xlu1 %v2250_v40 }
 0x5e1   :  { %v2316_v44 = vpop.xlane.xlu0 %2315 }
 0x5e2   :  { %v2319_v46 = vsel %vm1442_vm13, %v2316_v44, 0.0 }
 0x5e3   :  { %v2320_v50 = vadd.f32 %v2319_v46, %v2318_v43 }
 0x5e5   :  { %v2321_v51 = vrot.slane %v2320_v50, 4 }
 0x5e7   :  { %v2322_v52 = vadd.f32 %v2321_v51, %v2320_v50 }
 0x5e9   :  { %v2323_v53 = vrot.slane %v2322_v52, 2 }
 0x5eb   :  { %v2324_v54 = vadd.f32 %v2323_v53, %v2322_v52 }
 0x5ed   :  { %v2325_v55 = vrot.slane %v2324_v54, 1 }
 0x5ef   :  { %v2326_v4 = vadd.f32 %v2325_v55, %v2324_v54  ;;  %v2483_v55 = vld [vmem:[%s6639_s9 + $0x10] sm:$0xff] }
 0x5f1   :  { %v2327_v58 = vmul.f32 0.004166667, %v2326_v4 }
 0x5f3   :  { %v6215_v60 = vsub.f32 %v6178_v15, %v2327_v58  ;;  %v6218_v61 = vsub.f32 %v6170_v49, %v2327_v58  ;;  %v6220_v63 = vsub.f32 %v2304_v7, %v2327_v58  ;;  %v6222_v14 = vsub.f32 %v2303_v12, %v2327_v58 }
 0x5f5   :  { %v2333_v17 = vmul.f32 %v6215_v60, %v6215_v60  ;;  %v2332_v35 = vmul.f32 %v6218_v61, %v6218_v61  ;;  %v2335_v15 = vmul.f32 %v6220_v63, %v6220_v63  ;;  %v2334_v49 = vmul.f32 %v6222_v14, %v6222_v14 }
 0x5f7   :  { %v2339_v22 = vsel %vm792_vm2, %v2333_v17, 0.0  ;;  %v2336_v0 = vsel %vm792_vm2, %v2332_v35, 0.0  ;;  %v2345_v27 = vsel %vm1432_vm8, %v2335_v15, 0.0  ;;  %v2342_v24 = vsel %vm792_vm2, %v2334_v49, 0.0 }
 0x5f8   :  { %2340 = vadd.xlane.f32.xlu0 %v2339_v22  ;;  %2337 = vadd.xlane.f32.xlu1 %v2336_v0 }
 0x5fc   :  { %2346 = vadd.xlane.f32.xlu0 %v2345_v27  ;;  %2343 = vadd.xlane.f32.xlu1 %v2342_v24 }
 0x666   :  { %v2246_v10 = vpop.xlane.xlu1 %2245  ;;  %v2249_v2 = vpop.xlane.xlu0 %2248 }
 0x667   :  { %v2256_v3 = vadd.f32 %v2249_v2, %v2246_v10 }
 0x66a   :  { %v2252_v11 = vpop.xlane.xlu1 %2251  ;;  %v2255_v12 = vpop.xlane.xlu0 %2254 }
 0x66b   :  { %v2257_v48 = vadd.f32 %v2256_v3, %v2252_v11  ;;  %v2258_v23 = vsel %vm1442_vm13, %v2255_v12, 0.0 }
 0x66d   :  { %v2259_v42 = vadd.f32 %v2258_v23, %v2257_v48 }
 0x66f   :  { %v2260_v7 = vrot.slane %v2259_v42, 4 }
 0x671   :  { %v2261_v25 = vadd.f32 %v2260_v7, %v2259_v42 }
 0x673   :  { %v2262_v28 = vrot.slane %v2261_v25, 2 }
 0x675   :  { %v2263_v29 = vadd.f32 %v2262_v28, %v2261_v25 }
 0x677   :  { %v2264_v36 = vrot.slane %v2263_v29, 1 }
 0x679   :  { %v2265_v34 = vadd.f32 %v2264_v36, %v2263_v29 }
 0x67b   :  { %v2266_v59 = vmul.f32 0.004166667, %v2265_v34 }
 0x67d   :  { %v2267_v1 = vadd.f32 1e-05, %v2266_v59 }
 0x67f   :  { %4693 = vrsqrt.f32 %v2267_v1 }
 0x685   :  { %v2338_v5 = vpop.xlane.xlu1 %2337  ;;  %v2341_v18 = vpop.xlane.xlu0 %2340 }
 0x686   :  { %v2348_v62 = vadd.f32 %v2341_v18, %v2338_v5 }
 0x689   :  { %v4694_v21 = vpop.eup %4693  ;;  %v2344_v33 = vpop.xlane.xlu1 %2343 }
 0x68a   :  { %v2347_v45 = vpop.xlane.xlu0 %2346  ;;  %v2270_v6 = vmul.f32 %v4694_v21, %v6190_v20  ;;  %v2271_v16 = vmul.f32 %v4694_v21, %v6199_v8  ;;  %v2269_v26 = vmul.f32 %v4694_v21, %v6193_v56  ;;  %v2272_v39 = vmul.f32 %v4694_v21, %v6196_v47  ;;  %v2481_v20 = vld [vmem:[%s6639_s9] sm:$0xff]  ;;  %v2482_v8 = vld [vmem:[%s6639_s9 + $0x8] sm:$0xff] }
 0x68b   :  { %v2349_v40 = vadd.f32 %v2348_v62, %v2344_v33  ;;  %v2350_v41 = vsel %vm1442_vm13, %v2347_v45, 0.0  ;;  %v4659_v46 = vpack.c.bf16 %v2482_v8, %v2481_v20 }
 0x68c   :  { %v2274_v57 = vmul.f32 %v2270_v6, %v6240_v19  ;;  %v2275_v56 = vmul.f32 %v2271_v16, %v6245_v13  ;;  %v2273_v47 = vmul.f32 %v2269_v26, %v2186_v30  ;;  %v2276_v43 = vmul.f32 %v2272_v39, %v6253_v31 }
 0x68d   :  { %v2351_v44 = vadd.f32 %v2350_v41, %v2349_v40  ;;  %4660 = vmatprep.subr.bf16.mxu1 %v4659_v46 }
 0x68e   :  { %v2278_v50 = vadd.f32 %v2274_v57, %v2191_v32  ;;  %v2279_v51 = vadd.f32 %v2275_v56, %v2192_v38  ;;  %v2277_v52 = vadd.f32 %v2273_v47, %v2190_v37  ;;  %v2280_v53 = vadd.f32 %v2276_v43, %v2193_v9  ;;  %4662 = vmatpush3.bf16.msra.mxu1 %v4659_v46 }
 0x68f   :  { %v2352_v54 = vrot.slane %v2351_v44, 4  ;;  %4534 = vmatprep.subr.mxu1 %v2483_v55 }
 0x690   :  { %2282 = vst.msk [vmem:[#allocation5 + $0x8] sm:$0xff] %vm792_vm2, %v2278_v50  ;;  %2283 = vst.msk [vmem:[#allocation5 + $0x10] sm:$0xff] %vm792_vm2, %v2279_v51 }
 0x691   :  { %2281 = vst.msk [vmem:[#allocation5] sm:$0xff] %vm792_vm2, %v2277_v52  ;;  %v2353_v4 = vadd.f32 %v2352_v54, %v2351_v44 }
 0x692   :  { %2284 = vst.msk [vmem:[#allocation5 + $0x18] sm:$0x3f] %vm1432_vm8, %v2280_v53  ;;  %4535 = vmatpush3.msra.mxu1 %v2483_v55 }
 0x693   :  { %v2354_v58 = vrot.slane %v2353_v4, 2 }
 0x695   :  { %v2355_v17 = vadd.f32 %v2354_v58, %v2353_v4 }
 0x697   :  { %v2356_v35 = vrot.slane %v2355_v17, 1  ;;  %v2386_v22 = vld [vmem:[#allocation5 + $0x9] sm:$0xff] }
 0x698   :  { %v2385_v0 = vld [vmem:[#allocation5 + $0x1] sm:$0xff]  ;;  %2411 = vrot.lane.b32.xlu0 %v2386_v22, %s4735_s5  ;;  %v2394_v3 = vld [vmem:[#allocation5 + $0xa] sm:$0xff] }
 0x699   :  { %2409 = vrot.lane.b32.xlu1 %v2385_v0, %s4735_s5  ;;  %v2357_v15 = vadd.f32 %v2356_v35, %v2355_v17  ;;  %v2387_v27 = vld [vmem:[#allocation5 + $0x11] sm:$0xff]  ;;  %v2393_v24 = vld [vmem:[#allocation5 + $0x2] sm:$0xff] }
 0x69a   :  { %v2395_v2 = vld [vmem:[#allocation5 + $0x12] sm:$0xff]  ;;  %v2377_v33 = vld [vmem:[#allocation5] sm:$0xff]  ;;  %v2378_v16 = vld [vmem:[#allocation5 + $0x8] sm:$0xff] }
 0x69b   :  { %v2358_v49 = vmul.f32 0.004166667, %v2357_v15 }
 0x69c   :  { %2413 = vrot.lane.b32.xlu0 %v2387_v27, %s4735_s5 }
 0x69d   :  { %2441 = vrot.lane.b32.xlu1 %v2393_v24, %s6631_s10  ;;  %v2359_v10 = vadd.f32 1e-05, %v2358_v49 }
 0x69f   :  { %4695 = vrsqrt.f32 %v2359_v10 }
 0x6a0   :  { %2445 = vrot.lane.b32.xlu0 %v2395_v2, %s6631_s10 }
 0x6a1   :  { %2443 = vrot.lane.b32.xlu1 %v2394_v3, %s6631_s10  ;;  %v4302_v3 = vld [vmem:[%s6640_s28] ss:$0 sm:$0xff] }
 0x6a9   :  { %v4696_v11 = vpop.eup %4695 }
 0x6aa   :  { %v2361_v12 = vmul.f32 %v4696_v11, %v6218_v61  ;;  %v2362_v48 = vmul.f32 %v4696_v11, %v6215_v60  ;;  %v2363_v23 = vmul.f32 %v4696_v11, %v6222_v14  ;;  %v2364_v42 = vmul.f32 %v4696_v11, %v6220_v63 }
 0x6ac   :  { %v2365_v7 = vmul.f32 %v2361_v12, %v2186_v30  ;;  %v2366_v25 = vmul.f32 %v2362_v48, %v6240_v19  ;;  %v2367_v28 = vmul.f32 %v2363_v23, %v6245_v13  ;;  %v2368_v29 = vmul.f32 %v2364_v42, %v6253_v31 }
 0x6ae   :  { %v2369_v36 = vadd.f32 %v2365_v7, %v2190_v37  ;;  %v2370_v34 = vadd.f32 %v2366_v25, %v2191_v32  ;;  %v2371_v59 = vadd.f32 %v2367_v28, %v2192_v38  ;;  %v2372_v1 = vadd.f32 %v2368_v29, %v2193_v9  ;;  %v2379_v37 = vld [vmem:[#allocation5 + $0x10] sm:$0xff] }
 0x6b0   :  { %2373 = vst.msk [vmem:[#allocation5 + $0x1e] sm:$0xff] %vm792_vm2, %v2369_v36  ;;  %2374 = vst.msk [vmem:[#allocation5 + $0x26] sm:$0xff] %vm792_vm2, %v2370_v34 }
 0x6b1   :  { %2375 = vst.msk [vmem:[#allocation5 + $0x2e] sm:$0xff] %vm792_vm2, %v2371_v59 }
 0x6b2   :  { %2376 = vst.msk [vmem:[#allocation5 + $0x36] sm:$0x3f] %vm1432_vm8, %v2372_v1 }
 0x6b7   :  { %v2389_v60 = vld [vmem:[#allocation5 + $0x21] sm:$0xff]  ;;  %v2388_v61 = vld [vmem:[#allocation5 + $0x19] sm:$0xff] }
 0x6b8   :  { %2417 = vrot.lane.b32.xlu0 %v2389_v60, %s4735_s5  ;;  %2415 = vrot.lane.b32.xlu1 %v2388_v61, %s4735_s5  ;;  %v2397_v63 = vld [vmem:[#allocation5 + $0x22] sm:$0xff]  ;;  %v2396_v14 = vld [vmem:[#allocation5 + $0x1a] sm:$0xff]  ;;  %v2398_v21 = vld [vmem:[#allocation5 + $0x2a] sm:$0xff] }
 0x6b9   :  { %v2391_v5 = vld [vmem:[#allocation5 + $0x31] sm:$0xff]  ;;  %v2390_v18 = vld [vmem:[#allocation5 + $0x29] sm:$0xff]  ;;  %v2392_v62 = vld [vmem:[#allocation5 + $0x39] sm:$0x3] }
 0x6ba   :  { %v2399_v19 = vld [vmem:[#allocation5 + $0x32] sm:$0xff]  ;;  %v2400_v13 = vld [vmem:[#allocation5 + $0x3a] sm:$0x3]  ;;  %v2381_v47 = vld [vmem:[#allocation5 + $0x20] sm:$0xff] }
 0x6bb   :  { %v2380_v56 = vld [vmem:[#allocation5 + $0x18] sm:$0xff]  ;;  %v2382_v55 = vld [vmem:[#allocation5 + $0x28] sm:$0xff]  ;;  %v2383_v4 = vld [vmem:[#allocation5 + $0x30] sm:$0xff] }
 0x6bc   :  { %2449 = vrot.lane.b32.xlu0 %v2397_v63, %s6631_s10  ;;  %2447 = vrot.lane.b32.xlu1 %v2396_v14, %s6631_s10  ;;  %v2384_v27 = vld [vmem:[#allocation5 + $0x38] sm:$0x3] }
 0x6c0   :  { %2421 = vrot.lane.b32.xlu0 %v2391_v5, %s4735_s5  ;;  %2419 = vrot.lane.b32.xlu1 %v2390_v18, %s4735_s5 }
 0x6c4   :  { %2453 = vrot.lane.b32.xlu0 %v2399_v19, %s6631_s10  ;;  %2451 = vrot.lane.b32.xlu1 %v2398_v21, %s6631_s10 }
 0x6c8   :  { %2423 = vrot.lane.b32.xlu1 %v2392_v62, %s4735_s5 }
 0x6cc   :  { %2455 = vrot.lane.b32.xlu1 %v2400_v13, %s6631_s10 }
 0x70a   :  { %v2412_v31 = vpop.permute.xlu0 %2411 }
 0x70b   :  { %v2410_v30 = vpop.permute.xlu1 %2409  ;;  %v2466_v26 = vsel %vm792_vm2, %v2378_v16, %v2412_v31 }
 0x70c   :  { %v2465_v45 = vsel %vm792_vm2, %v2377_v33, %v2410_v30 }
 0x70e   :  { %v2414_v38 = vpop.permute.xlu0 %2413 }
 0x70f   :  { %v2442_v32 = vpop.permute.xlu1 %2441  ;;  %v2467_v39 = vsel %vm792_vm2, %v2379_v37, %v2414_v38 }
 0x710   :  { %v2473_v6 = vsel %vm858_vm4, %v2465_v45, %v2442_v32 }
 0x711   :  { %4536 = vmatprep.mubr.msk.f32.mxu1 %vm1927_vm14, %v2473_v6 }
 0x712   :  { %v2446_v41 = vpop.permute.xlu0 %2445 }
 0x713   :  { %v2444_v40 = vpop.permute.xlu1 %2443  ;;  %v2475_v20 = vsel %vm858_vm4, %v2467_v39, %v2446_v41 }
 0x714   :  { %v2474_v9 = vsel %vm858_vm4, %v2466_v26, %v2444_v40 }
 0x715   :  { %4537 = vmatmul.mubr.msk.f32.vlgmr.msra.gmra.mrb[16].mxu1 %vm1927_vm14, %v2474_v9 }
 0x716   :  { %4539 = vmatprep.mubr.msk.f32.mxu1 %vm1927_vm14, %v2475_v20 }
 0x72a   :  { %v2416_v8 = vpop.permute.xlu1 %2415  ;;  %v2418_v57 = vpop.permute.xlu0 %2417 }
 0x72b   :  { %v2468_v43 = vsel %vm792_vm2, %v2380_v56, %v2416_v8  ;;  %v2469_v44 = vsel %vm792_vm2, %v2381_v47, %v2418_v57 }
 0x72e   :  { %v2448_v46 = vpop.permute.xlu1 %2447  ;;  %v2450_v50 = vpop.permute.xlu0 %2449 }
 0x72f   :  { %v2476_v51 = vsel %vm858_vm4, %v2468_v43, %v2448_v46  ;;  %v2477_v52 = vsel %vm858_vm4, %v2469_v44, %v2450_v50 }
 0x730   :  { %4540 = vmatmul.mubr.msk.f32.gmra.mrb[18].mxu1 %vm1927_vm14, %v2476_v51 }
 0x731   :  { %4542 = vmatprep.mubr.msk.f32.mxu1 %vm1927_vm14, %v2477_v52 }
 0x732   :  { %v2420_v53 = vpop.permute.xlu1 %2419  ;;  %v2422_v54 = vpop.permute.xlu0 %2421 }
 0x733   :  { %v2470_v58 = vsel %vm792_vm2, %v2382_v55, %v2420_v53  ;;  %v2471_v17 = vsel %vm792_vm2, %v2383_v4, %v2422_v54 }
 0x736   :  { %v2452_v35 = vpop.permute.xlu1 %2451  ;;  %v2454_v22 = vpop.permute.xlu0 %2453 }
 0x737   :  { %v2478_v0 = vsel %vm858_vm4, %v2470_v58, %v2452_v35  ;;  %v2479_v15 = vsel %vm858_vm4, %v2471_v17, %v2454_v22 }
 0x738   :  { %4543 = vmatmul.mubr.msk.f32.gmra.mrb[20].mxu1 %vm1927_vm14, %v2478_v0 }
 0x739   :  { %4545 = vmatprep.mubr.msk.f32.mxu1 %vm1927_vm14, %v2479_v15 }
 0x73a   :  { %v2424_v49 = vpop.permute.xlu1 %2423 }
 0x73b   :  { %v2472_v24 = vsel %vm792_vm2, %v2384_v27, %v2424_v49 }
 0x73e   :  { %v2456_v10 = vpop.permute.xlu1 %2455 }
 0x73f   :  { %v2480_v2 = vsel %vm858_vm4, %v2472_v24, %v2456_v10 }
 0x740   :  { %4546 = vmatmul.mubr.msk.f32.gmra.mrb[22].mxu1 %vm1927_vm14, %v2480_v2 }
 0x7e8   :  { %v4538_v11 = vpop.f32.mrb[16].mxu1 }
 0x7e9   :  { %v2587_v12 = vadd.f32 %v4538_v11, %v4302_v3  ;;  %v2581_v48 = vpop.f32.mrb[17].mxu1 }
 0x7ea   :  { %v2582_v23 = vadd.f32 %v4302_v3, %v2581_v48 }
 0x7eb   :  { %vm2621_vm7 = vcmp.gt.f32.partialorder %v2587_v12, 0.0  ;;  %v2629_v42 = vmul.f32 0.01, %v2587_v12 }
 0x7ec   :  { %vm2620_vm9 = vcmp.gt.f32.partialorder %v2582_v23, 0.0  ;;  %v2628_v7 = vmul.f32 0.01, %v2582_v23 }
 0x7ed   :  { %v2637_v25 = vsel %vm2621_vm7, %v2587_v12, %v2629_v42 }
 0x7ee   :  { %2645 = vst.msk [vmem:[#allocation6 + $0x8] sm:$0xff] %vm792_vm2, %v2637_v25  ;;  %v2636_v28 = vsel %vm2620_vm9, %v2582_v23, %v2628_v7 }
 0x7ef   :  { %2644 = vst.msk [vmem:[#allocation6] sm:$0xff] %vm792_vm2, %v2636_v28 }
 0x7f6   :  { %v2656_v30 = vld [vmem:[#allocation6] ss:$2 sm:$0xff]  ;;  %v2660_v31 = vld [vmem:[#allocation6 + $0x1] ss:$2 sm:$0xff] }
 0x7f7   :  { %v2663_v39 = vmax.f32 %v2656_v30, %v2660_v31 }
 0x7f9   :  { %v2665_v8 = vsel %vm792_vm2, %v2663_v39, 0.0 }
 0x803   :  { %v4541_v29 = vpop.f32.mrb[18].mxu1 }
 0x804   :  { %v2597_v36 = vadd.f32 %v4541_v29, %v4302_v3  ;;  %v2591_v34 = vpop.f32.mrb[19].mxu1 }
 0x805   :  { %v2592_v59 = vadd.f32 %v4302_v3, %v2591_v34 }
 0x806   :  { %vm2623_vm4 = vcmp.gt.f32.partialorder %v2597_v36, 0.0  ;;  %v2631_v1 = vmul.f32 0.01, %v2597_v36 }
 0x807   :  { %vm2622_vm14 = vcmp.gt.f32.partialorder %v2592_v59, 0.0  ;;  %v2630_v60 = vmul.f32 0.01, %v2592_v59 }
 0x808   :  { %v2639_v61 = vsel %vm2623_vm4, %v2597_v36, %v2631_v1 }
 0x809   :  { %2647 = vst.msk [vmem:[#allocation6 + $0x18] sm:$0xff] %vm792_vm2, %v2639_v61  ;;  %v2638_v63 = vsel %vm2622_vm14, %v2592_v59, %v2630_v60 }
 0x80a   :  { %2646 = vst.msk [vmem:[#allocation6 + $0x10] sm:$0xff] %vm792_vm2, %v2638_v63 }
 0x80b   :  { %v4544_v14 = vpop.f32.mrb[20].mxu1 }
 0x80c   :  { %v2607_v5 = vadd.f32 %v4544_v14, %v4302_v3  ;;  %v2601_v18 = vpop.f32.mrb[21].mxu1 }
 0x80d   :  { %v2602_v19 = vadd.f32 %v4302_v3, %v2601_v18  ;;  %v3224_v18 = vld [vmem:[%s6591_s13 + $0x30] sm:$0xff] }
 0x80e   :  { %vm2625_vm10 = vcmp.gt.f32.partialorder %v2607_v5, 0.0  ;;  %v2633_v21 = vmul.f32 0.01, %v2607_v5 }
 0x80f   :  { %vm2624_vm11 = vcmp.gt.f32.partialorder %v2602_v19, 0.0  ;;  %v2632_v62 = vmul.f32 0.01, %v2602_v19 }
 0x810   :  { %v2641_v13 = vsel %vm2625_vm10, %v2607_v5, %v2633_v21  ;;  %v4739_v21 = vmov 0.0  }
 0x811   :  { %2649 = vst.msk [vmem:[#allocation6 + $0x28] sm:$0xff] %vm792_vm2, %v2641_v13  ;;  %v2640_v33 = vsel %vm2624_vm11, %v2602_v19, %v2632_v62  ;;  %v2658_v45 = vld [vmem:[#allocation6 + $0x10] ss:$2 sm:$0x3f]  ;;  %v2767_v19 = vld [vmem:[%s6591_s13 + $0x8] sm:$0xff]  ;;  %4578 = vmatprep.subr.mxu0 %v4739_v21  ;;  %4548 = vmatprep.subr.mxu1 %v4739_v21 }
 0x812   :  { %v2662_v32 = vld [vmem:[#allocation6 + $0x11] ss:$2 sm:$0x3f]  ;;  %2648 = vst.msk [vmem:[#allocation6 + $0x20] sm:$0xff] %vm792_vm2, %v2640_v33  ;;  %4579 = vmatpush3.msra.mxu0 %v3224_v18  ;;  %4549 = vmatpush3.msra.mxu1 %v2767_v19  ;;  %v3455_v18 = vld [vmem:[%s6591_s13 + $0x48] sm:$0xff] }
 0x813   :  { %v2664_v38 = vmax.f32 %v2658_v45, %v2662_v32  ;;  %v4547_v6 = vpop.f32.mrb[22].mxu1  ;;  %4550 = vmatprep.mubr.msk.f32.mxu1 %vm4740_vm0, %v4739_v21  ;;  %4553 = vmatprep.subr.mxu1 %v4739_v21 }
 0x814   :  { %v2617_v16 = vadd.f32 %v4547_v6, %v4302_v3  ;;  %v2611_v37 = vpop.f32.mrb[23].mxu1  ;;  %4580 = vmatprep.mubr.msk.f32.mxu0 %vm4740_vm0, %v4739_v21  ;;  %4588 = vmatprep.subr.mxu0 %v4739_v21 }
 0x815   :  { %v2668_v26 = vsel %vm1432_vm8, %v2664_v38, 0.0  ;;  %v2612_v40 = vadd.f32 %v4302_v3, %v2611_v37 }
 0x816   :  { %2669 = vadd.xlane.f32.xlu0 %v2668_v26  ;;  %vm2627_vm12 = vcmp.gt.f32.partialorder %v2617_v16, 0.0  ;;  %v2635_v41 = vmul.f32 0.01, %v2617_v16 }
 0x817   :  { %vm2626_vm15 = vcmp.gt.f32.partialorder %v2612_v40, 0.0  ;;  %v2634_v9 = vmul.f32 0.01, %v2612_v40 }
 0x818   :  { %v2643_v20 = vsel %vm2627_vm12, %v2617_v16, %v2635_v41 }
 0x819   :  { %2651 = vst.msk [vmem:[#allocation6 + $0x38] sm:$0x3] %vm2184_vm5, %v2643_v20  ;;  %v2642_v57 = vsel %vm2626_vm15, %v2612_v40, %v2634_v9  ;;  %v2710_v56 = vld [vmem:[#allocation6 + $0x1e] ss:$2 sm:$0xff]  ;;  %v2714_v47 = vld [vmem:[#allocation6 + $0x1f] ss:$2 sm:$0xff] }
 0x81a   :  { %2666 = vadd.xlane.f32.xlu0 %v2665_v8  ;;  %2650 = vst.msk [vmem:[#allocation6 + $0x30] sm:$0xff] %vm792_vm2, %v2642_v57  ;;  %v2717_v43 = vmax.f32 %v2710_v56, %v2714_v47 }
 0x81c   :  { %v2719_v44 = vsel %vm792_vm2, %v2717_v43, 0.0 }
 0x81e   :  { %2720 = vadd.xlane.f32.xlu0 %v2719_v44 }
 0x821   :  { %v2712_v46 = vld [vmem:[#allocation6 + $0x2e] ss:$2 sm:$0x3f]  ;;  %v2716_v50 = vld [vmem:[#allocation6 + $0x2f] ss:$2 sm:$0x3f] }
 0x822   :  { %v2718_v51 = vmax.f32 %v2712_v46, %v2716_v50  ;;  %v2652_v50 = vld [vmem:[%s6641_s2] sm:$0xff] }
 0x824   :  { %v2722_v52 = vsel %vm1432_vm8, %v2718_v51, 0.0 }
 0x825   :  { %2723 = vadd.xlane.f32.xlu1 %v2722_v52 }
 0x8a3   :  { %v2670_v53 = vpop.xlane.xlu0 %2669 }
 0x8a4   :  { %v2671_v54 = vsel %vm1442_vm13, %v2670_v53, 0.0 }
 0x8a7   :  { %v2667_v55 = vpop.xlane.xlu0 %2666 }
 0x8a8   :  { %v2672_v4 = vadd.f32 %v2671_v54, %v2667_v55  ;;  %v2654_v55 = vld [vmem:[%s6590_s12] sm:$0xff] }
 0x8aa   :  { %v2673_v58 = vrot.slane %v2672_v4, 4 }
 0x8ab   :  { %v2721_v27 = vpop.xlane.xlu0 %2720 }
 0x8ac   :  { %v2674_v17 = vadd.f32 %v2673_v58, %v2672_v4  ;;  %v2655_v4 = vld [vmem:[%s6590_s12 + $0x8] sm:$0x3f] }
 0x8ae   :  { %v2675_v35 = vrot.slane %v2674_v17, 2 }
 0x8b0   :  { %v2676_v22 = vadd.f32 %v2675_v35, %v2674_v17 }
 0x8b2   :  { %v2677_v0 = vrot.slane %v2676_v22, 1  ;;  %v2724_v15 = vpop.xlane.xlu1 %2723 }
 0x8b3   :  { %v2725_v24 = vsel %vm1442_vm13, %v2724_v15, 0.0 }
 0x8b4   :  { %v2678_v49 = vadd.f32 %v2677_v0, %v2676_v22  ;;  %v2726_v10 = vadd.f32 %v2725_v24, %v2721_v27 }
 0x8b6   :  { %v2679_v2 = vmul.f32 0.008928572, %v2678_v49  ;;  %v2727_v3 = vrot.slane %v2726_v10, 4 }
 0x8b8   :  { %v2681_v11 = vsub.f32 %v2664_v38, %v2679_v2  ;;  %v2680_v12 = vsub.f32 %v2663_v39, %v2679_v2  ;;  %v2728_v48 = vadd.f32 %v2727_v3, %v2726_v10  ;;  %v2764_v3 = vld [vmem:[%s6591_s13] sm:$0xff] }
 0x8ba   :  { %v2683_v23 = vmul.f32 %v2681_v11, %v2681_v11  ;;  %v2729_v42 = vrot.slane %v2728_v48, 2  ;;  %v2682_v25 = vmul.f32 %v2680_v12, %v2680_v12 }
 0x8bc   :  { %v2687_v7 = vsel %vm1432_vm8, %v2683_v23, 0.0  ;;  %v2730_v28 = vadd.f32 %v2729_v42, %v2728_v48  ;;  %v2684_v36 = vsel %vm792_vm2, %v2682_v25, 0.0  ;;  %v2916_v23 = vld [vmem:[%s6591_s13 + $0x10] sm:$0xff] }
 0x8bd   :  { %2688 = vadd.xlane.f32.xlu1 %v2687_v7  ;;  %v3532_v42 = vld [vmem:[%s6591_s13 + $0x50] sm:$0xff] }
 0x8be   :  { %v2731_v29 = vrot.slane %v2730_v28, 1 }
 0x8c0   :  { %v2732_v34 = vadd.f32 %v2731_v29, %v2730_v28  ;;  %v2993_v28 = vld [vmem:[%s6591_s13 + $0x18] sm:$0xff]  ;;  %v3686_v29 = vld [vmem:[%s6591_s13 + $0x60] sm:$0xff] }
 0x8c1   :  { %2685 = vadd.xlane.f32.xlu1 %v2684_v36 }
 0x8c2   :  { %v2733_v59 = vmul.f32 0.008928572, %v2732_v34 }
 0x8c4   :  { %v2735_v1 = vsub.f32 %v2718_v51, %v2733_v59  ;;  %v2734_v60 = vsub.f32 %v2717_v43, %v2733_v59  ;;  %v2653_v51 = vld [vmem:[%s6641_s2 + $0x8] sm:$0x3f]  ;;  %v3070_v59 = vld [vmem:[%s6591_s13 + $0x20] sm:$0xff] }
 0x8c6   :  { %v2737_v61 = vmul.f32 %v2735_v1, %v2735_v1  ;;  %v2736_v14 = vmul.f32 %v2734_v60, %v2734_v60 }
 0x8c8   :  { %v2741_v63 = vsel %vm1432_vm8, %v2737_v61, 0.0  ;;  %v2738_v5 = vsel %vm792_vm2, %v2736_v14, 0.0  ;;  %v3147_v61 = vld [vmem:[%s6591_s13 + $0x28] sm:$0xff]  ;;  %v3301_v14 = vld [vmem:[%s6591_s13 + $0x38] sm:$0xff] }
 0x8c9   :  { %2742 = vadd.xlane.f32.xlu0 %v2741_v63 }
 0x8cd   :  { %2739 = vadd.xlane.f32.xlu0 %v2738_v5 }
 0x94a   :  { %v2689_v62 = vpop.xlane.xlu1 %2688 }
 0x94b   :  { %v2690_v13 = vsel %vm1442_vm13, %v2689_v62, 0.0  ;;  %v3609_v62 = vld [vmem:[%s6591_s13 + $0x58] sm:$0xff] }
 0x94e   :  { %v2686_v30 = vpop.xlane.xlu1 %2685 }
 0x94f   :  { %v2691_v31 = vadd.f32 %v2690_v13, %v2686_v30  ;;  %v3763_v30 = vld [vmem:[%s6591_s13 + $0x68] sm:$0xff] }
 0x951   :  { %v2692_v33 = vrot.slane %v2691_v31, 4 }
 0x953   :  { %v2693_v45 = vadd.f32 %v2692_v33, %v2691_v31 }
 0x955   :  { %v2694_v32 = vrot.slane %v2693_v45, 2 }
 0x956   :  { %v2743_v6 = vpop.xlane.xlu0 %2742 }
 0x957   :  { %v2695_v38 = vadd.f32 %v2694_v32, %v2693_v45  ;;  %v2744_v26 = vsel %vm1442_vm13, %v2743_v6, 0.0  ;;  %v3888_v45 = vld [vmem:[%s6595_s17] sm:$0xff]  ;;  %v3889_v32 = vld [vmem:[%s6595_s17 + $0x8] sm:$0xff]  ;;  %v4741_v6 = vmov 0.0|0.0   ;;  %vm3899_vm13 = vcmask 261120  }
 0x959   :  { %v2696_v16 = vrot.slane %v2695_v38, 1 }
 0x95a   :  { %v2740_v39 = vpop.xlane.xlu0 %2739 }
 0x95b   :  { %v2697_v37 = vadd.f32 %v2696_v16, %v2695_v38  ;;  %v2745_v40 = vadd.f32 %v2744_v26, %v2740_v39  ;;  %v3890_v38 = vld [vmem:[%s6595_s17 + $0x10] sm:$0xff]  ;;  %v4664_v16 = vpack.c.bf16 %v3889_v32, %v3888_v45 }
 0x95d   :  { %v2698_v41 = vmul.f32 0.008928572, %v2697_v37  ;;  %v2746_v9 = vrot.slane %v2745_v40, 4  ;;  %v3891_v37 = vld [vmem:[%s6595_s17 + $0x18] sm:$0xff] }
 0x95e   :  { %v4667_v26 = vpack.c.bf16 %v3891_v37, %v3890_v38 }
 0x95f   :  { %v2699_v20 = vadd.f32 1e-05, %v2698_v41  ;;  %v2747_v8 = vadd.f32 %v2746_v9, %v2745_v40 }
 0x961   :  { %4697 = vrsqrt.f32 %v2699_v20  ;;  %v2748_v57 = vrot.slane %v2747_v8, 2 }
 0x963   :  { %v2749_v56 = vadd.f32 %v2748_v57, %v2747_v8 }
 0x965   :  { %v2750_v47 = vrot.slane %v2749_v56, 1 }
 0x967   :  { %v2751_v43 = vadd.f32 %v2750_v47, %v2749_v56 }
 0x969   :  { %v2752_v44 = vmul.f32 0.008928572, %v2751_v43 }
 0x96b   :  { %v4698_v46 = vpop.eup %4697  ;;  %v2753_v54 = vadd.f32 1e-05, %v2752_v44 }
 0x96c   :  { %v2701_v52 = vmul.f32 %v4698_v46, %v2680_v12  ;;  %v2702_v53 = vmul.f32 %v4698_v46, %v2681_v11  ;;  %v3378_v11 = vld [vmem:[%s6591_s13 + $0x40] sm:$0xff] }
 0x96d   :  { %4699 = vrsqrt.f32 %v2753_v54 }
 0x96e   :  { %v2703_v58 = vmul.f32 %v2701_v52, %v2652_v50  ;;  %v2704_v17 = vmul.f32 %v2702_v53, %v2653_v51 }
 0x970   :  { %v2705_v35 = vadd.f32 %v2703_v58, %v2654_v55  ;;  %v2706_v22 = vadd.f32 %v2704_v17, %v2655_v4 }
 0x972   :  { %2707 = vst.msk [vmem:[#allocation7] sm:$0xff] %vm792_vm2, %v2705_v35 }
 0x973   :  { %2708 = vst.msk [vmem:[#allocation7 + $0x8] sm:$0x3f] %vm1432_vm8, %v2706_v22 }
 0x977   :  { %v4700_v0 = vpop.eup %4699 }
 0x978   :  { %v2755_v15 = vmul.f32 %v4700_v0, %v2734_v60  ;;  %v2756_v49 = vmul.f32 %v4700_v0, %v2735_v1 }
 0x97a   :  { %v2757_v27 = vmul.f32 %v2755_v15, %v2652_v50  ;;  %v2758_v24 = vmul.f32 %v2756_v49, %v2653_v51 }
 0x97c   :  { %v2759_v10 = vadd.f32 %v2757_v27, %v2654_v55  ;;  %v2760_v2 = vadd.f32 %v2758_v24, %v2655_v4 }
 0x97e   :  { %2761 = vst.msk [vmem:[#allocation7 + $0xe] sm:$0xff] %vm792_vm2, %v2759_v10 }
 0x97f   :  { %2762 = vst.msk [vmem:[#allocation7 + $0x16] sm:$0x3f] %vm1432_vm8, %v2760_v2 }
 0x985   :  { %v2766_v12 = vld [vmem:[#allocation7 + $0x1] ss:$14 sm:$0x3]  ;;  %v3223_v48 = vld [vmem:[#allocation7 + $0x6] ss:$14 sm:$0x3] }
 0x986   :  { %4551 = vmatmul.mubr.msk.f32.vlgmr.msra.gmra.mrb[24].mxu1 %vm792_vm2, %v2766_v12  ;;  %4581 = vmatmul.mubr.msk.f32.vlgmr.msra.gmra.mrb[32].mxu0 %vm792_vm2, %v3223_v48  ;;  %v2763_v7 = vld [vmem:[#allocation7] ss:$14 sm:$0x3]  ;;  %v3377_v25 = vld [vmem:[#allocation7 + $0x8] ss:$14 sm:$0x3] }
 0x987   :  { %4554 = vmatpush3.msra.mxu1 %v2764_v3  ;;  %4555 = vmatprep.mubr.msk.f32.mxu1 %vm4740_vm0, %v4739_v21  ;;  %v2915_v36 = vld [vmem:[#allocation7 + $0x2] ss:$14 sm:$0x3]  ;;  %v3531_v34 = vld [vmem:[#allocation7 + $0xa] ss:$14 sm:$0x3] }
 0x988   :  { %4558 = vmatprep.subr.mxu1 %v4739_v21  ;;  %4589 = vmatpush3.msra.mxu0 %v3378_v11  ;;  %v2992_v1 = vld [vmem:[#allocation7 + $0x3] ss:$14 sm:$0x3]  ;;  %v3685_v60 = vld [vmem:[#allocation7 + $0xc] ss:$14 sm:$0x3] }
 0x989   :  { %4590 = vmatprep.mubr.msk.f32.mxu0 %vm4740_vm0, %v4739_v21  ;;  %4598 = vmatprep.subr.mxu0 %v4739_v21  ;;  %v3069_v63 = vld [vmem:[#allocation7 + $0x4] ss:$14 sm:$0x3]  ;;  %v3146_v5 = vld [vmem:[#allocation7 + $0x5] ss:$14 sm:$0x3] }
 0x98a   :  { %4556 = vmatmul.mubr.msk.f32.vlgmr.msra.gmra.mrb[26].mxu1 %vm792_vm2, %v2763_v7  ;;  %4591 = vmatmul.mubr.msk.f32.vlgmr.msra.gmra.mrb[34].mxu0 %vm792_vm2, %v3377_v25  ;;  %v3300_v19 = vld [vmem:[#allocation7 + $0x7] ss:$14 sm:$0x3]  ;;  %v3454_v13 = vld [vmem:[#allocation7 + $0x9] ss:$14 sm:$0x3] }
 0x98b   :  { %4559 = vmatpush3.msra.mxu1 %v2916_v23  ;;  %4560 = vmatprep.mubr.msk.f32.mxu1 %vm4740_vm0, %v4739_v21  ;;  %v3608_v31 = vld [vmem:[#allocation7 + $0xb] ss:$14 sm:$0x3]  ;;  %v3762_v33 = vld [vmem:[#allocation7 + $0xd] ss:$14 sm:$0x3] }
 0x98c   :  { %4563 = vmatprep.subr.mxu1 %v4739_v21  ;;  %4599 = vmatpush3.msra.mxu0 %v3532_v42 }
 0x98d   :  { %4600 = vmatprep.mubr.msk.f32.mxu0 %vm4740_vm0, %v4739_v21  ;;  %4608 = vmatprep.subr.mxu0 %v4739_v21 }
 0x98e   :  { %4561 = vmatmul.mubr.msk.f32.vlgmr.msra.gmra.mrb[28].mxu1 %vm792_vm2, %v2915_v36  ;;  %4601 = vmatmul.mubr.msk.f32.vlgmr.msra.gmra.mrb[36].mxu0 %vm792_vm2, %v3531_v34 }
 0x98f   :  { %4564 = vmatpush3.msra.mxu1 %v2993_v28  ;;  %4565 = vmatprep.mubr.msk.f32.mxu1 %vm4740_vm0, %v4739_v21 }
 0x990   :  { %4568 = vmatprep.subr.mxu1 %v4739_v21  ;;  %4609 = vmatpush3.msra.mxu0 %v3686_v29  ;;  %v4325_v29 = vld [vmem:[%s6592_s14] ss:$0 sm:$0xff] }
 0x991   :  { %4610 = vmatprep.mubr.msk.f32.mxu0 %vm4740_vm0, %v4739_v21  ;;  %4663 = vmatprep.subr.bf16.mxu0 %v4741_v6 }
 0x992   :  { %4566 = vmatmul.mubr.msk.f32.vlgmr.msra.gmra.mrb[30].mxu1 %vm792_vm2, %v2992_v1  ;;  %4611 = vmatmul.mubr.msk.f32.vlgmr.msra.gmra.mrb[38].mxu0 %vm792_vm2, %v3685_v60 }
 0x993   :  { %4569 = vmatpush3.msra.mxu1 %v3070_v59  ;;  %4570 = vmatprep.mubr.msk.f32.mxu1 %vm4740_vm0, %v4739_v21 }
 0x994   :  { %4573 = vmatprep.subr.mxu1 %v4739_v21  ;;  %4626 = vmatprep.mubr.msk.f32.mxu0 %vm4740_vm0, %v4739_v21 }
 0x995   :  { %4665 = vmatpush3.bf16.msra.mxu0 %v4664_v16 }
 0x996   :  { %4571 = vmatmul.mubr.msk.f32.vlgmr.msra.gmra.mrb[32].mxu1 %vm792_vm2, %v3069_v63  ;;  %4666 = vmatprep.subr.bf16.mxu0 %v4741_v6 }
 0x997   :  { %4574 = vmatpush3.msra.mxu1 %v3147_v61  ;;  %4575 = vmatprep.mubr.msk.f32.mxu1 %vm4740_vm0, %v4739_v21 }
 0x998   :  { %4583 = vmatprep.subr.mxu1 %v4739_v21 }
 0x999   :  { %4668 = vmatpush3.bf16.msra.mxu0 %v4667_v26 }
 0x99a   :  { %4576 = vmatmul.mubr.msk.f32.vlgmr.msra.gmra.mrb[34].mxu1 %vm792_vm2, %v3146_v5  ;;  %4675 = vmatprep.subr.bf16.mxu0 %v4741_v6 }
 0x99b   :  { %4584 = vmatpush3.msra.mxu1 %v3301_v14  ;;  %4585 = vmatprep.mubr.msk.f32.mxu1 %vm4740_vm0, %v4739_v21 }
 0x99c   :  { %4593 = vmatprep.subr.mxu1 %v4739_v21 }
 0x99e   :  { %4586 = vmatmul.mubr.msk.f32.vlgmr.msra.gmra.mrb[36].mxu1 %vm792_vm2, %v3300_v19 }
 0x99f   :  { %4594 = vmatpush3.msra.mxu1 %v3455_v18  ;;  %4595 = vmatprep.mubr.msk.f32.mxu1 %vm4740_vm0, %v4739_v21 }
 0x9a0   :  { %4603 = vmatprep.subr.mxu1 %v4739_v21 }
 0x9a2   :  { %4596 = vmatmul.mubr.msk.f32.vlgmr.msra.gmra.mrb[38].mxu1 %vm792_vm2, %v3454_v13 }
 0x9a3   :  { %4604 = vmatpush3.msra.mxu1 %v3609_v62  ;;  %4605 = vmatprep.mubr.msk.f32.mxu1 %vm4740_vm0, %v4739_v21 }
 0x9a4   :  { %4613 = vmatprep.subr.mxu1 %v4739_v21 }
 0x9a6   :  { %4606 = vmatmul.mubr.msk.f32.vlgmr.msra.gmra.mrb[40].mxu1 %vm792_vm2, %v3608_v31 }
 0x9a7   :  { %4614 = vmatpush3.msra.mxu1 %v3763_v30  ;;  %4615 = vmatprep.mubr.msk.f32.mxu1 %vm4740_vm0, %v4739_v21 }
 0x9a8   :  { %4669 = vmatprep.subr.bf16.mxu1 %v4741_v6 }
 0x9aa   :  { %4616 = vmatmul.mubr.msk.f32.vlgmr.msra.gmra.mrb[42].mxu1 %vm792_vm2, %v3762_v33  ;;  %vm3848_vm2 = vcmask 254976  }
 0x9ab   :  { %4637 = vmatprep.mubr.msk.f32.mxu1 %vm4740_vm0, %v4739_v21 }
 0xa59   :  { %v2837_v39 = vpop.f32.mrb[24].mxu1  ;;  %v3294_v40 = vpop.f32.mrb[32].mxu0 }
 0xa5a   :  { %v4552_v41 = vpop.f32.mrb[25].mxu1  ;;  %v4582_v9 = vpop.f32.mrb[33].mxu0 }
 0xa5b   :  { %v4327_v9 = vld [vmem:[%s6594_s16] ss:$0 sm:$0xff] }
 0xa5d   :  { %v2910_v20 = vpop.f32.mrb[26].mxu1  ;;  %v3448_v8 = vpop.f32.mrb[34].mxu0 }
 0xa5e   :  { %v2911_v57 = vadd.f32 %v2910_v20, %v2837_v39  ;;  %v4557_v56 = vpop.f32.mrb[27].mxu1  ;;  %v4592_v47 = vpop.f32.mrb[35].mxu0 }
 0xa5f   :  { %v4013_v47 = vld [vmem:[%s6599_s21] sm:$0xff] }
 0xa61   :  { %v2986_v43 = vpop.f32.mrb[28].mxu1  ;;  %v3602_v44 = vpop.f32.mrb[36].mxu0 }
 0xa62   :  { %v2990_v46 = vadd.f32 %v2986_v43, %v2911_v57  ;;  %v4562_v50 = vpop.f32.mrb[29].mxu1  ;;  %v4602_v51 = vpop.f32.mrb[37].mxu0  ;;  %v4014_v43 = vld [vmem:[%s6599_s21 + $0x8] sm:$0xff] }
 0xa63   :  { %v4016_v50 = vld [vmem:[%s6599_s21 + $0x18] sm:$0xff] }
 0xa65   :  { %v3063_v52 = vpop.f32.mrb[30].mxu1  ;;  %v3756_v53 = vpop.f32.mrb[38].mxu0 }
 0xa66   :  { %v3067_v54 = vadd.f32 %v3063_v52, %v2990_v46  ;;  %v4567_v55 = vpop.f32.mrb[31].mxu1  ;;  %v4612_v4 = vpop.f32.mrb[39].mxu0  ;;  %v4670_v46 = vpack.c.bf16 %v4014_v43, %v4013_v47 }
 0xa68   :  { %4671 = vmatpush3.bf16.msra.mxu1 %v4670_v46  ;;  %v4334_v46 = vld [vmem:[%s6601_s23] ss:$0 sm:$0xff]  ;;  %s4742_s23 = smov [#allocation8]  }
 0xa69   :  { %v3140_v58 = vpop.f32.mrb[32].mxu1  ;;  %4672 = vmatprep.subr.bf16.mxu1 %v4741_v6 }
 0xa6a   :  { %v3144_v17 = vadd.f32 %v3140_v58, %v3067_v54  ;;  %v4572_v35 = vpop.f32.mrb[33].mxu1 }
 0xa6d   :  { %v3217_v22 = vpop.f32.mrb[34].mxu1 }
 0xa6e   :  { %v3221_v0 = vadd.f32 %v3217_v22, %v3144_v17  ;;  %v4577_v15 = vpop.f32.mrb[35].mxu1 }
 0xa70   :  { %v3298_v49 = vadd.f32 %v3294_v40, %v3221_v0  ;;  %v4326_v40 = vld [vmem:[%s6593_s15] ss:$0 sm:$0xff] }
 0xa71   :  { %v3371_v27 = vpop.f32.mrb[36].mxu1 }
 0xa72   :  { %v3375_v24 = vadd.f32 %v3371_v27, %v3298_v49  ;;  %v4587_v10 = vpop.f32.mrb[37].mxu1 }
 0xa74   :  { %v3452_v2 = vadd.f32 %v3448_v8, %v3375_v24 }
 0xa75   :  { %v3525_v3 = vpop.f32.mrb[38].mxu1 }
 0xa76   :  { %v3529_v11 = vadd.f32 %v3525_v3, %v3452_v2  ;;  %v4597_v12 = vpop.f32.mrb[39].mxu1 }
 0xa78   :  { %v3606_v48 = vadd.f32 %v3602_v44, %v3529_v11  ;;  %v4015_v44 = vld [vmem:[%s6599_s21 + $0x10] sm:$0xff] }
 0xa79   :  { %v3679_v23 = vpop.f32.mrb[40].mxu1  ;;  %v4673_v51 = vpack.c.bf16 %v4016_v50, %v4015_v44 }
 0xa7a   :  { %v3683_v42 = vadd.f32 %v3679_v23, %v3606_v48  ;;  %v4607_v7 = vpop.f32.mrb[41].mxu1 }
 0xa7b   :  { %4674 = vmatpush3.bf16.msra.mxu1 %v4673_v51  ;;  %v4335_v51 = vld [vmem:[%s6602_s24] ss:$0 sm:$0xff]  ;;  %s4243_s24 = sshll.u32 %s4742_s23, 4  ;;  %s4244_s24 = int_to_ptr.vmem [resolvable:$true] %s4243_s24 }
 0xa7c   :  { %v3760_v25 = vadd.f32 %v3756_v53, %v3683_v42  ;;  %p4716_p1 = scmp.lt.s32.totalorder %s4244_s24, %s4244_s24 }
 0xa7d   :  { %v3833_v28 = vpop.f32.mrb[42].mxu1 }
 0xa7e   :  { %v3837_v36 = vadd.f32 %v3833_v28, %v3760_v25  ;;  %v4617_v34 = vpop.f32.mrb[43].mxu1  ;;  %v4330_v25 = vld [vmem:[%s6597_s19] ss:$0 sm:$0xff] }
 0xa80   :  { %v3845_v59 = vadd.f32 %v4325_v29, %v3837_v36  ;;  %v4331_v29 = vld [vmem:[%s6598_s20] ss:$0 sm:$0xff] }
 0xa82   :  { %v3849_v1 = vsel %vm3848_vm2, %v3845_v59, 0.0 }
 0xa83   :  { %v3850_v60 = vrot.slane %v3849_v1, 4 }
 0xa85   :  { %v3851_v61 = vadd.f32 %v3850_v60, %v3849_v1  ;;  %v4137_v60 = vld [vmem:[%s6603_s25] sm:$0xff] }
 0xa87   :  { %v3852_v63 = vrot.slane %v3851_v61, 2 }
 0xa89   :  { %v3853_v14 = vadd.f32 %v3852_v63, %v3851_v61  ;;  %v4138_v61 = vld [vmem:[%s6603_s25 + $0x8] sm:$0xff]  ;;  %v4139_v63 = vld [vmem:[%s6603_s25 + $0x10] sm:$0xff] }
 0xa8b   :  { %v3854_v5 = vrot.slane %v3853_v14, 1 }
 0xa8d   :  { %v3855_v18 = vadd.f32 %v3854_v5, %v3853_v14  ;;  %v4676_v14 = vpack.c.bf16 %v4138_v61, %v4137_v60  ;;  %v4140_v5 = vld [vmem:[%s6603_s25 + $0x18] sm:$0xff] }
 0xa8f   :  { %v3857_v19 = vmul.f32 0.5, %v3855_v18  ;;  %v4679_v18 = vpack.c.bf16 %v4140_v5, %v4139_v63 }
 0xa91   :  { %v3858_v62 = vsub.f32 %v3845_v59, %v3857_v19  ;;  %v4332_v19 = vld [vmem:[%s6600_s22] ss:$0 sm:$0xff] }
 0xa93   :  { %v3859_v13 = vmul.f32 %v3858_v62, %v3858_v62 }
 0xa95   :  { %v3860_v30 = vsel %vm3848_vm2, %v3859_v13, 0.0 }
 0xa96   :  { %v3861_v31 = vrot.slane %v3860_v30, 4 }
 0xa98   :  { %v3862_v33 = vadd.f32 %v3861_v31, %v3860_v30 }
 0xa9a   :  { %v3863_v45 = vrot.slane %v3862_v33, 2 }
 0xa9c   :  { %v3864_v32 = vadd.f32 %v3863_v45, %v3862_v33 }
 0xa9e   :  { %v3865_v38 = vrot.slane %v3864_v32, 1 }
 0xaa0   :  { %v3866_v16 = vadd.f32 %v3865_v38, %v3864_v32 }
 0xaa2   :  { %v3867_v37 = vmul.f32 0.5, %v3866_v16 }
 0xaa4   :  { %v3868_v26 = vadd.f32 1e-05, %v3867_v37 }
 0xaa6   :  { %4701 = vrsqrt.f32 %v3868_v26 }
 0xab0   :  { %v4702_v39 = vpop.eup %4701 }
 0xab1   :  { %v3870_v41 = vmul.f32 %v4702_v39, %v3858_v62 }
 0xab3   :  { %v3877_v20 = vmul.f32 %v4326_v40, %v3870_v41 }
 0xab5   :  { %v3884_v8 = vadd.f32 %v4327_v9, %v3877_v20 }
 0xab7   :  { %vm3885_vm8 = vcmp.gt.f32.partialorder %v3884_v8, 0.0  ;;  %v3886_v57 = vmul.f32 0.01, %v3884_v8 }
 0xab9   :  { %v3887_v56 = vsel %vm3885_vm8, %v3884_v8, %v3886_v57 }
 0xaba   :  { %4627 = vmatmul.mubr.msk.f32.vlgmr.msra.gmra.mrb[40].mxu0 %vm3899_vm13, %v3887_v56 }
 0xabb   :  { %4648 = vmatprep.mubr.msk.f32.mxu0 %vm4740_vm0, %v4739_v21  ;;  %v4328_v21 = vld [vmem:[%s6596_s18] ss:$0 sm:$0xff]  ;;  %4677 = vmatpush3.bf16.msra.mxu0 %v4676_v14 }
 0xabc   :  { %4678 = vmatprep.subr.bf16.mxu0 %v4741_v6 }
 0xabf   :  { %4680 = vmatpush3.bf16.msra.mxu0 %v4679_v18 }
 0xb8d   :  { %v3969_v52 = vpop.f32.mrb[40].mxu0 }
 0xb8e   :  { %v3970_v53 = vadd.f32 %v4328_v21, %v3969_v52  ;;  %v4628_v54 = vpop.f32.mrb[41].mxu0 }
 0xb90   :  { %v3975_v55 = vsel %vm3848_vm2, %v3970_v53, 0.0 }
 0xb91   :  { %v3976_v4 = vrot.slane %v3975_v55, 4 }
 0xb93   :  { %v3977_v58 = vadd.f32 %v3976_v4, %v3975_v55  ;;  %v4336_v55 = vld [vmem:[%s6604_s26] ss:$0 sm:$0xff]  ;;  %s4711_s26 = scalar_lea.vmem %s4244_s24, 32 }
 0xb94   :  { %p4712_p0 = scmp.ne.s32.totalorder %s4244_s24, %s4711_s26  ;;  %p4717_p2 = scmp.lt.s32.totalorder %s4711_s26, %s4711_s26 }
 0xb95   :  { %v3978_v17 = vrot.slane %v3977_v58, 2 }
 0xb96   :  { %p4718_p3 = por %p4717_p2, %p4716_p1 }
 0xb97   :  { %v3979_v35 = vadd.f32 %v3978_v17, %v3977_v58 }
 0xb98   :  { %p4719_p4 = pnand %p4718_p3, %p4712_p0 }
 0xb99   :  { %v3980_v22 = vrot.slane %v3979_v35, 1 }
 0xb9b   :  { %v3981_v0 = vadd.f32 %v3980_v22, %v3979_v35 }
 0xb9d   :  { %v3982_v15 = vmul.f32 0.5, %v3981_v0 }
 0xb9f   :  { %v3983_v49 = vsub.f32 %v3970_v53, %v3982_v15 }
 0xba1   :  { %v3984_v27 = vmul.f32 %v3983_v49, %v3983_v49 }
 0xba3   :  { %v3985_v24 = vsel %vm3848_vm2, %v3984_v27, 0.0 }
 0xba4   :  { %v3986_v10 = vrot.slane %v3985_v24, 4 }
 0xba6   :  { %v3987_v2 = vadd.f32 %v3986_v10, %v3985_v24 }
 0xba8   :  { %v3988_v3 = vrot.slane %v3987_v2, 2 }
 0xbaa   :  { %v3989_v11 = vadd.f32 %v3988_v3, %v3987_v2 }
 0xbac   :  { %v3990_v12 = vrot.slane %v3989_v11, 1 }
 0xbae   :  { %v3991_v48 = vadd.f32 %v3990_v12, %v3989_v11 }
 0xbb0   :  { %v3992_v23 = vmul.f32 0.5, %v3991_v48 }
 0xbb2   :  { %v3993_v42 = vadd.f32 1e-05, %v3992_v23 }
 0xbb4   :  { %4703 = vrsqrt.f32 %v3993_v42 }
 0xbbe   :  { %v4704_v7 = vpop.eup %4703 }
 0xbbf   :  { %v3995_v28 = vmul.f32 %v4704_v7, %v3983_v49 }
 0xbc1   :  { %v4002_v36 = vmul.f32 %v4330_v25, %v3995_v28 }
 0xbc3   :  { %v4009_v34 = vadd.f32 %v4331_v29, %v4002_v36 }
 0xbc5   :  { %vm4010_vm1 = vcmp.gt.f32.partialorder %v4009_v34, 0.0  ;;  %v4011_v59 = vmul.f32 0.01, %v4009_v34 }
 0xbc7   :  { %v4012_v1 = vsel %vm4010_vm1, %v4009_v34, %v4011_v59 }
 0xbc8   :  { %4638 = vmatmul.mubr.msk.f32.vlgmr.msra.gmra.mrb[44].mxu1 %vm3899_vm13, %v4012_v1 }
 0xc9b   :  { %v4093_v62 = vpop.f32.mrb[44].mxu1 }
 0xc9c   :  { %v4094_v13 = vadd.f32 %v4332_v19, %v4093_v62  ;;  %v4639_v30 = vpop.f32.mrb[45].mxu1 }
 0xc9e   :  { %v4099_v31 = vsel %vm3848_vm2, %v4094_v13, 0.0 }
 0xc9f   :  { %v4100_v33 = vrot.slane %v4099_v31, 4 }
 0xca1   :  { %v4101_v45 = vadd.f32 %v4100_v33, %v4099_v31 }
 0xca3   :  { %v4102_v32 = vrot.slane %v4101_v45, 2 }
 0xca5   :  { %v4103_v38 = vadd.f32 %v4102_v32, %v4101_v45 }
 0xca7   :  { %v4104_v16 = vrot.slane %v4103_v38, 1 }
 0xca9   :  { %v4105_v37 = vadd.f32 %v4104_v16, %v4103_v38 }
 0xcab   :  { %v4106_v26 = vmul.f32 0.5, %v4105_v37 }
 0xcad   :  { %v4107_v39 = vsub.f32 %v4094_v13, %v4106_v26 }
 0xcaf   :  { %v4108_v40 = vmul.f32 %v4107_v39, %v4107_v39 }
 0xcb1   :  { %v4109_v6 = vsel %vm3848_vm2, %v4108_v40, 0.0 }
 0xcb2   :  { %v4110_v41 = vrot.slane %v4109_v6, 4 }
 0xcb4   :  { %v4111_v9 = vadd.f32 %v4110_v41, %v4109_v6 }
 0xcb6   :  { %v4112_v20 = vrot.slane %v4111_v9, 2 }
 0xcb8   :  { %v4113_v8 = vadd.f32 %v4112_v20, %v4111_v9 }
 0xcba   :  { %v4114_v57 = vrot.slane %v4113_v8, 1 }
 0xcbc   :  { %v4115_v56 = vadd.f32 %v4114_v57, %v4113_v8 }
 0xcbe   :  { %v4116_v47 = vmul.f32 0.5, %v4115_v56 }
 0xcc0   :  { %v4117_v43 = vadd.f32 1e-05, %v4116_v47 }
 0xcc2   :  { %4705 = vrsqrt.f32 %v4117_v43 }
 0xccc   :  { %v4706_v44 = vpop.eup %4705 }
 0xccd   :  { %v4119_v50 = vmul.f32 %v4706_v44, %v4107_v39 }
 0xccf   :  { %v4126_v21 = vmul.f32 %v4334_v46, %v4119_v50 }
 0xcd1   :  { %v4133_v52 = vadd.f32 %v4335_v51, %v4126_v21 }
 0xcd3   :  { %vm4134_vm3 = vcmp.gt.f32.partialorder %v4133_v52, 0.0  ;;  %v4135_v53 = vmul.f32 0.01, %v4133_v52 }
 0xcd5   :  { %v4136_v54 = vsel %vm4134_vm3, %v4133_v52, %v4135_v53 }
 0xcd6   :  { %4649 = vmatmul.mubr.msk.f32.vlgmr.msra.gmra.mrb[42].mxu0 %vm3899_vm13, %v4136_v54 }
 0xda9   :  { %v4217_v4 = vpop.f32.mrb[42].mxu0 }
 0xdaa   :  { %v4218_v58 = vadd.f32 %v4336_v55, %v4217_v4  ;;  %v4650_v17 = vpop.f32.mrb[43].mxu0 }
 0xdac   :  { %v4222_v35 = vmul.f32 0.01, %v4218_v58  ;;  %vm4221_vm5 = vcmp.gt.f32.partialorder %v4218_v58, 0.0 }
 0xdae   :  { %v4223_v22 = vsel %vm4221_vm5, %v4218_v58, %v4222_v35 }
 0xdaf   :  { %v4225_v0 = vsel %vm4224_vm6, %v4223_v22, -inf }
 0xdb0   :  { %4226 = vmax.xlane.f32.xlu1 %v4225_v0 }
 0xe3d   :  { %v4227_v15 = vpop.xlane.xlu1 %4226 }
 0xe3e   :  { %v4228_v49 = vsub.f32 %v4223_v22, %v4227_v15 }
 0xe40   :  { %v4229_v27 = vmul.f32 1.442695, %v4228_v49 }
 0xe42   :  { %4707 = vpow2.f32 %v4229_v27 }
 0xe4c   :  { %v4708_v24 = vpop.eup %4707 }
 0xe4d   :  { %v4231_v10 = vsel %vm4224_vm6, %v4708_v24, 0.0 }
 0xe4e   :  { %4232 = vadd.xlane.f32.xlu0 %v4231_v10 }
 0xedb   :  { %v4233_v2 = vpop.xlane.xlu0 %4232 }
 0xedc   :  { %4709 = vrcp.f32 %v4233_v2 }
 0xee6   :  { %v4710_v3 = vpop.eup %4709 }
 0xee7   :  { %v4235_v11 = vmul.f32 %v4710_v3, %v4708_v24 }
 0xee9   :  { %4236 = vst.msk [vmem:[#allocation8] sm:$0x3] %vm4224_vm6, %v4235_v11 }
 0xeea   :  { %4722 = shalt.err (!%p4719_p4)
}
 0xeeb   :  { %s4723_s11 = scalar_lea.hbm %s6605_s27, 32 }
 0xeec   :  { %p4724_p5 = scmp.ne.s32.totalorder %s6605_s27, %s4723_s11  ;;  %p4727_p6 = scmp.lt.u32.totalorder %s4723_s11, %s6605_s27 }
 0xeee   :  { %p4729_p7 = pnand %p4727_p6, %p4724_p5 }
 0xef0   :  { %4732 = shalt.err (!%p4729_p7)
}
 0xef1   :  { %4246 = dma.vmem_to_hbm [thread:$0]  %s4244_s24, 32, %s6605_s27, [#allocation9]  }
 0xef2   :  { %4733 = dma.done.wait [#allocation9], 32  }
 0xef3   :  { %4734 = vsyncadd [#allocation9], 4294967264 }
 0xef4   :  { %4250 = vsyncpa [#allocation9], 1 }

</bundles_post_ra>
